<compile_context>
chip_gen: v7x
topology: tpu7x:2x2x1
jax: 0.10.0
libtpu: 0.0.40
codegen_flags: <defaults>
</compile_context>

<pallas_src>
import functools
import numpy as np
import jax
import jax.numpy as jnp
from jax.experimental import pallas as pl
from jax.experimental.pallas import tpu as pltpu


def _layer_norm(v, g, b, eps=1e-5):
    mu = jnp.mean(v, axis=-1, keepdims=True)
    var = jnp.mean(jnp.square(v - mu), axis=-1, keepdims=True)
    return (v - mu) * jax.lax.rsqrt(var + eps) * g + b


# -----------------------------------------------------------------------------
# Fused kernel: cross-attention + LN + tanh-gate + reduction + LN
# for one (batch, query-block) tile.
# -----------------------------------------------------------------------------
def _pm_gated_xattn_kernel(x_ref, pos_ref, ctx_ref,
                           wq_ref, qb_ref, wk_ref, kb_ref, wv_ref, vb_ref,
                           wc_ref, cb_ref, gn_ref, bn_ref, alpha_ref,
                           wr_ref, gf_ref, bf_ref, o_ref,
                           *, num_heads, mm_dtype):
    E = wq_ref.shape[1]
    d = E // num_heads
    scale = jnp.float32(1.0 / np.sqrt(d))

    def mm(a, w):  # MXU matmul in mm_dtype with f32 accumulation
        return jnp.dot(a.astype(mm_dtype), w.astype(mm_dtype),
                       preferred_element_type=jnp.float32)

    x = x_ref[0].astype(jnp.float32)                       # (bq, 4C) merged tokens
    ctx = ctx_ref[0].astype(jnp.float32)                   # (S, Ckv)

    # --- projections (large MXU-friendly matmuls) -----------------------------
    xq = x + pos_ref[...].astype(jnp.float32)              # pos only feeds the query
    q = (mm(xq, wq_ref[...]) + qb_ref[...]) * scale        # (bq, E)
    k = mm(ctx, wk_ref[...]) + kb_ref[...]                 # (S, E)
    v = mm(ctx, wv_ref[...]) + vb_ref[...]                 # (S, E)

    # --- per-head attention with the output projection folded in (no concat) --
    acc = jnp.zeros((x.shape[0], wc_ref.shape[1]), jnp.float32)
    for h in range(num_heads):
        sl = slice(h * d, (h + 1) * d)
        qh = q[:, sl]
        kh = k[:, sl]
        logits = jnp.dot(qh, kh.T, preferred_element_type=jnp.float32)   # (bq, S)
        m = jnp.max(logits, axis=-1, keepdims=True)
        e = jnp.exp(logits - m)
        p = e * pl.reciprocal(jnp.sum(e, axis=-1, keepdims=True), approx=True)
        oh = jnp.dot(p, v[:, sl], preferred_element_type=jnp.float32)    # (bq, d)
        acc = acc + mm(oh, wc_ref[sl, :])                                # += oh @ Wc_h
    attn = acc + cb_ref[...]                                             # (bq, E)

    # CrossAttention's LayerNorm(4C)
    x_vl = _layer_norm(attn, gn_ref[...], bn_ref[...])

    # tanh-gated residual (gated variant: tanh(alpha) * x_vl + x)
    gate = jnp.tanh(alpha_ref[...])                                      # (1, 1)
    y = gate * x_vl + x

    # reduction Linear(4C -> 2C, no bias) + LayerNorm(2C)
    red = mm(y, wr_ref[...])                                             # (bq, 2C)
    o_ref[0] = _layer_norm(red, gf_ref[...], bf_ref[...]).astype(o_ref.dtype)


# -----------------------------------------------------------------------------
# Wrapper
# -----------------------------------------------------------------------------
def patch_merging_gated_attention_v3(x, context_prompts, params, *,
                                     input_resolution, num_heads,
                                     block_q=256, matmul_dtype=jnp.float32):
    H, W = input_resolution
    B, L, C = x.shape
    assert L == H * W, 'input feature has wrong size'
    assert H % 2 == 0 and W % 2 == 0
    E = 4 * C
    assert E % num_heads == 0

    # --- patch merging: pure layout plumbing, stays in XLA glue ---------------
    xh = x.reshape(B, H, W, C)
    xm = jnp.concatenate(
        [xh[:, 0::2, 0::2, :], xh[:, 1::2, 0::2, :],
         xh[:, 0::2, 1::2, :], xh[:, 1::2, 1::2, :]], axis=-1)
    Lq = (H // 2) * (W // 2)
    xm = xm.reshape(B, Lq, E)

    pos = params['pos_embed']                               # (Lq, E)

    # Query-row tiling: full rows when small; otherwise pad up to a multiple of
    # block_q so the pipeline stays 2-deep with bounded VMEM on every grid step.
    if Lq <= block_q:
        bq, pad = Lq, 0
    else:
        bq = block_q
        pad = (-Lq) % bq
        if pad:
            xm = jnp.pad(xm, ((0, 0), (0, pad), (0, 0)))
            pos = jnp.pad(pos, ((0, pad), (0, 0)))
    Lp = Lq + pad
    nq = Lp // bq

    S, Ckv = context_prompts.shape[1], context_prompts.shape[2]
    Cout = params['red_w_t'].shape[1]

    wcast = lambda w: w.astype(matmul_dtype)   # bf16 weight cast halves weight DMA
    kernel = functools.partial(_pm_gated_xattn_kernel,
                               num_heads=num_heads, mm_dtype=matmul_dtype)
    full = lambda b, qi: (0, 0)

    out = pl.pallas_call(
        kernel,
        out_shape=jax.ShapeDtypeStruct((B, Lp, Cout), x.dtype),
        grid=(B, nq),
        in_specs=[
            pl.BlockSpec((1, bq, E), lambda b, qi: (b, qi, 0)),    # merged tokens
            pl.BlockSpec((bq, E), lambda b, qi: (qi, 0)),          # pos embedding
            pl.BlockSpec((1, S, Ckv), lambda b, qi: (b, 0, 0)),    # context prompts
            pl.BlockSpec((E, E), full),                            # Wq^T
            pl.BlockSpec((1, E), full),                            # q bias
            pl.BlockSpec((Ckv, E), full),                          # Wk^T
            pl.BlockSpec((1, E), full),                            # k bias
            pl.BlockSpec((Ckv, E), full),                          # Wv^T
            pl.BlockSpec((1, E), full),                            # v bias
            pl.BlockSpec((E, E), full),                            # Wc^T
            pl.BlockSpec((1, E), full),                            # c bias
            pl.BlockSpec((1, E), full),                            # attn-LN weight
            pl.BlockSpec((1, E), full),                            # attn-LN bias
            pl.BlockSpec((1, 1), full),                            # vl_alpha
            pl.BlockSpec((E, Cout), full),                         # Wred^T
            pl.BlockSpec((1, Cout), full),                         # out-LN weight
            pl.BlockSpec((1, Cout), full),                         # out-LN bias
        ],
        out_specs=pl.BlockSpec((1, bq, Cout), lambda b, qi: (b, qi, 0)),
        compiler_params=pltpu.CompilerParams(
            dimension_semantics=("parallel", "parallel"),
            vmem_limit_bytes=48 * 1024 * 1024),
    )(xm, pos, context_prompts,
      wcast(params['q_w_t']), params['q_b'],
      wcast(params['k_w_t']), params['k_b'],
      wcast(params['v_w_t']), params['v_b'],
      wcast(params['c_w_t']), params['c_b'],
      params['attn_norm_w'], params['attn_norm_b'],
      params['vl_alpha'],
      wcast(params['red_w_t']),
      params['out_norm_w'], params['out_norm_b'])

    if pad:
        out = out[:, :Lq, :]
    return out


# -----------------------------------------------------------------------------
# Parameters (weights stored pre-transposed (in,out); biases pre-shaped 2-D so
# no per-call .T / reshape HBM copies -- "hoist weight prep" feedback).
# -----------------------------------------------------------------------------
def init_params(key, dim, num_heads, lm_d_model, input_resolution, reduce=True):
    H, W = input_resolution
    E = 4 * dim
    Cout = 2 * dim if reduce else 4 * dim
    Lq = (H // 2) * (W // 2)
    ks = jax.random.split(key, 7)
    s = 0.02
    f32 = jnp.float32
    return {
        # CrossAttention ------------------------------------------------------
        'pos_embed': jax.random.normal(ks[0], (Lq, E), f32) / np.sqrt(E),
        # q_proj is pinned to identity / zero bias by the module's __init__
        'q_w_t': jnp.eye(E, dtype=f32),
        'q_b': jnp.zeros((1, E), f32),
        'k_w_t': jax.random.normal(ks[1], (lm_d_model, E), f32) * s,
        'k_b': jax.random.normal(ks[2], (1, E), f32) * s,
        'v_w_t': jax.random.normal(ks[3], (lm_d_model, E), f32) * s,
        'v_b': jax.random.normal(ks[4], (1, E), f32) * s,
        'c_w_t': jax.random.normal(ks[5], (E, E), f32) * s,
        'c_b': jnp.zeros((1, E), f32),
        'attn_norm_w': jnp.ones((1, E), f32),
        'attn_norm_b': jnp.zeros((1, E), f32),
        # gating + merge head --------------------------------------------------
        # (module init is 0.0; non-zero keeps the cross-attn path numerically live)
        'vl_alpha': jnp.full((1, 1), 0.5, f32),
        'red_w_t': jax.random.normal(ks[6], (E, Cout), f32) * s,
        'out_norm_w': jnp.ones((1, Cout), f32),
        'out_norm_b': jnp.zeros((1, Cout), f32),
    }


# -----------------------------------------------------------------------------
# Pure-JAX reference (mirrors the PyTorch forward) for a correctness check.
# -----------------------------------------------------------------------------
def reference_forward(x, ctx, p, *, input_resolution, num_heads):
    H, W = input_resolution
    B, L, C = x.shape
    E = 4 * C
    d = E // num_heads
    hp = 'highest'
    xh = x.reshape(B, H, W, C)
    xm = jnp.concatenate(
        [xh[:, 0::2, 0::2, :], xh[:, 1::2, 0::2, :],
         xh[:, 0::2, 1::2, :], xh[:, 1::2, 1::2, :]], axis=-1).reshape(B, -1, E)

    xq = xm + p['pos_embed'][None]
    q = (jnp.matmul(xq, p['q_w_t'], precision=hp) + p['q_b']) * (d ** -0.5)
    k = jnp.matmul(ctx, p['k_w_t'], precision=hp) + p['k_b']
    v = jnp.matmul(ctx, p['v_w_t'], precision=hp) + p['v_b']

    def split(t):
        return t.reshape(t.shape[0], t.shape[1], num_heads, d).transpose(0, 2, 1, 3)
    qh, kh, vh = split(q), split(k), split(v)
    attn = jax.nn.softmax(
        jnp.einsum('bhqd,bhkd->bhqk', qh, kh, precision=hp), axis=-1)
    o = jnp.einsum('bhqk,bhkd->bhqd', attn, vh, precision=hp)
    o = o.transpose(0, 2, 1, 3).reshape(B, -1, E)
    o = jnp.matmul(o, p['c_w_t'], precision=hp) + p['c_b']

    def ln(t, g, b):
        mu = t.mean(-1, keepdims=True)
        var = ((t - mu) ** 2).mean(-1, keepdims=True)
        return (t - mu) / jnp.sqrt(var + 1e-5) * g + b

    x_vl = ln(o, p['attn_norm_w'], p['attn_norm_b'])
    y = jnp.tanh(p['vl_alpha'][0, 0]) * x_vl + xm
    red = jnp.matmul(y, p['red_w_t'], precision=hp)
    return ln(red, p['out_norm_w'], p['out_norm_b'])


if __name__ == "__main__":
    B = 2
    H, W = 16, 16               # input_resolution -> L = 256, merged Lq = 64
    dim = 64                    # C  -> 4C = 256, 2C = 128 (lane-dense output)
    num_heads = 4               # head_dim = 64
    lm_d_model = 128            # language-model prompt width (kv_dim)
    S = 32                      # number of context-prompt tokens

    key = jax.random.PRNGKey(0)
    kx, kc, kp = jax.random.split(key, 3)
    x = jax.random.normal(kx, (B, H * W, dim), jnp.float32)
    context_prompts = jax.random.normal(kc, (B, S, lm_d_model), jnp.float32)
    params = init_params(kp, dim, num_heads, lm_d_model, (H, W))

    out = patch_merging_gated_attention_v3(
        x, context_prompts, params,
        input_resolution=(H, W), num_heads=num_heads)
    out = jax.block_until_ready(out)

    assert out.shape == (B, (H // 2) * (W // 2), 2 * dim), out.shape
    assert bool(jnp.all(jnp.isfinite(out)))

    ref = reference_forward(x, context_prompts, params,
                            input_resolution=(H, W), num_heads=num_heads)
    assert bool(jnp.allclose(out, ref, rtol=5e-2, atol=5e-2)), \
        float(jnp.max(jnp.abs(out - ref)))

    print("KERNEL_OK")
</pallas_src>

<mosaic_0001>
module attributes {stable_mosaic.version = 11 : i64} {
  func.func @_pm_gated_xattn_kernel(%arg0: i32, %arg1: i32, %arg2: memref<1x64x256xf32, #tpu.memory_space<vmem>>, %arg3: memref<64x256xf32, #tpu.memory_space<vmem>>, %arg4: memref<1x32x128xf32, #tpu.memory_space<vmem>>, %arg5: memref<256x256xf32, #tpu.memory_space<vmem>>, %arg6: memref<1x256xf32, #tpu.memory_space<vmem>>, %arg7: memref<128x256xf32, #tpu.memory_space<vmem>>, %arg8: memref<1x256xf32, #tpu.memory_space<vmem>>, %arg9: memref<128x256xf32, #tpu.memory_space<vmem>>, %arg10: memref<1x256xf32, #tpu.memory_space<vmem>>, %arg11: memref<256x256xf32, #tpu.memory_space<vmem>>, %arg12: memref<1x256xf32, #tpu.memory_space<vmem>>, %arg13: memref<1x256xf32, #tpu.memory_space<vmem>>, %arg14: memref<1x256xf32, #tpu.memory_space<vmem>>, %arg15: memref<1x1xf32, #tpu.memory_space<vmem>>, %arg16: memref<256x128xf32, #tpu.memory_space<vmem>>, %arg17: memref<1x128xf32, #tpu.memory_space<vmem>>, %arg18: memref<1x128xf32, #tpu.memory_space<vmem>>, %arg19: memref<1x64x128xf32, #tpu.memory_space<vmem>>) attributes {dimension_semantics = [#tpu.dimension_semantics<parallel>, #tpu.dimension_semantics<parallel>], iteration_bounds = array<i64: 2, 1>, scalar_prefetch = 0 : i64, scratch_operands = 0 : i64, tpu.core_type = #tpu.core_type<tc>, window_params = [{transform_indices = @transform_0, window_bounds = array<i64: 1, 64, 256>}, {transform_indices = @transform_1, window_bounds = array<i64: 64, 256>}, {transform_indices = @transform_2, window_bounds = array<i64: 1, 32, 128>}, {pipeline_mode = #tpu.pipeline_mode<synchronous>, transform_indices = @transform_3, window_bounds = array<i64: 256, 256>}, {pipeline_mode = #tpu.pipeline_mode<synchronous>, transform_indices = @transform_4, window_bounds = array<i64: 1, 256>}, {pipeline_mode = #tpu.pipeline_mode<synchronous>, transform_indices = @transform_5, window_bounds = array<i64: 128, 256>}, {pipeline_mode = #tpu.pipeline_mode<synchronous>, transform_indices = @transform_6, window_bounds = array<i64: 1, 256>}, {pipeline_mode = #tpu.pipeline_mode<synchronous>, transform_indices = @transform_7, window_bounds = array<i64: 128, 256>}, {pipeline_mode = #tpu.pipeline_mode<synchronous>, transform_indices = @transform_8, window_bounds = array<i64: 1, 256>}, {pipeline_mode = #tpu.pipeline_mode<synchronous>, transform_indices = @transform_9, window_bounds = array<i64: 256, 256>}, {pipeline_mode = #tpu.pipeline_mode<synchronous>, transform_indices = @transform_10, window_bounds = array<i64: 1, 256>}, {pipeline_mode = #tpu.pipeline_mode<synchronous>, transform_indices = @transform_11, window_bounds = array<i64: 1, 256>}, {pipeline_mode = #tpu.pipeline_mode<synchronous>, transform_indices = @transform_12, window_bounds = array<i64: 1, 256>}, {pipeline_mode = #tpu.pipeline_mode<synchronous>, transform_indices = @transform_13, window_bounds = array<i64: 1, 1>}, {pipeline_mode = #tpu.pipeline_mode<synchronous>, transform_indices = @transform_14, window_bounds = array<i64: 256, 128>}, {pipeline_mode = #tpu.pipeline_mode<synchronous>, transform_indices = @transform_15, window_bounds = array<i64: 1, 128>}, {pipeline_mode = #tpu.pipeline_mode<synchronous>, transform_indices = @transform_16, window_bounds = array<i64: 1, 128>}, {transform_indices = @transform_17, window_bounds = array<i64: 1, 64, 128>}]} {
    %c0 = arith.constant 0 : index
    %c0_0 = arith.constant 0 : index
    %c0_1 = arith.constant 0 : index
    %0 = vector.load %arg2[%c0, %c0_0, %c0_1] : memref<1x64x256xf32, #tpu.memory_space<vmem>>, vector<1x64x256xf32>
    %1 = vector.shape_cast %0 : vector<1x64x256xf32> to vector<64x256xf32>
    %c0_2 = arith.constant 0 : index
    %c0_3 = arith.constant 0 : index
    %c0_4 = arith.constant 0 : index
    %2 = vector.load %arg4[%c0_2, %c0_3, %c0_4] : memref<1x32x128xf32, #tpu.memory_space<vmem>>, vector<1x32x128xf32>
    %3 = vector.shape_cast %2 : vector<1x32x128xf32> to vector<32x128xf32>
    %c0_5 = arith.constant 0 : index
    %c0_6 = arith.constant 0 : index
    %4 = vector.load %arg3[%c0_5, %c0_6] : memref<64x256xf32, #tpu.memory_space<vmem>>, vector<64x256xf32>
    %5 = arith.addf %1, %4 : vector<64x256xf32>
    %c0_7 = arith.constant 0 : index
    %c0_8 = arith.constant 0 : index
    %6 = vector.load %arg5[%c0_7, %c0_8] : memref<256x256xf32, #tpu.memory_space<vmem>>, vector<256x256xf32>
    %cst = arith.constant dense<0.000000e+00> : vector<64x256xf32>
    %7 = tpu.matmul %5, %6, %cst {dimension_numbers = #tpu.dot_dimension_numbers<[1], [0], [0], [1], [0, 0, 1, 1], [], []>} : vector<64x256xf32>, vector<256x256xf32>, vector<64x256xf32> -> vector<64x256xf32>
    %c0_9 = arith.constant 0 : index
    %c0_10 = arith.constant 0 : index
    %8 = vector.load %arg6[%c0_9, %c0_10] : memref<1x256xf32, #tpu.memory_space<vmem>>, vector<1x256xf32>
    %9 = vector.broadcast %8 : vector<1x256xf32> to vector<64x256xf32>
    %10 = arith.addf %7, %9 : vector<64x256xf32>
    %cst_11 = arith.constant 1.250000e-01 : f32
    %11 = vector.broadcast %cst_11 : f32 to vector<64x256xf32>
    %12 = arith.mulf %10, %11 : vector<64x256xf32>
    %c0_12 = arith.constant 0 : index
    %c0_13 = arith.constant 0 : index
    %13 = vector.load %arg7[%c0_12, %c0_13] : memref<128x256xf32, #tpu.memory_space<vmem>>, vector<128x256xf32>
    %cst_14 = arith.constant dense<0.000000e+00> : vector<32x256xf32>
    %14 = tpu.matmul %3, %13, %cst_14 {dimension_numbers = #tpu.dot_dimension_numbers<[1], [0], [0], [1], [0, 0, 1, 1], [], []>} : vector<32x128xf32>, vector<128x256xf32>, vector<32x256xf32> -> vector<32x256xf32>
    %c0_15 = arith.constant 0 : index
    %c0_16 = arith.constant 0 : index
    %15 = vector.load %arg8[%c0_15, %c0_16] : memref<1x256xf32, #tpu.memory_space<vmem>>, vector<1x256xf32>
    %16 = vector.broadcast %15 : vector<1x256xf32> to vector<32x256xf32>
    %17 = arith.addf %14, %16 : vector<32x256xf32>
    %c0_17 = arith.constant 0 : index
    %c0_18 = arith.constant 0 : index
    %18 = vector.load %arg9[%c0_17, %c0_18] : memref<128x256xf32, #tpu.memory_space<vmem>>, vector<128x256xf32>
    %cst_19 = arith.constant dense<0.000000e+00> : vector<32x256xf32>
    %19 = tpu.matmul %3, %18, %cst_19 {dimension_numbers = #tpu.dot_dimension_numbers<[1], [0], [0], [1], [0, 0, 1, 1], [], []>} : vector<32x128xf32>, vector<128x256xf32>, vector<32x256xf32> -> vector<32x256xf32>
    %c0_20 = arith.constant 0 : index
    %c0_21 = arith.constant 0 : index
    %20 = vector.load %arg10[%c0_20, %c0_21] : memref<1x256xf32, #tpu.memory_space<vmem>>, vector<1x256xf32>
    %21 = vector.broadcast %20 : vector<1x256xf32> to vector<32x256xf32>
    %22 = arith.addf %19, %21 : vector<32x256xf32>
    %cst_22 = arith.constant 0.000000e+00 : f32
    %23 = vector.broadcast %cst_22 : f32 to vector<64x256xf32>
    %24 = vector.extract_strided_slice %12 {offsets = [0, 0], sizes = [64, 64], strides = [1, 1]} : vector<64x256xf32> to vector<64x64xf32>
    %25 = vector.extract_strided_slice %17 {offsets = [0, 0], sizes = [32, 64], strides = [1, 1]} : vector<32x256xf32> to vector<32x64xf32>
    %26 = tpu.transpose %25, [1, 0] : vector<32x64xf32> -> vector<64x32xf32>
    %cst_23 = arith.constant dense<0.000000e+00> : vector<64x32xf32>
    %27 = tpu.matmul %24, %26, %cst_23 {dimension_numbers = #tpu.dot_dimension_numbers<[1], [0], [0], [1], [0, 0, 1, 1], [], []>} : vector<64x64xf32>, vector<64x32xf32>, vector<64x32xf32> -> vector<64x32xf32>
    %cst_24 = arith.constant dense<0xFF800000> : vector<64xf32>
    %28 = vector.multi_reduction <maximumf>, %27, %cst_24 [1] : vector<64x32xf32> to vector<64xf32>
    %29 = vector.shape_cast %28 : vector<64xf32> to vector<64x1xf32>
    %30 = vector.broadcast %29 : vector<64x1xf32> to vector<64x32xf32>
    %31 = arith.subf %27, %30 : vector<64x32xf32>
    %32 = math.exp %31 : vector<64x32xf32>
    %cst_25 = arith.constant dense<0.000000e+00> : vector<64xf32>
    %33 = vector.multi_reduction <add>, %32, %cst_25 [1] : vector<64x32xf32> to vector<64xf32>
    %34 = vector.shape_cast %33 : vector<64xf32> to vector<64x1xf32>
    %35 = tpu.reciprocal %34 {approx = true} : vector<64x1xf32> -> vector<64x1xf32>
    %36 = vector.broadcast %35 : vector<64x1xf32> to vector<64x32xf32>
    %37 = arith.mulf %32, %36 : vector<64x32xf32>
    %38 = vector.extract_strided_slice %22 {offsets = [0, 0], sizes = [32, 64], strides = [1, 1]} : vector<32x256xf32> to vector<32x64xf32>
    %cst_26 = arith.constant dense<0.000000e+00> : vector<64x64xf32>
    %39 = tpu.matmul %37, %38, %cst_26 {dimension_numbers = #tpu.dot_dimension_numbers<[1], [0], [0], [1], [0, 0, 1, 1], [], []>} : vector<64x32xf32>, vector<32x64xf32>, vector<64x64xf32> -> vector<64x64xf32>
    %c0_27 = arith.constant 0 : index
    %c0_28 = arith.constant 0 : index
    %40 = vector.load %arg11[%c0_27, %c0_28] : memref<256x256xf32, #tpu.memory_space<vmem>>, vector<64x256xf32>
    %cst_29 = arith.constant dense<0.000000e+00> : vector<64x256xf32>
    %41 = tpu.matmul %39, %40, %cst_29 {dimension_numbers = #tpu.dot_dimension_numbers<[1], [0], [0], [1], [0, 0, 1, 1], [], []>} : vector<64x64xf32>, vector<64x256xf32>, vector<64x256xf32> -> vector<64x256xf32>
    %42 = arith.addf %23, %41 : vector<64x256xf32>
    %43 = vector.extract_strided_slice %12 {offsets = [0, 64], sizes = [64, 64], strides = [1, 1]} : vector<64x256xf32> to vector<64x64xf32>
    %44 = vector.extract_strided_slice %17 {offsets = [0, 64], sizes = [32, 64], strides = [1, 1]} : vector<32x256xf32> to vector<32x64xf32>
    %45 = tpu.transpose %44, [1, 0] : vector<32x64xf32> -> vector<64x32xf32>
    %cst_30 = arith.constant dense<0.000000e+00> : vector<64x32xf32>
    %46 = tpu.matmul %43, %45, %cst_30 {dimension_numbers = #tpu.dot_dimension_numbers<[1], [0], [0], [1], [0, 0, 1, 1], [], []>} : vector<64x64xf32>, vector<64x32xf32>, vector<64x32xf32> -> vector<64x32xf32>
    %cst_31 = arith.constant dense<0xFF800000> : vector<64xf32>
    %47 = vector.multi_reduction <maximumf>, %46, %cst_31 [1] : vector<64x32xf32> to vector<64xf32>
    %48 = vector.shape_cast %47 : vector<64xf32> to vector<64x1xf32>
    %49 = vector.broadcast %48 : vector<64x1xf32> to vector<64x32xf32>
    %50 = arith.subf %46, %49 : vector<64x32xf32>
    %51 = math.exp %50 : vector<64x32xf32>
    %cst_32 = arith.constant dense<0.000000e+00> : vector<64xf32>
    %52 = vector.multi_reduction <add>, %51, %cst_32 [1] : vector<64x32xf32> to vector<64xf32>
    %53 = vector.shape_cast %52 : vector<64xf32> to vector<64x1xf32>
    %54 = tpu.reciprocal %53 {approx = true} : vector<64x1xf32> -> vector<64x1xf32>
    %55 = vector.broadcast %54 : vector<64x1xf32> to vector<64x32xf32>
    %56 = arith.mulf %51, %55 : vector<64x32xf32>
    %57 = vector.extract_strided_slice %22 {offsets = [0, 64], sizes = [32, 64], strides = [1, 1]} : vector<32x256xf32> to vector<32x64xf32>
    %cst_33 = arith.constant dense<0.000000e+00> : vector<64x64xf32>
    %58 = tpu.matmul %56, %57, %cst_33 {dimension_numbers = #tpu.dot_dimension_numbers<[1], [0], [0], [1], [0, 0, 1, 1], [], []>} : vector<64x32xf32>, vector<32x64xf32>, vector<64x64xf32> -> vector<64x64xf32>
    %c64 = arith.constant 64 : index
    %c0_34 = arith.constant 0 : index
    %59 = vector.load %arg11[%c64, %c0_34] : memref<256x256xf32, #tpu.memory_space<vmem>>, vector<64x256xf32>
    %cst_35 = arith.constant dense<0.000000e+00> : vector<64x256xf32>
    %60 = tpu.matmul %58, %59, %cst_35 {dimension_numbers = #tpu.dot_dimension_numbers<[1], [0], [0], [1], [0, 0, 1, 1], [], []>} : vector<64x64xf32>, vector<64x256xf32>, vector<64x256xf32> -> vector<64x256xf32>
    %61 = arith.addf %42, %60 : vector<64x256xf32>
    %62 = vector.extract_strided_slice %12 {offsets = [0, 128], sizes = [64, 64], strides = [1, 1]} : vector<64x256xf32> to vector<64x64xf32>
    %63 = vector.extract_strided_slice %17 {offsets = [0, 128], sizes = [32, 64], strides = [1, 1]} : vector<32x256xf32> to vector<32x64xf32>
    %64 = tpu.transpose %63, [1, 0] : vector<32x64xf32> -> vector<64x32xf32>
    %cst_36 = arith.constant dense<0.000000e+00> : vector<64x32xf32>
    %65 = tpu.matmul %62, %64, %cst_36 {dimension_numbers = #tpu.dot_dimension_numbers<[1], [0], [0], [1], [0, 0, 1, 1], [], []>} : vector<64x64xf32>, vector<64x32xf32>, vector<64x32xf32> -> vector<64x32xf32>
    %cst_37 = arith.constant dense<0xFF800000> : vector<64xf32>
    %66 = vector.multi_reduction <maximumf>, %65, %cst_37 [1] : vector<64x32xf32> to vector<64xf32>
    %67 = vector.shape_cast %66 : vector<64xf32> to vector<64x1xf32>
    %68 = vector.broadcast %67 : vector<64x1xf32> to vector<64x32xf32>
    %69 = arith.subf %65, %68 : vector<64x32xf32>
    %70 = math.exp %69 : vector<64x32xf32>
    %cst_38 = arith.constant dense<0.000000e+00> : vector<64xf32>
    %71 = vector.multi_reduction <add>, %70, %cst_38 [1] : vector<64x32xf32> to vector<64xf32>
    %72 = vector.shape_cast %71 : vector<64xf32> to vector<64x1xf32>
    %73 = tpu.reciprocal %72 {approx = true} : vector<64x1xf32> -> vector<64x1xf32>
    %74 = vector.broadcast %73 : vector<64x1xf32> to vector<64x32xf32>
    %75 = arith.mulf %70, %74 : vector<64x32xf32>
    %76 = vector.extract_strided_slice %22 {offsets = [0, 128], sizes = [32, 64], strides = [1, 1]} : vector<32x256xf32> to vector<32x64xf32>
    %cst_39 = arith.constant dense<0.000000e+00> : vector<64x64xf32>
    %77 = tpu.matmul %75, %76, %cst_39 {dimension_numbers = #tpu.dot_dimension_numbers<[1], [0], [0], [1], [0, 0, 1, 1], [], []>} : vector<64x32xf32>, vector<32x64xf32>, vector<64x64xf32> -> vector<64x64xf32>
    %c128 = arith.constant 128 : index
    %c0_40 = arith.constant 0 : index
    %78 = vector.load %arg11[%c128, %c0_40] : memref<256x256xf32, #tpu.memory_space<vmem>>, vector<64x256xf32>
    %cst_41 = arith.constant dense<0.000000e+00> : vector<64x256xf32>
    %79 = tpu.matmul %77, %78, %cst_41 {dimension_numbers = #tpu.dot_dimension_numbers<[1], [0], [0], [1], [0, 0, 1, 1], [], []>} : vector<64x64xf32>, vector<64x256xf32>, vector<64x256xf32> -> vector<64x256xf32>
    %80 = arith.addf %61, %79 : vector<64x256xf32>
    %81 = vector.extract_strided_slice %12 {offsets = [0, 192], sizes = [64, 64], strides = [1, 1]} : vector<64x256xf32> to vector<64x64xf32>
    %82 = vector.extract_strided_slice %17 {offsets = [0, 192], sizes = [32, 64], strides = [1, 1]} : vector<32x256xf32> to vector<32x64xf32>
    %83 = tpu.transpose %82, [1, 0] : vector<32x64xf32> -> vector<64x32xf32>
    %cst_42 = arith.constant dense<0.000000e+00> : vector<64x32xf32>
    %84 = tpu.matmul %81, %83, %cst_42 {dimension_numbers = #tpu.dot_dimension_numbers<[1], [0], [0], [1], [0, 0, 1, 1], [], []>} : vector<64x64xf32>, vector<64x32xf32>, vector<64x32xf32> -> vector<64x32xf32>
    %cst_43 = arith.constant dense<0xFF800000> : vector<64xf32>
    %85 = vector.multi_reduction <maximumf>, %84, %cst_43 [1] : vector<64x32xf32> to vector<64xf32>
    %86 = vector.shape_cast %85 : vector<64xf32> to vector<64x1xf32>
    %87 = vector.broadcast %86 : vector<64x1xf32> to vector<64x32xf32>
    %88 = arith.subf %84, %87 : vector<64x32xf32>
    %89 = math.exp %88 : vector<64x32xf32>
    %cst_44 = arith.constant dense<0.000000e+00> : vector<64xf32>
    %90 = vector.multi_reduction <add>, %89, %cst_44 [1] : vector<64x32xf32> to vector<64xf32>
    %91 = vector.shape_cast %90 : vector<64xf32> to vector<64x1xf32>
    %92 = tpu.reciprocal %91 {approx = true} : vector<64x1xf32> -> vector<64x1xf32>
    %93 = vector.broadcast %92 : vector<64x1xf32> to vector<64x32xf32>
    %94 = arith.mulf %89, %93 : vector<64x32xf32>
    %95 = vector.extract_strided_slice %22 {offsets = [0, 192], sizes = [32, 64], strides = [1, 1]} : vector<32x256xf32> to vector<32x64xf32>
    %cst_45 = arith.constant dense<0.000000e+00> : vector<64x64xf32>
    %96 = tpu.matmul %94, %95, %cst_45 {dimension_numbers = #tpu.dot_dimension_numbers<[1], [0], [0], [1], [0, 0, 1, 1], [], []>} : vector<64x32xf32>, vector<32x64xf32>, vector<64x64xf32> -> vector<64x64xf32>
    %c192 = arith.constant 192 : index
    %c0_46 = arith.constant 0 : index
    %97 = vector.load %arg11[%c192, %c0_46] : memref<256x256xf32, #tpu.memory_space<vmem>>, vector<64x256xf32>
    %cst_47 = arith.constant dense<0.000000e+00> : vector<64x256xf32>
    %98 = tpu.matmul %96, %97, %cst_47 {dimension_numbers = #tpu.dot_dimension_numbers<[1], [0], [0], [1], [0, 0, 1, 1], [], []>} : vector<64x64xf32>, vector<64x256xf32>, vector<64x256xf32> -> vector<64x256xf32>
    %99 = arith.addf %80, %98 : vector<64x256xf32>
    %c0_48 = arith.constant 0 : index
    %c0_49 = arith.constant 0 : index
    %100 = vector.load %arg12[%c0_48, %c0_49] : memref<1x256xf32, #tpu.memory_space<vmem>>, vector<1x256xf32>
    %101 = vector.broadcast %100 : vector<1x256xf32> to vector<64x256xf32>
    %102 = arith.addf %99, %101 : vector<64x256xf32>
    %c0_50 = arith.constant 0 : index
    %c0_51 = arith.constant 0 : index
    %103 = vector.load %arg13[%c0_50, %c0_51] : memref<1x256xf32, #tpu.memory_space<vmem>>, vector<1x256xf32>
    %c0_52 = arith.constant 0 : index
    %c0_53 = arith.constant 0 : index
    %104 = vector.load %arg14[%c0_52, %c0_53] : memref<1x256xf32, #tpu.memory_space<vmem>>, vector<1x256xf32>
    %cst_54 = arith.constant dense<0.000000e+00> : vector<64xf32>
    %105 = vector.multi_reduction <add>, %102, %cst_54 [1] : vector<64x256xf32> to vector<64xf32>
    %106 = vector.shape_cast %105 : vector<64xf32> to vector<64x1xf32>
    %cst_55 = arith.constant 2.560000e+02 : f32
    %107 = vector.broadcast %cst_55 : f32 to vector<64x1xf32>
    %108 = arith.divf %106, %107 : vector<64x1xf32>
    %109 = vector.broadcast %108 : vector<64x1xf32> to vector<64x256xf32>
    %110 = arith.subf %102, %109 : vector<64x256xf32>
    %111 = arith.mulf %110, %110 : vector<64x256xf32>
    %cst_56 = arith.constant dense<0.000000e+00> : vector<64xf32>
    %112 = vector.multi_reduction <add>, %111, %cst_56 [1] : vector<64x256xf32> to vector<64xf32>
    %113 = vector.shape_cast %112 : vector<64xf32> to vector<64x1xf32>
    %cst_57 = arith.constant 2.560000e+02 : f32
    %114 = vector.broadcast %cst_57 : f32 to vector<64x1xf32>
    %115 = arith.divf %113, %114 : vector<64x1xf32>
    %116 = vector.broadcast %108 : vector<64x1xf32> to vector<64x256xf32>
    %117 = arith.subf %102, %116 : vector<64x256xf32>
    %cst_58 = arith.constant 9.99999974E-6 : f32
    %118 = vector.broadcast %cst_58 : f32 to vector<64x1xf32>
    %119 = arith.addf %115, %118 : vector<64x1xf32>
    %120 = math.rsqrt %119 : vector<64x1xf32>
    %121 = vector.broadcast %120 : vector<64x1xf32> to vector<64x256xf32>
    %122 = arith.mulf %117, %121 : vector<64x256xf32>
    %123 = vector.broadcast %103 : vector<1x256xf32> to vector<64x256xf32>
    %124 = arith.mulf %122, %123 : vector<64x256xf32>
    %125 = vector.broadcast %104 : vector<1x256xf32> to vector<64x256xf32>
    %126 = arith.addf %124, %125 : vector<64x256xf32>
    %c0_59 = arith.constant 0 : index
    %c0_60 = arith.constant 0 : index
    %127 = vector.load %arg15[%c0_59, %c0_60] : memref<1x1xf32, #tpu.memory_space<vmem>>, vector<1x1xf32>
    %128 = math.tanh %127 : vector<1x1xf32>
    %129 = vector.broadcast %128 : vector<1x1xf32> to vector<64x256xf32>
    %130 = arith.mulf %129, %126 : vector<64x256xf32>
    %131 = arith.addf %130, %1 : vector<64x256xf32>
    %c0_61 = arith.constant 0 : index
    %c0_62 = arith.constant 0 : index
    %132 = vector.load %arg16[%c0_61, %c0_62] : memref<256x128xf32, #tpu.memory_space<vmem>>, vector<256x128xf32>
    %cst_63 = arith.constant dense<0.000000e+00> : vector<64x128xf32>
    %133 = tpu.matmul %131, %132, %cst_63 {dimension_numbers = #tpu.dot_dimension_numbers<[1], [0], [0], [1], [0, 0, 1, 1], [], []>} : vector<64x256xf32>, vector<256x128xf32>, vector<64x128xf32> -> vector<64x128xf32>
    %c0_64 = arith.constant 0 : index
    %c0_65 = arith.constant 0 : index
    %134 = vector.load %arg17[%c0_64, %c0_65] : memref<1x128xf32, #tpu.memory_space<vmem>>, vector<1x128xf32>
    %c0_66 = arith.constant 0 : index
    %c0_67 = arith.constant 0 : index
    %135 = vector.load %arg18[%c0_66, %c0_67] : memref<1x128xf32, #tpu.memory_space<vmem>>, vector<1x128xf32>
    %cst_68 = arith.constant dense<0.000000e+00> : vector<64xf32>
    %136 = vector.multi_reduction <add>, %133, %cst_68 [1] : vector<64x128xf32> to vector<64xf32>
    %137 = vector.shape_cast %136 : vector<64xf32> to vector<64x1xf32>
    %cst_69 = arith.constant 1.280000e+02 : f32
    %138 = vector.broadcast %cst_69 : f32 to vector<64x1xf32>
    %139 = arith.divf %137, %138 : vector<64x1xf32>
    %140 = vector.broadcast %139 : vector<64x1xf32> to vector<64x128xf32>
    %141 = arith.subf %133, %140 : vector<64x128xf32>
    %142 = arith.mulf %141, %141 : vector<64x128xf32>
    %cst_70 = arith.constant dense<0.000000e+00> : vector<64xf32>
    %143 = vector.multi_reduction <add>, %142, %cst_70 [1] : vector<64x128xf32> to vector<64xf32>
    %144 = vector.shape_cast %143 : vector<64xf32> to vector<64x1xf32>
    %cst_71 = arith.constant 1.280000e+02 : f32
    %145 = vector.broadcast %cst_71 : f32 to vector<64x1xf32>
    %146 = arith.divf %144, %145 : vector<64x1xf32>
    %147 = vector.broadcast %139 : vector<64x1xf32> to vector<64x128xf32>
    %148 = arith.subf %133, %147 : vector<64x128xf32>
    %cst_72 = arith.constant 9.99999974E-6 : f32
    %149 = vector.broadcast %cst_72 : f32 to vector<64x1xf32>
    %150 = arith.addf %146, %149 : vector<64x1xf32>
    %151 = math.rsqrt %150 : vector<64x1xf32>
    %152 = vector.broadcast %151 : vector<64x1xf32> to vector<64x128xf32>
    %153 = arith.mulf %148, %152 : vector<64x128xf32>
    %154 = vector.broadcast %134 : vector<1x128xf32> to vector<64x128xf32>
    %155 = arith.mulf %153, %154 : vector<64x128xf32>
    %156 = vector.broadcast %135 : vector<1x128xf32> to vector<64x128xf32>
    %157 = arith.addf %155, %156 : vector<64x128xf32>
    %c0_73 = arith.constant 0 : index
    %c0_74 = arith.constant 0 : index
    %c0_75 = arith.constant 0 : index
    %158 = vector.load %arg19[%c0_73, %c0_74, %c0_75] : memref<1x64x128xf32, #tpu.memory_space<vmem>>, vector<1x64x128xf32>
    %159 = vector.shape_cast %158 : vector<1x64x128xf32> to vector<64x128xf32>
    %160 = vector.shape_cast %157 : vector<64x128xf32> to vector<1x64x128xf32>
    tpu.vector_store %arg19[%c0_73, %c0_74, %c0_75], %160 {strides = array<i32>} : memref<1x64x128xf32, #tpu.memory_space<vmem>>, vector<1x64x128xf32>,
    return
  }
  func.func @transform_0(%arg0: i32, %arg1: i32) -> (i32, i32, i32) {
    %c0_i32 = arith.constant 0 : i32
    %c0_i32_0 = arith.constant 0 : i32
    return %arg0, %arg1, %c0_i32 : i32, i32, i32
  }
  func.func @transform_1(%arg0: i32, %arg1: i32) -> (i32, i32) {
    %c0_i32 = arith.constant 0 : i32
    %c0_i32_0 = arith.constant 0 : i32
    return %arg1, %c0_i32 : i32, i32
  }
  func.func @transform_2(%arg0: i32, %arg1: i32) -> (i32, i32, i32) {
    %c0_i32 = arith.constant 0 : i32
    %c0_i32_0 = arith.constant 0 : i32
    %c0_i32_1 = arith.constant 0 : i32
    return %arg0, %c0_i32, %c0_i32_0 : i32, i32, i32
  }
  func.func @transform_3(%arg0: i32, %arg1: i32) -> (i32, i32) {
    %c0_i32 = arith.constant 0 : i32
    %c0_i32_0 = arith.constant 0 : i32
    %c0_i32_1 = arith.constant 0 : i32
    return %c0_i32, %c0_i32_0 : i32, i32
  }
  func.func @transform_4(%arg0: i32, %arg1: i32) -> (i32, i32) {
    %c0_i32 = arith.constant 0 : i32
    %c0_i32_0 = arith.constant 0 : i32
    %c0_i32_1 = arith.constant 0 : i32
    return %c0_i32, %c0_i32_0 : i32, i32
  }
  func.func @transform_5(%arg0: i32, %arg1: i32) -> (i32, i32) {
    %c0_i32 = arith.constant 0 : i32
    %c0_i32_0 = arith.constant 0 : i32
    %c0_i32_1 = arith.constant 0 : i32
    return %c0_i32, %c0_i32_0 : i32, i32
  }
  func.func @transform_6(%arg0: i32, %arg1: i32) -> (i32, i32) {
    %c0_i32 = arith.constant 0 : i32
    %c0_i32_0 = arith.constant 0 : i32
    %c0_i32_1 = arith.constant 0 : i32
    return %c0_i32, %c0_i32_0 : i32, i32
  }
  func.func @transform_7(%arg0: i32, %arg1: i32) -> (i32, i32) {
    %c0_i32 = arith.constant 0 : i32
    %c0_i32_0 = arith.constant 0 : i32
    %c0_i32_1 = arith.constant 0 : i32
    return %c0_i32, %c0_i32_0 : i32, i32
  }
  func.func @transform_8(%arg0: i32, %arg1: i32) -> (i32, i32) {
    %c0_i32 = arith.constant 0 : i32
    %c0_i32_0 = arith.constant 0 : i32
    %c0_i32_1 = arith.constant 0 : i32
    return %c0_i32, %c0_i32_0 : i32, i32
  }
  func.func @transform_9(%arg0: i32, %arg1: i32) -> (i32, i32) {
    %c0_i32 = arith.constant 0 : i32
    %c0_i32_0 = arith.constant 0 : i32
    %c0_i32_1 = arith.constant 0 : i32
    return %c0_i32, %c0_i32_0 : i32, i32
  }
  func.func @transform_10(%arg0: i32, %arg1: i32) -> (i32, i32) {
    %c0_i32 = arith.constant 0 : i32
    %c0_i32_0 = arith.constant 0 : i32
    %c0_i32_1 = arith.constant 0 : i32
    return %c0_i32, %c0_i32_0 : i32, i32
  }
  func.func @transform_11(%arg0: i32, %arg1: i32) -> (i32, i32) {
    %c0_i32 = arith.constant 0 : i32
    %c0_i32_0 = arith.constant 0 : i32
    %c0_i32_1 = arith.constant 0 : i32
    return %c0_i32, %c0_i32_0 : i32, i32
  }
  func.func @transform_12(%arg0: i32, %arg1: i32) -> (i32, i32) {
    %c0_i32 = arith.constant 0 : i32
    %c0_i32_0 = arith.constant 0 : i32
    %c0_i32_1 = arith.constant 0 : i32
    return %c0_i32, %c0_i32_0 : i32, i32
  }
  func.func @transform_13(%arg0: i32, %arg1: i32) -> (i32, i32) {
    %c0_i32 = arith.constant 0 : i32
    %c0_i32_0 = arith.constant 0 : i32
    %c0_i32_1 = arith.constant 0 : i32
    return %c0_i32, %c0_i32_0 : i32, i32
  }
  func.func @transform_14(%arg0: i32, %arg1: i32) -> (i32, i32) {
    %c0_i32 = arith.constant 0 : i32
    %c0_i32_0 = arith.constant 0 : i32
    %c0_i32_1 = arith.constant 0 : i32
    return %c0_i32, %c0_i32_0 : i32, i32
  }
  func.func @transform_15(%arg0: i32, %arg1: i32) -> (i32, i32) {
    %c0_i32 = arith.constant 0 : i32
    %c0_i32_0 = arith.constant 0 : i32
    %c0_i32_1 = arith.constant 0 : i32
    return %c0_i32, %c0_i32_0 : i32, i32
  }
  func.func @transform_16(%arg0: i32, %arg1: i32) -> (i32, i32) {
    %c0_i32 = arith.constant 0 : i32
    %c0_i32_0 = arith.constant 0 : i32
    %c0_i32_1 = arith.constant 0 : i32
    return %c0_i32, %c0_i32_0 : i32, i32
  }
  func.func @transform_17(%arg0: i32, %arg1: i32) -> (i32, i32, i32) {
    %c0_i32 = arith.constant 0 : i32
    %c0_i32_0 = arith.constant 0 : i32
    return %arg0, %arg1, %c0_i32 : i32, i32, i32
  }
}

</mosaic_0001>

<bundles_post_ra>
// kernel: tpu_custom_call.1
= control target key start
LH: loop header
LB: loop body
LE: loop exit
PB: predicated region body
PF: predicated region fallthrough
CT: control target
= control target key end

     0   :  { %s6996_s0 = inlined_call_operand.hbm [shape: f32[2,64,256], index: 0, kind: input, shape index: {}]   ;;  %s6997_s1 = inlined_call_operand.hbm [shape: f32[64,256], index: 1, kind: input, shape index: {}]   ;;  %s6998_s2 = inlined_call_operand.hbm [shape: f32[2,32,128], index: 2, kind: input, shape index: {}]   ;;  %s6999_s3 = inlined_call_operand.hbm [shape: f32[256,256], index: 3, kind: input, shape index: {}]   ;;  %s7000_s4 = inlined_call_operand.vmem [shape: f32[1,256], index: 4, kind: input, shape index: {}]   ;;  %s7001_s5 = inlined_call_operand.hbm [shape: f32[128,256], index: 5, kind: input, shape index: {}]   ;;  %s7002_s6 = inlined_call_operand.vmem [shape: f32[1,256], index: 6, kind: input, shape index: {}]   ;;  %s7003_s7 = inlined_call_operand.hbm [shape: f32[128,256], index: 7, kind: input, shape index: {}]   ;;  %s7004_s8 = inlined_call_operand.vmem [shape: f32[1,256], index: 8, kind: input, shape index: {}]   ;;  %s7005_s9 = inlined_call_operand.hbm [shape: f32[256,256], index: 9, kind: input, shape index: {}]   ;;  %s7006_s10 = inlined_call_operand.vmem [shape: f32[1,256], index: 10, kind: input, shape index: {}]   ;;  %s7007_s11 = inlined_call_operand.vmem [shape: f32[1,256], index: 11, kind: input, shape index: {}]   ;;  %s7008_s12 = inlined_call_operand.vmem [shape: f32[1,256], index: 12, kind: input, shape index: {}]   ;;  %s7009_s13 = inlined_call_operand.<no memory space> [shape: f32[1,1], index: 13, kind: input, shape index: {}]   ;;  %s7010_s14 = inlined_call_operand.hbm [shape: f32[256,128], index: 14, kind: input, shape index: {}]   ;;  %s7011_s15 = inlined_call_operand.vmem [shape: f32[1,128], index: 15, kind: input, shape index: {}]   ;;  %s7012_s16 = inlined_call_operand.vmem [shape: f32[1,128], index: 16, kind: input, shape index: {}]   ;;  %s7013_s17 = inlined_call_operand.hbm [shape: f32[2,64,128], index: 17, kind: output, shape index: {}]  }
   0x1   :  { %7038 = sst [smem:[#allocation31_spill]] %s6996_s0  ;;  %v22_v0 = vstv %s7009_s13 }
   0x2   :  { %7039 = sst [smem:[#allocation32_spill]] %s6997_s1  ;;  %23 = vst [vmem:[#allocation2] sm:$0x1] %v22_v0 }
   0x3   :  { %7040 = sst [smem:[#allocation33_spill]] %s7000_s4 }
   0x4   :  { %7041 = sst [smem:[#allocation34_spill]] %s7001_s5 }
   0x5   :  { %7042 = sst [smem:[#allocation35_spill]] %s7004_s8 }
   0x6   :  { %7043 = sst [smem:[#allocation36_spill]] %s7005_s9 }
   0x7   :  { %7044 = sst [smem:[#allocation37_spill]] %s7006_s10 }
   0x8   :  { %7045 = sst [smem:[#allocation38_spill]] %s7007_s11 }
   0x9   :  { %7046 = sst [smem:[#allocation39_spill]] %s7008_s12 }
   0xa   :  { %7047 = sst [smem:[#allocation40_spill]] %s7011_s15 }
   0xb   :  { %7048 = sst [smem:[#allocation41_spill]] %s7012_s16 }
   0xc   :  { %7049 = sst [smem:[#allocation42_spill]] %s7013_s17 }
   0xd   :  { %24 = vsyncpa [#allocation4], 0 }
   0xe   :  { %26 = vsyncpa [#allocation4 + $0x1], 0 }
   0xf   :  { %27 = vsyncpa [#allocation7], 0 }
  0x10   :  { %28 = vsyncpa [#allocation11], 0 }
  0x11   :  { %29 = vsyncpa [#allocation14], 0 }
  0x12   :  { %30 = vsyncpa [#allocation5], 0 }
  0x13   :  { %32 = vsyncpa [#allocation5 + $0x1], 0  ;;  %s5695_s26 = smov 0   ;;  %s5697_s27 = smov 0  }
  0x14   :  { %s5699_s28 = smov 0   ;;  %s5701_s29 = smov 0  }
  0x15   :  { %s5703_s0 = smov 0   ;;  %s5705_s30 = smov 0  }
  0x16 LB: > { %7050 = sst [smem:[#allocation24_spill]] %s5562_s26  ;;  %s5726_s13 = sadd.s32 4294967295, %s5582_s30   ;;  %s5582_s30 = sphi %s5705_s30, %s38_s30   ;;  %s5578_s0 = sphi %s5703_s0, %s7110_s0   ;;  %s5574_s29 = sphi %s5701_s29, %s7109_s29   ;;  %s5570_s28 = sphi %s5699_s28, %s7105_s28   ;;  %s5566_s27 = sphi %s5697_s27, %s7108_s27   ;;  %s5562_s26 = sphi %s5695_s26, %s7107_s26  }
  0x17   : > { %7051 = sst [smem:[#allocation25_spill]] %s5570_s28  ;;  %p4085_p0 = scmp.ge.s32.totalorder %s5582_s30, 1 }
  0x18   : > { %7052 = sst [smem:[#allocation26_spill]] %s5574_s29  ;;  %p7017_p1 = scmp.eq.s32.totalorder %s5726_s13, 0 }
  0x19   : > { %7053 = sst [smem:[#allocation27_spill]] %s5582_s30  ;;  %p457_p2 = scmp.lt.s32.totalorder %s5582_s30, 3 }
  0x1a   : > { %s5584_s19 = smov [#allocation6]   ;;  %s5585_s21 = smov [#allocation10]  }
  0x1b   : > { %p5731_p3 = pnand %p4085_p0, %p457_p2  ;;  %s473_s1 = sshll.u32 %s5584_s19, 4  ;;  %s5735_s1 = int_to_ptr.vmem [resolvable:$true] %s473_s1 }
  0x1c   : > { %s502_s22 = sshll.u32 %s5585_s21, 4  ;;  %s5586_s23 = smov [#allocation13]   ;;  %s5746_s22 = int_to_ptr.vmem [resolvable:$true] %s502_s22 }
  0x1d   : > { %s7054_s18 = scalar_select %p5731_p3, 1, 0 }
  0x1e   : > { %p4925_p4 = pneg %p5731_p3  ;;  %s5748_s24 = sshll.u32 %s5586_s23, 4  ;;  %s535_s24 = int_to_ptr.vmem [resolvable:$true] %s5748_s24 }
  0x1f   : > { %s7056_s17 = sld [smem:[#allocation32_spill]] }
  0x20   : > { %p5742_p6 = pnand %p4925_p4, %p7017_p1 }
  0x22   : > { %s7055_s20 = scalar_select %p5742_p6, 1, 0 }
  0x23   : > { %p5758_p8 = pneg %p5742_p6 }
  0x25   : > { %s5252_s29 = scalar_lea.hbm %s7056_s17, 2048 }
  0x26   : > { %p5253_p7 = scmp.ne.s32.totalorder %s7056_s17, %s5252_s29  ;;  %p5259_p11 = scmp.lt.u32.totalorder %s5252_s29, %s7056_s17 }
  0x28   : > { %p5255_p9 = pnand %p5758_p8, %p5253_p7 }
  0x2a   : > { %p5256_p10 = pneg %p5255_p9 }
  0x2c   : > { %p5261_p12 = pnand %p5259_p11, %p5256_p10 }
  0x2e   : > { %5264 = shalt.err (!%p5261_p12)
}
  0x2f   : > { %s5265_s15 = scalar_lea.vmem %s5735_s1, 2048  ;;  %p5273_p4 = scmp.lt.s32.totalorder %s5735_s1, %s5735_s1 }
  0x30   : > { %p5266_p13 = scmp.ne.s32.totalorder %s5735_s1, %s5265_s15  ;;  %p5274_p5 = scmp.lt.s32.totalorder %s5265_s15, %s5265_s15 }
  0x32   : > { %p5268_p0 = pnand %p5266_p13, %p5758_p8  ;;  %p5275_p7 = por %p5274_p5, %p5273_p4 }
  0x34   : > { %p5269_p2 = pneg %p5268_p0 }
  0x36   : > { %p5276_p9 = pnand %p5275_p7, %p5269_p2 }
  0x38   : > { %5279 = shalt.err (!%p5276_p9)
}
  0x39   : > { %s7019_s16 = smov 256   ;;  %s7021_s29 = smov 16  }
  0x3a   : > { %4928 = dma.hbm_to_vmem [thread:$0]  (!%p5742_p6), %s7056_s17, 2048, %s5735_s1, [#allocation7], %s7019_s16, %s7019_s16, %s7021_s29  }
  0x3b   : > { %s7058_s5 = sld [smem:[#allocation34_spill]] }
  0x41   : > { %s5280_s15 = scalar_lea.hbm %s7058_s5, 4096 }
  0x42   : > { %p5281_p5 = scmp.ne.s32.totalorder %s7058_s5, %s5280_s15  ;;  %p5287_p12 = scmp.lt.u32.totalorder %s5280_s15, %s7058_s5 }
  0x44   : > { %p5283_p10 = pnand %p5281_p5, %p5758_p8 }
  0x46   : > { %p5284_p11 = pneg %p5283_p10 }
  0x48   : > { %p5289_p13 = pnand %p5287_p12, %p5284_p11 }
  0x4a   : > { %5292 = shalt.err (!%p5289_p13)
}
  0x4b   : > { %s5293_s1 = scalar_lea.vmem %s5746_s22, 4096  ;;  %p5301_p7 = scmp.lt.s32.totalorder %s5746_s22, %s5746_s22 }
  0x4c   : > { %p5294_p0 = scmp.ne.s32.totalorder %s5746_s22, %s5293_s1  ;;  %p5302_p9 = scmp.lt.s32.totalorder %s5293_s1, %s5293_s1 }
  0x4e   : > { %p5296_p2 = pnand %p5294_p0, %p5758_p8  ;;  %p5303_p5 = por %p5302_p9, %p5301_p7 }
  0x50   : > { %p5297_p4 = pneg %p5296_p2 }
  0x52   : > { %p5304_p10 = pnand %p5303_p5, %p5297_p4 }
  0x54   : > { %5307 = shalt.err (!%p5304_p10)
}
  0x55   : > { %4934 = dma.hbm_to_vmem [thread:$0]  (!%p5742_p6), %s7058_s5, 4096, %s5746_s22, [#allocation11], %s7019_s16, %s7019_s16, %s7021_s29  }
  0x56   : > { %s7059_s9 = sld [smem:[#allocation36_spill]] }
  0x5c   : > { %s5308_s25 = scalar_lea.hbm %s7059_s9, 8192 }
  0x5d   : > { %p5309_p11 = scmp.ne.s32.totalorder %s7059_s9, %s5308_s25  ;;  %p5315_p0 = scmp.lt.u32.totalorder %s5308_s25, %s7059_s9 }
  0x5f   : > { %p5311_p12 = pnand %p5309_p11, %p5758_p8 }
  0x61   : > { %p5312_p13 = pneg %p5311_p12 }
  0x63   : > { %p5317_p2 = pnand %p5315_p0, %p5312_p13 }
  0x65   : > { %5320 = shalt.err (!%p5317_p2)
}
  0x66   : > { %s5321_s1 = scalar_lea.vmem %s535_s24, 8192  ;;  %p5329_p5 = scmp.lt.s32.totalorder %s535_s24, %s535_s24 }
  0x67   : > { %p5322_p4 = scmp.ne.s32.totalorder %s535_s24, %s5321_s1  ;;  %p5330_p10 = scmp.lt.s32.totalorder %s5321_s1, %s5321_s1 }
  0x69   : > { %p5324_p7 = pnand %p5322_p4, %p5758_p8  ;;  %p5331_p1 = por %p5330_p10, %p5329_p5 }
  0x6b   : > { %p5325_p9 = pneg %p5324_p7 }
  0x6d   : > { %p5332_p3 = pnand %p5331_p1, %p5325_p9 }
  0x6f   : > { %5335 = shalt.err (!%p5332_p3)
}
  0x70   : > { %4940 = dma.hbm_to_vmem [thread:$0]  (!%p5742_p6), %s7059_s9, 8192, %s535_s24, [#allocation14], %s7019_s16, %s7019_s16, %s7021_s29  }
  0x71   : > { %s4084_s8 = sadd.s32 4294967294, %s5582_s30   ;;  %s50_s10 = sadd.s32 1, %s5578_s0 }
  0x72   : > { %s59_s11 = sadd.s32 1, %s5570_s28  ;;  %p52_p1 = scmp.ge.s32.totalorder %s50_s10, 2 }
  0x73   : > { %p66_p3 = scmp.ne.s32.totalorder %s5570_s28, %s5566_s27  ;;  %p67_p11 = scmp.eq.s32.totalorder %s5582_s30, 0 }
  0x74   : > { %p72_p12 = scmp.ne.s32.totalorder %s5566_s27, %s5562_s26  ;;  %s7112_s10 = smov (%p52_p1, %s50_s10), 0 }
  0x75   : > { %7060 = sst [smem:[#allocation28_spill]] %s7112_s10  ;;  %p5840_p13 = por %p67_p11, %p66_p3 }
  0x76   : > { %p7062_p0 = scmp.eq.s32.totalorder %s5726_s13, 0  ;;  %s54_s19 = ssub.s32 %s5578_s0, %s7112_s10 }
  0x77   : > { %p444_p4 = scmp.eq.s32.totalorder %s5726_s13, 1  ;;  %p57_p7 = scmp.eq.s32.totalorder %s54_s19, 0 }
  0x78   : > { %p5846_p2 = por %p7062_p0, %p72_p12  ;;  %p450_p9 = scmp.eq.s32.totalorder %s4084_s8, 1 }
  0x79   : > { %p5853_p5 = por %p444_p4, %p66_p3  ;;  %p4961_p10 = scmp.lt.s32.totalorder %s5582_s30, 2 }
  0x7a   : > { %s7063_s24 = scalar_select %p5846_p2, 1, 0 }
  0x7b   : > { %s7064_s21 = scalar_select %p5853_p5, 1, 0 }
  0x7c   : > { %s5859_s23 = scalar_select %p57_p7, %s5570_s28, %s59_s11  }
  0x7d   : > { %p5861_p1 = por %p450_p9, %p72_p12  ;;  %s579_s1 = sand.u32 1, %s5582_s30  }
  0x7e   : > { %7065 = sst [smem:[#allocation29_spill]] %s5859_s23  ;;  %s581_s22 = sand.u32 1, %s5570_s28  }
  0x7f   : > { %s7066_s15 = scalar_select %p5861_p1, 1, 0 }
  0x80   : > { %s4093_s4 = sshll.u32 %s581_s22, 7  ;;  %s4228_s16 = sshll.u32 %s5578_s0, 11 }
  0x81   : > { %7067 = sst [smem:[#allocation30_spill]] %s7066_s15  ;;  %s7068_s9 = sld [smem:[#allocation31_spill]] }
  0x82   : > { %s583_s8 = scalar_lea.vmem [#allocation3], %s4093_s4  ;;  %p5875_p3 = pnand %p4961_p10, %p5840_p13 }
  0x83   : > { %s593_s11 = sshll.u32 %s583_s8, 4  ;;  %s5881_s10 = sshll.u32 %s581_s22, 5  ;;  %s5879_s11 = int_to_ptr.vmem [resolvable:$true] %s593_s11 }
  0x84   : > { %s7069_s17 = scalar_select %p5875_p3, 1, 0 }
  0x85   : > { %s5883_s5 = scalar_lea.sflag [#allocation4], %s579_s1  ;;  %p7035_p12 = pneg %p5875_p3 }
  0x87   : > { %s5871_s19 = scalar_lea.hbm %s7068_s9, %s4228_s16  ;;  %s5341_s4 = scalar_lea.hbm %s7068_s9, 4096 }
  0x88   : > { %s5336_s16 = scalar_lea.hbm %s5871_s19, 2048  ;;  %p5342_p13 = scmp.lt.u32.totalorder %s5871_s19, %s7068_s9 }
  0x89   : > { %p5337_p11 = scmp.ne.s32.totalorder %s5871_s19, %s5336_s16  ;;  %p5343_p7 = scmp.lt.u32.totalorder %s5341_s4, %s5336_s16 }
  0x8a   : > { %p5345_p10 = scmp.lt.u32.totalorder %s5336_s16, %s5871_s19 }
  0x8b   : > { %p5339_p0 = pnand %p7035_p12, %p5337_p11  ;;  %p5344_p9 = por %p5343_p7, %p5342_p13 }
  0x8d   : > { %p5340_p4 = pneg %p5339_p0  ;;  %p5346_p1 = por %p5345_p10, %p5344_p9 }
  0x8f   : > { %p5347_p5 = pnand %p5346_p1, %p5340_p4 }
  0x91   : > { %5350 = shalt.err (!%p5347_p5)
}
  0x92   : > { %s5351_s1 = scalar_lea.vmem %s5879_s11, 2048  ;;  %s5589_s22 = smov [#allocation3]  }
  0x93   : > { %p5352_p11 = scmp.ne.s32.totalorder %s5879_s11, %s5351_s1  ;;  %s5356_s29 = sshll.u32 %s5589_s22, 4  ;;  %s5357_s29 = int_to_ptr.vmem [resolvable:$false] %s5356_s29 }
  0x94   : > { %s5358_s23 = scalar_lea.vmem %s5357_s29, 4096  ;;  %p5359_p6 = scmp.lt.s32.totalorder %s5879_s11, %s5357_s29 }
  0x95   : > { %p5354_p0 = pnand %p5352_p11, %p7035_p12  ;;  %p5360_p13 = scmp.lt.s32.totalorder %s5358_s23, %s5351_s1 }
  0x97   : > { %p5355_p2 = pneg %p5354_p0  ;;  %p5361_p7 = por %p5360_p13, %p5359_p6 }
  0x99   : > { %p5362_p9 = pnand %p5361_p7, %p5355_p2 }
  0x9b   : > { %5365 = shalt.err (!%p5362_p9)
}
  0x9c   : > { %s7070_s16 = smov 16   ;;  %s7071_s25 = smov 256  }
  0x9d   : > { %4947 = dma.hbm_to_vmem [thread:$0]  (!%p5875_p3), %s5871_s19, 2048, %s5879_s11, %s5883_s5, %s7071_s25, %s7071_s25, %s7070_s16  }
  0x9e   : > { %s607_s4 = scalar_lea.vmem [#allocation8], %s5881_s10  ;;  %s5590_s22 = smov [#allocation9]  }
  0x9f   : > { %s5915_s8 = sshll.u32 %s607_s4, 4  ;;  %s486_s29 = sshll.u32 %s5590_s22, 4  ;;  %s487_s29 = int_to_ptr.vmem [resolvable:$true] %s486_s29  ;;  %s5982_s8 = int_to_ptr.vmem [resolvable:$true] %s5915_s8 }
  0xa0   : > { %s5591_s1 = smov [#allocation12]   ;;  %s5366_s30 = scalar_lea.hbm %s6999_s3, 8192 }
  0xa1   : > { %s518_s23 = sshll.u32 %s5591_s1, 4  ;;  %p5367_p6 = scmp.ne.s32.totalorder %s6999_s3, %s5366_s30  ;;  %s519_s23 = int_to_ptr.vmem [resolvable:$true] %s518_s23 }
  0xa2   : > { %p5373_p1 = scmp.lt.u32.totalorder %s5366_s30, %s6999_s3 }
  0xa3   : > { %p5369_p2 = pnand %p5367_p6, %p5758_p8 }
  0xa5   : > { %p5370_p5 = pneg %p5369_p2 }
  0xa7   : > { %p5375_p4 = pnand %p5373_p1, %p5370_p5 }
  0xa9   : > { %5378 = shalt.err (!%p5375_p4)
}
  0xaa   : > { %s5379_s11 = scalar_lea.vmem %s487_s29, 8192  ;;  %p5387_p13 = scmp.lt.s32.totalorder %s487_s29, %s487_s29 }
  0xab   : > { %p5380_p10 = scmp.ne.s32.totalorder %s487_s29, %s5379_s11  ;;  %p5388_p7 = scmp.lt.s32.totalorder %s5379_s11, %s5379_s11 }
  0xad   : > { %p5382_p11 = pnand %p5380_p10, %p5758_p8  ;;  %p5389_p9 = por %p5388_p7, %p5387_p13 }
  0xaf   : > { %p5383_p0 = pneg %p5382_p11 }
  0xb1   : > { %p5390_p12 = pnand %p5389_p9, %p5383_p0 }
  0xb3   : > { %5393 = shalt.err (!%p5390_p12)
}
  0xb4   : > { %p7072_p6 = scmp.ne.s32.totalorder %s7055_s20, 0  ;;  %s5394_s15 = scalar_lea.hbm %s7003_s7, 4096 }
  0xb5   : > { %p5395_p2 = scmp.ne.s32.totalorder %s7003_s7, %s5394_s15  ;;  %p5401_p1 = scmp.lt.u32.totalorder %s5394_s15, %s7003_s7 }
  0xb6   : > { %4931 = dma.hbm_to_vmem [thread:$0]  (!%p7072_p6), %s6999_s3, 8192, %s487_s29, [#allocation7], %s7071_s25, %s7071_s25, %s7070_s16  }
  0xb7   : > { %p5397_p12 = pnand %p5395_p2, %p5758_p8 }
  0xb9   : > { %p5398_p5 = pneg %p5397_p12 }
  0xbb   : > { %p5403_p4 = pnand %p5401_p1, %p5398_p5 }
  0xbd   : > { %5406 = shalt.err (!%p5403_p4)
}
  0xbe   : > { %s5407_s10 = scalar_lea.vmem %s519_s23, 4096  ;;  %p5415_p13 = scmp.lt.s32.totalorder %s519_s23, %s519_s23 }
  0xbf   : > { %p5408_p10 = scmp.ne.s32.totalorder %s519_s23, %s5407_s10  ;;  %p5416_p7 = scmp.lt.s32.totalorder %s5407_s10, %s5407_s10 }
  0xc1   : > { %p5410_p11 = pnand %p5408_p10, %p5758_p8  ;;  %p5417_p9 = por %p5416_p7, %p5415_p13 }
  0xc3   : > { %p5411_p0 = pneg %p5410_p11 }
  0xc5   : > { %p5418_p3 = pnand %p5417_p9, %p5411_p0 }
  0xc7   : > { %5421 = shalt.err (!%p5418_p3)
}
  0xc8   : > { %4937 = dma.hbm_to_vmem [thread:$0]  (!%p7072_p6), %s7003_s7, 4096, %s519_s23, [#allocation11], %s7071_s25, %s7071_s25, %s7070_s16  }
  0xc9   : > { %s5592_s9 = smov [#allocation15]   ;;  %s5422_s15 = scalar_lea.hbm %s7010_s14, 4096 }
  0xca   : > { %s559_s26 = sshll.u32 %s5592_s9, 4  ;;  %p5423_p3 = scmp.ne.s32.totalorder %s7010_s14, %s5422_s15  ;;  %s560_s26 = int_to_ptr.vmem [resolvable:$true] %s559_s26 }
  0xcb   : > { %p5429_p5 = scmp.lt.u32.totalorder %s5422_s15, %s7010_s14 }
  0xcc   : > { %p5425_p2 = pnand %p5423_p3, %p5758_p8 }
  0xce   : > { %p5426_p12 = pneg %p5425_p2 }
  0xd0   : > { %p5431_p1 = pnand %p5429_p5, %p5426_p12 }
  0xd2   : > { %5434 = shalt.err (!%p5431_p1)
}
  0xd3   : > { %s5435_s16 = scalar_lea.vmem %s560_s26, 4096  ;;  %p5443_p0 = scmp.lt.s32.totalorder %s560_s26, %s560_s26 }
  0xd4   : > { %p5436_p4 = scmp.ne.s32.totalorder %s560_s26, %s5435_s16  ;;  %p5444_p13 = scmp.lt.s32.totalorder %s5435_s16, %s5435_s16 }
  0xd6   : > { %p5438_p10 = pnand %p5436_p4, %p5758_p8  ;;  %p5445_p7 = por %p5444_p13, %p5443_p0 }
  0xd8   : > { %p5439_p11 = pneg %p5438_p10 }
  0xda   : > { %p5446_p9 = pnand %p5445_p7, %p5439_p11 }
  0xdc   : > { %5449 = shalt.err (!%p5446_p9)
}
  0xdd   : > { %s5593_s25 = smov 128   ;;  %s5594_s23 = smov 8  }
  0xde   : > { %4943 = dma.hbm_to_vmem [thread:$0]  (!%p7072_p6), %s7010_s14, 4096, %s560_s26, [#allocation14], %s5593_s25, %s5593_s25, %s5594_s23  }
  0xdf   : > { %s4229_s12 = sshll.u32 %s5578_s0, 9  ;;  %p7073_p3 = scmp.ne.s32.totalorder %s7069_s17, 0 }
  0xe0   : > { %s5987_s28 = scalar_lea.hbm %s6998_s2, %s4229_s12  ;;  %s5455_s15 = scalar_lea.hbm %s6998_s2, 1024 }
  0xe1   : > { %s5450_s20 = scalar_lea.hbm %s5987_s28, 512  ;;  %p7074_p2 = pneg %p7073_p3 }
  0xe2   : > { %p5451_p8 = scmp.ne.s32.totalorder %s5987_s28, %s5450_s20  ;;  %p5456_p6 = scmp.lt.u32.totalorder %s5987_s28, %s6998_s2 }
  0xe3   : > { %p5457_p1 = scmp.lt.u32.totalorder %s5455_s15, %s5450_s20  ;;  %p5459_p10 = scmp.lt.u32.totalorder %s5450_s20, %s5987_s28 }
  0xe4   : > { %p5453_p12 = pnand %p5451_p8, %p7074_p2 }
  0xe5   : > { %p5458_p4 = por %p5457_p1, %p5456_p6 }
  0xe6   : > { %p5454_p5 = pneg %p5453_p12 }
  0xe7   : > { %p5460_p11 = por %p5459_p10, %p5458_p4 }
  0xe9   : > { %p5461_p0 = pnand %p5460_p11, %p5454_p5 }
  0xeb   : > { %5464 = shalt.err (!%p5461_p0)
}
  0xec   : > { %s5465_s1 = scalar_lea.vmem %s5982_s8, 512  ;;  %p7075_p7 = pmov %p7074_p2 }
  0xed   : > { %p5466_p13 = scmp.ne.s32.totalorder %s5982_s8, %s5465_s1  ;;  %s5595_s19 = smov [#allocation8]  }
  0xee   : > { %s5470_s16 = sshll.u32 %s5595_s19, 4  ;;  %s5471_s16 = int_to_ptr.vmem [resolvable:$false] %s5470_s16 }
  0xef   : > { %p5468_p9 = pnand %p5466_p13, %p7075_p7  ;;  %s5472_s10 = scalar_lea.vmem %s5471_s16, 1024 }
  0xf0   : > { %p5473_p2 = scmp.lt.s32.totalorder %s5982_s8, %s5471_s16  ;;  %p5474_p12 = scmp.lt.s32.totalorder %s5472_s10, %s5465_s1 }
  0xf1   : > { %p5469_p8 = pneg %p5468_p9 }
  0xf2   : > { %p5475_p6 = por %p5474_p12, %p5473_p2 }
  0xf4   : > { %p5476_p1 = pnand %p5475_p6, %p5469_p8 }
  0xf6   : > { %5479 = shalt.err (!%p5476_p1)
}
  0xf7   : > { %4950 = dma.hbm_to_vmem [thread:$0]  (!%p7073_p3), %s5987_s28, 512, %s5982_s8, %s5883_s5, %s5593_s25, %s5593_s25, %s5594_s23  }
  0xf8   : > { %p7076_p5 = scmp.ne.s32.totalorder %s7054_s18, 0 }
  0xf9   : > { %s628_s29 = sand.u32 (!%p7076_p5), 1, %s5726_s13   ;;  %s6020_s12 = sand.u32 (!%p7076_p5), 1, %s5566_s27  }
  0xfa   : > { %626 = sbr.rel (%p7076_p5) target bundleno = 3735 (0xe97), region = 88  ;;  %s4100_s11 = sshll.u32 (!%p7076_p5), %s6020_s12, 7 }
  0xfb   : > { %s629_s9 = scalar_lea.sflag (!%p7076_p5), [#allocation4], %s628_s29  ;;  %s6023_s17 = scalar_lea.vmem (!%p7076_p5), [#allocation3], %s4100_s11 }
  0xfc   : > { %p7077_p4 = scmp.ne.s32.totalorder (!%p7076_p5), %s7063_s24, 0 }
 0x101   : > { %5533 = dma.done.wait (%p7077_p4), %s629_s9, 2048  }
 0x102   : > { %5535 = vsyncadd (%p7077_p4), %s629_s9, 4294965248  ;;  %p7078_p3 = scmp.eq.s32.totalorder %s5726_s13, 0 }
 0x104   : > { %5537 = dma.done.wait (%p7078_p3), [#allocation7], 2048   ;;  %p7079_p10 = pmov %p7078_p3 }
 0x105   : > { %s4102_s18 = sshll.u32 %s6020_s12, 5 }
 0x106   : > { %5539 = vsyncadd (%p7079_p10), [#allocation7], 4294965248  ;;  %s6034_s5 = scalar_lea.vmem [#allocation8], %s4102_s18 }
 0x107   : > { %5541 = dma.done.wait (%p7077_p4), %s629_s9, 512  }
 0x108   : > { %5543 = vsyncadd (%p7077_p4), %s629_s9, 4294966784  ;;  %p7080_p11 = pmov %p7078_p3 }
 0x109   : > { %p7081_p0 = pmov %p7078_p3 }
 0x10a   : > { %5545 = dma.done.wait (%p7080_p11), [#allocation7], 8192  }
 0x10b   : > { %5547 = vsyncadd (%p7081_p0), [#allocation7], 4294959104  ;;  %p7082_p13 = pmov %p7081_p0 }
 0x10c   : > { %p7083_p7 = pmov %p7081_p0 }
 0x10d   : > { %5549 = dma.done.wait (%p7082_p13), [#allocation11], 8192  }
 0x10e   : > { %5551 = vsyncadd (%p7083_p7), [#allocation11], 4294959104  ;;  %p7084_p9 = pmov %p7081_p0 }
 0x10f   : > { %p7085_p8 = pmov %p7081_p0 }
 0x110   : > { %5553 = dma.done.wait (%p7084_p9), [#allocation14], 12288  }
 0x111   : > { %5555 = vsyncadd (%p7085_p8), [#allocation14], 4294955008  ;;  %v5596_v1 = vmov 0.0   ;;  %v777_v2 = vld [vmem:[#allocation9 + $0x8] sm:$0xff]  ;;  %v779_v3 = vld [vmem:[#allocation9 + $0x18] sm:$0xff]  ;;  %vm1247_vm0 = vcmask 523264  }
 0x112   : > { %1089 = vmatprep.mubr.f32.mxu1 %v5596_v1  ;;  %v776_v4 = vld [vmem:[#allocation9] sm:$0xff]  ;;  %v4543_v5 = vpack.c.bf16 %v779_v3, %v777_v2  ;;  %v778_v6 = vld [vmem:[#allocation9 + $0x10] sm:$0xff]  ;;  %v781_v7 = vld [vmem:[#allocation9 + $0x28] sm:$0xff]  ;;  %s5597_s8 = smov 64   ;;  %s7088_s28 = sld [smem:[#allocation33_spill]]  ;;  %vm1389_vm2 = vcmask 261120  }
 0x113   : > { %v783_v8 = vld [vmem:[#allocation9 + $0x38] sm:$0xff]  ;;  %v4545_v9 = vpack.c.bf16 %v778_v6, %v776_v4  ;;  %v780_v11 = vld [vmem:[#allocation9 + $0x20] sm:$0xff]  ;;  %v782_v12 = vld [vmem:[#allocation9 + $0x30] sm:$0xff]  ;;  %s7089_s26 = sld [smem:[#allocation35_spill]]  ;;  %s7091_s22 = sld [smem:[#allocation37_spill]] }
 0x114   : > { %v4547_v10 = vpack.c.bf16 %v783_v8, %v781_v7  ;;  %v785_v13 = vld [vmem:[#allocation9 + $0x48] sm:$0xff]  ;;  %4544 = vmatprep.subr.bf16.mxu0 %v4543_v5  ;;  %v787_v14 = vld [vmem:[#allocation9 + $0x58] sm:$0xff]  ;;  %v4549_v15 = vpack.c.bf16 %v782_v12, %v780_v11  ;;  %v784_v16 = vld [vmem:[#allocation9 + $0x40] sm:$0xff]  ;;  %s7092_s16 = sld [smem:[#allocation38_spill]]  ;;  %s7093_s11 = sld [smem:[#allocation39_spill]] }
 0x115   : > { %4546 = vmatpush1.bf16.msra.mxu0 %v4545_v9  ;;  %v982_v17 = vld [vmem:[#allocation10 + $0x8] sm:$0xff]  ;;  %v4551_v18 = vpack.c.bf16 %v787_v14, %v785_v13  ;;  %v786_v19 = vld [vmem:[#allocation9 + $0x50] sm:$0xff]  ;;  %v984_v21 = vld [vmem:[#allocation10 + $0x18] sm:$0xff]  ;;  %s7094_s18 = sld [smem:[#allocation40_spill]]  ;;  %s7096_s23 = sld [smem:[#allocation26_spill]] }
 0x116   : > { %4548 = vmatprep.subr.bf16.mxu0 %v4547_v10  ;;  %v789_v20 = vld [vmem:[#allocation9 + $0x68] sm:$0xff]  ;;  %v791_v22 = vld [vmem:[#allocation9 + $0x78] sm:$0xff]  ;;  %v4607_v23 = vpack.c.bf16 %v984_v21, %v982_v17  ;;  %v981_v24 = vld [vmem:[#allocation10] sm:$0xff]  ;;  %v4553_v29 = vpack.c.bf16 %v786_v19, %v784_v16  ;;  %s7097_s15 = sld [smem:[#allocation42_spill]]  ;;  %p7098_p12 = scmp.ne.s32.totalorder %s7064_s21, 0 }
 0x117   : > { %v983_v25 = vld [vmem:[#allocation10 + $0x10] sm:$0xff]  ;;  %v986_v27 = vld [vmem:[#allocation10 + $0x28] sm:$0xff]  ;;  %v988_v28 = vld [vmem:[#allocation10 + $0x38] sm:$0xff]  ;;  %v4555_v33 = vpack.c.bf16 %v791_v22, %v789_v20  ;;  %s5599_s19 = smov [#allocation16]  }
 0x118   : > { %v4609_v26 = vpack.c.bf16 %v983_v25, %v981_v24  ;;  %4608 = vmatprep.subr.bf16.mxu1 %v4607_v23  ;;  %v788_v30 = vld [vmem:[#allocation9 + $0x60] sm:$0xff]  ;;  %v4611_v31 = vpack.c.bf16 %v988_v28, %v986_v27  ;;  %v790_v34 = vld [vmem:[#allocation9 + $0x70] sm:$0xff]  ;;  %v793_v35 = vld [vmem:[#allocation9 + $0x88] sm:$0xff] }
 0x119   : > { %4550 = vmatpush1.bf16.msra.mxu0 %v4549_v15  ;;  %v985_v32 = vld [vmem:[#allocation10 + $0x20] sm:$0xff]  ;;  %v987_v36 = vld [vmem:[#allocation10 + $0x30] sm:$0xff]  ;;  %v795_v37 = vld [vmem:[#allocation9 + $0x98] sm:$0xff]  ;;  %v4557_v44 = vpack.c.bf16 %v790_v34, %v788_v30 }
 0x11a   : > { %4552 = vmatprep.subr.bf16.mxu0 %v4551_v18  ;;  %4610 = vmatpush1.bf16.msra.mxu1 %v4609_v26  ;;  %v4613_v38 = vpack.c.bf16 %v987_v36, %v985_v32  ;;  %v990_v39 = vld [vmem:[#allocation10 + $0x48] sm:$0xff]  ;;  %v992_v40 = vld [vmem:[#allocation10 + $0x58] sm:$0xff]  ;;  %v989_v42 = vld [vmem:[#allocation10 + $0x40] sm:$0xff]  ;;  %v4559_v47 = vpack.c.bf16 %v795_v37, %v793_v35 }
 0x11b   : > { %4612 = vmatprep.subr.bf16.mxu1 %v4611_v31  ;;  %v4615_v41 = vpack.c.bf16 %v992_v40, %v990_v39  ;;  %v991_v43 = vld [vmem:[#allocation10 + $0x50] sm:$0xff]  ;;  %v792_v45 = vld [vmem:[#allocation9 + $0x80] sm:$0xff]  ;;  %v994_v46 = vld [vmem:[#allocation10 + $0x68] sm:$0xff] }
 0x11c   : > { %v794_v48 = vld [vmem:[#allocation9 + $0x90] sm:$0xff]  ;;  %v797_v49 = vld [vmem:[#allocation9 + $0xa8] sm:$0xff]  ;;  %v4617_v50 = vpack.c.bf16 %v991_v43, %v989_v42  ;;  %v996_v51 = vld [vmem:[#allocation10 + $0x78] sm:$0xff] }
 0x11d   : > { %4554 = vmatpush1.bf16.msra.mxu0 %v4553_v29  ;;  %v799_v52 = vld [vmem:[#allocation9 + $0xb8] sm:$0xff]  ;;  %v4619_v53 = vpack.c.bf16 %v996_v51, %v994_v46  ;;  %v993_v54 = vld [vmem:[#allocation10 + $0x60] sm:$0xff]  ;;  %v995_v55 = vld [vmem:[#allocation10 + $0x70] sm:$0xff]  ;;  %v4561_v58 = vpack.c.bf16 %v794_v48, %v792_v45 }
 0x11e   : > { %4556 = vmatprep.subr.bf16.mxu0 %v4555_v33  ;;  %4614 = vmatpush1.bf16.msra.mxu1 %v4613_v38  ;;  %v998_v56 = vld [vmem:[#allocation10 + $0x88] sm:$0xff]  ;;  %v1000_v57 = vld [vmem:[#allocation10 + $0x98] sm:$0xff]  ;;  %v4563_v59 = vpack.c.bf16 %v799_v52, %v797_v49  ;;  %v796_v60 = vld [vmem:[#allocation9 + $0xa0] sm:$0xff]  ;;  %v4621_v63 = vpack.c.bf16 %v995_v55, %v993_v54 }
 0x11f   : > { %4616 = vmatprep.subr.bf16.mxu1 %v4615_v41  ;;  %v798_v61 = vld [vmem:[#allocation9 + $0xb0] sm:$0xff]  ;;  %v801_v62 = vld [vmem:[#allocation9 + $0xc8] sm:$0xff]  ;;  %v803_v0 = vld [vmem:[#allocation9 + $0xd8] sm:$0xff]  ;;  %v4623_v2 = vpack.c.bf16 %v1000_v57, %v998_v56 }
 0x120   : > { %v997_v3 = vld [vmem:[#allocation10 + $0x80] sm:$0xff]  ;;  %v999_v4 = vld [vmem:[#allocation10 + $0x90] sm:$0xff]  ;;  %v1002_v5 = vld [vmem:[#allocation10 + $0xa8] sm:$0xff]  ;;  %v4565_v7 = vpack.c.bf16 %v798_v61, %v796_v60  ;;  %v4567_v8 = vpack.c.bf16 %v803_v0, %v801_v62 }
 0x121   : > { %4558 = vmatpush1.bf16.msra.mxu0 %v4557_v44  ;;  %v1004_v6 = vld [vmem:[#allocation10 + $0xb8] sm:$0xff]  ;;  %v800_v9 = vld [vmem:[#allocation9 + $0xc0] sm:$0xff]  ;;  %v802_v10 = vld [vmem:[#allocation9 + $0xd0] sm:$0xff]  ;;  %v4625_v12 = vpack.c.bf16 %v999_v4, %v997_v3 }
 0x122   : > { %4560 = vmatprep.subr.bf16.mxu0 %v4559_v47  ;;  %4618 = vmatpush1.bf16.msra.mxu1 %v4617_v50  ;;  %v805_v11 = vld [vmem:[#allocation9 + $0xe8] sm:$0xff]  ;;  %v807_v13 = vld [vmem:[#allocation9 + $0xf8] sm:$0xff]  ;;  %v4627_v14 = vpack.c.bf16 %v1004_v6, %v1002_v5  ;;  %v1001_v15 = vld [vmem:[#allocation10 + $0xa0] sm:$0xff]  ;;  %v4569_v19 = vpack.c.bf16 %v802_v10, %v800_v9 }
 0x123   : > { %4620 = vmatprep.subr.bf16.mxu1 %v4619_v53  ;;  %v1003_v16 = vld [vmem:[#allocation10 + $0xb0] sm:$0xff]  ;;  %v1006_v17 = vld [vmem:[#allocation10 + $0xc8] sm:$0xff]  ;;  %v1008_v18 = vld [vmem:[#allocation10 + $0xd8] sm:$0xff]  ;;  %v4571_v20 = vpack.c.bf16 %v807_v13, %v805_v11 }
 0x124   : > { %v804_v21 = vld [vmem:[#allocation9 + $0xe0] sm:$0xff]  ;;  %v806_v22 = vld [vmem:[#allocation9 + $0xf0] sm:$0xff]  ;;  %v809_v23 = vld [vmem:[#allocation9 + $0x108] sm:$0xff]  ;;  %v4629_v24 = vpack.c.bf16 %v1003_v16, %v1001_v15  ;;  %v4631_v26 = vpack.c.bf16 %v1008_v18, %v1006_v17 }
 0x125   : > { %4562 = vmatpush1.bf16.msra.mxu0 %v4561_v58  ;;  %v811_v25 = vld [vmem:[#allocation9 + $0x118] sm:$0xff]  ;;  %v1005_v27 = vld [vmem:[#allocation10 + $0xc0] sm:$0xff]  ;;  %v1007_v28 = vld [vmem:[#allocation10 + $0xd0] sm:$0xff]  ;;  %v4573_v31 = vpack.c.bf16 %v806_v22, %v804_v21 }
 0x126   : > { %4564 = vmatprep.subr.bf16.mxu0 %v4563_v59  ;;  %4622 = vmatpush1.bf16.msra.mxu1 %v4621_v63  ;;  %v1010_v29 = vld [vmem:[#allocation10 + $0xe8] sm:$0xff]  ;;  %v1012_v30 = vld [vmem:[#allocation10 + $0xf8] sm:$0xff]  ;;  %v4575_v32 = vpack.c.bf16 %v811_v25, %v809_v23  ;;  %v808_v33 = vld [vmem:[#allocation9 + $0x100] sm:$0xff]  ;;  %v4633_v36 = vpack.c.bf16 %v1007_v28, %v1005_v27 }
 0x127   : > { %4624 = vmatprep.subr.bf16.mxu1 %v4623_v2  ;;  %v810_v34 = vld [vmem:[#allocation9 + $0x110] sm:$0xff]  ;;  %v813_v35 = vld [vmem:[#allocation9 + $0x128] sm:$0xff]  ;;  %v815_v37 = vld [vmem:[#allocation9 + $0x138] sm:$0xff]  ;;  %v4635_v38 = vpack.c.bf16 %v1012_v30, %v1010_v29 }
 0x128   : > { %v1009_v39 = vld [vmem:[#allocation10 + $0xe0] sm:$0xff]  ;;  %v1011_v40 = vld [vmem:[#allocation10 + $0xf0] sm:$0xff]  ;;  %v4577_v41 = vpack.c.bf16 %v810_v34, %v808_v33  ;;  %v4579_v43 = vpack.c.bf16 %v815_v37, %v813_v35  ;;  %v725_v46 = vld [vmem:[%s6023_s17 + $0x8] sm:$0xff] }
 0x129   : > { %4566 = vmatpush1.bf16.msra.mxu0 %v4565_v7  ;;  %v812_v42 = vld [vmem:[#allocation9 + $0x120] sm:$0xff]  ;;  %v814_v44 = vld [vmem:[#allocation9 + $0x130] sm:$0xff]  ;;  %v4637_v45 = vpack.c.bf16 %v1011_v40, %v1009_v39  ;;  %v745_v47 = vld [vmem:[#allocation6 + $0x8] sm:$0xff] }
 0x12a   : > { %4568 = vmatprep.subr.bf16.mxu0 %v4567_v8  ;;  %4626 = vmatpush1.bf16.msra.mxu1 %v4625_v12  ;;  %v817_v48 = vld [vmem:[#allocation9 + $0x148] sm:$0xff]  ;;  %v819_v49 = vld [vmem:[#allocation9 + $0x158] sm:$0xff]  ;;  %v761_v50 = vadd.f32 %v745_v47, %v725_v46  ;;  %v4581_v51 = vpack.c.bf16 %v814_v44, %v812_v42  ;;  %v816_v53 = vld [vmem:[#allocation9 + $0x140] sm:$0xff] }
 0x12b   : > { %4628 = vmatprep.subr.bf16.mxu1 %v4627_v14  ;;  %v4583_v52 = vpack.c.bf16 %v819_v49, %v817_v48  ;;  %v818_v54 = vld [vmem:[#allocation9 + $0x150] sm:$0xff]  ;;  %v6055_v55 = vld [vmem:[%s6034_s5] sm:$0xff]  ;;  %v821_v56 = vld [vmem:[#allocation9 + $0x168] sm:$0xff] }
 0x12c   : > { %916 = vmatprep.mubr.f32.mxu0 %v761_v50  ;;  %v823_v57 = vld [vmem:[#allocation9 + $0x178] sm:$0xff]  ;;  %v4585_v58 = vpack.c.bf16 %v818_v54, %v816_v53  ;;  %v820_v60 = vld [vmem:[#allocation9 + $0x160] sm:$0xff]  ;;  %v822_v61 = vld [vmem:[#allocation9 + $0x170] sm:$0xff] }
 0x12d   : > { %4570 = vmatpush1.bf16.msra.mxu0 %v4569_v19  ;;  %v4587_v59 = vpack.c.bf16 %v823_v57, %v821_v56  ;;  %v6060_v62 = vld [vmem:[%s6034_s5 + $0x8] sm:$0xff]  ;;  %v827_v0 = vld [vmem:[#allocation9 + $0x198] sm:$0xff]  ;;  %v824_v2 = vld [vmem:[#allocation9 + $0x180] sm:$0xff]  ;;  %v4589_v5 = vpack.c.bf16 %v822_v61, %v820_v60 }
 0x12e   : > { %4572 = vmatprep.subr.bf16.mxu0 %v4571_v20  ;;  %4630 = vmatpush1.bf16.msra.mxu1 %v4629_v24  ;;  %v825_v63 = vld [vmem:[#allocation9 + $0x188] sm:$0xff]  ;;  %v826_v3 = vld [vmem:[#allocation9 + $0x190] sm:$0xff]  ;;  %v1117_v7 = vld [vmem:[#allocation12 + $0x18] sm:$0xff] }
 0x12f   : > { %4632 = vmatprep.subr.bf16.mxu1 %v4631_v26  ;;  %v6063_v4 = vld [vmem:[%s6034_s5 + $0x10] sm:$0xff]  ;;  %v1115_v6 = vld [vmem:[#allocation12 + $0x8] sm:$0xff]  ;;  %v1114_v8 = vld [vmem:[#allocation12] sm:$0xff]  ;;  %v4591_v9 = vpack.c.bf16 %v827_v0, %v825_v63  ;;  %v4593_v20 = vpack.c.bf16 %v826_v3, %v824_v2 }
 0x130   : > { %v4639_v10 = vpack.c.bf16 %v1117_v7, %v1115_v6  ;;  %v1116_v11 = vld [vmem:[#allocation12 + $0x10] sm:$0xff]  ;;  %v1119_v12 = vld [vmem:[#allocation12 + $0x28] sm:$0xff]  ;;  %v1121_v13 = vld [vmem:[#allocation12 + $0x38] sm:$0xff] }
 0x131   : > { %4574 = vmatpush1.bf16.msra.mxu0 %v4573_v31  ;;  %v829_v14 = vld [vmem:[#allocation9 + $0x1a8] sm:$0xff]  ;;  %v831_v15 = vld [vmem:[#allocation9 + $0x1b8] sm:$0xff]  ;;  %v4641_v16 = vpack.c.bf16 %v1116_v11, %v1114_v8  ;;  %v4643_v17 = vpack.c.bf16 %v1121_v13, %v1119_v12  ;;  %v1118_v18 = vld [vmem:[#allocation12 + $0x20] sm:$0xff] }
 0x132   : > { %4576 = vmatprep.subr.bf16.mxu0 %v4575_v32  ;;  %4634 = vmatpush1.bf16.msra.mxu1 %v4633_v36  ;;  %v1120_v19 = vld [vmem:[#allocation12 + $0x30] sm:$0xff]  ;;  %v1123_v21 = vld [vmem:[#allocation12 + $0x48] sm:$0xff]  ;;  %v1125_v22 = vld [vmem:[#allocation12 + $0x58] sm:$0xff]  ;;  %v4595_v23 = vpack.c.bf16 %v831_v15, %v829_v14 }
 0x133   : > { %4636 = vmatprep.subr.bf16.mxu1 %v4635_v38  ;;  %v828_v24 = vld [vmem:[#allocation9 + $0x1a0] sm:$0xff]  ;;  %v830_v25 = vld [vmem:[#allocation9 + $0x1b0] sm:$0xff]  ;;  %v6070_v26 = vld [vmem:[%s6034_s5 + $0x18] sm:$0xff]  ;;  %v4645_v29 = vpack.c.bf16 %v1120_v19, %v1118_v18  ;;  %v4647_v30 = vpack.c.bf16 %v1125_v22, %v1123_v21  ;;  %s4108_s5 = sshll.u32 %s6020_s12, 6 }
 0x134   : > { %v833_v27 = vld [vmem:[#allocation9 + $0x1c8] sm:$0xff]  ;;  %v835_v28 = vld [vmem:[#allocation9 + $0x1d8] sm:$0xff]  ;;  %v1122_v31 = vld [vmem:[#allocation12 + $0x40] sm:$0xff]  ;;  %v4597_v33 = vpack.c.bf16 %v830_v25, %v828_v24  ;;  %s6924_s25 = scalar_lea.vmem [#allocation16], %s4108_s5 }
 0x135   : > { %4578 = vmatpush1.bf16.msra.mxu0 %v4577_v41  ;;  %v1124_v32 = vld [vmem:[#allocation12 + $0x50] sm:$0xff]  ;;  %v1127_v34 = vld [vmem:[#allocation12 + $0x68] sm:$0xff]  ;;  %v1129_v35 = vld [vmem:[#allocation12 + $0x78] sm:$0xff]  ;;  %v4599_v36 = vpack.c.bf16 %v835_v28, %v833_v27  ;;  %s3917_s20 = sshll.u32 %s6924_s25, 4  ;;  %s6946_s20 = int_to_ptr.vmem [resolvable:$true] %s3917_s20 }
 0x136   : > { %4580 = vmatprep.subr.bf16.mxu0 %v4579_v43  ;;  %4638 = vmatpush1.bf16.msra.mxu1 %v4637_v45  ;;  %v832_v37 = vld [vmem:[#allocation9 + $0x1c0] sm:$0xff]  ;;  %v834_v38 = vld [vmem:[#allocation9 + $0x1d0] sm:$0xff]  ;;  %v837_v39 = vld [vmem:[#allocation9 + $0x1e8] sm:$0xff]  ;;  %v4649_v41 = vpack.c.bf16 %v1124_v32, %v1122_v31  ;;  %v4651_v42 = vpack.c.bf16 %v1129_v35, %v1127_v34  ;;  %s5480_s1 = scalar_lea.vmem %s6946_s20, 1024 }
 0x137   : > { %4640 = vmatprep.subr.bf16.mxu1 %v4639_v10  ;;  %v839_v40 = vld [vmem:[#allocation9 + $0x1f8] sm:$0xff]  ;;  %v1126_v43 = vld [vmem:[#allocation12 + $0x60] sm:$0xff]  ;;  %v1128_v44 = vld [vmem:[#allocation12 + $0x70] sm:$0xff]  ;;  %v4601_v45 = vpack.c.bf16 %v834_v38, %v832_v37  ;;  %p5481_p2 = scmp.ne.s32.totalorder %s6946_s20, %s5480_s1 }
 0x138   : > { %v1131_v46 = vld [vmem:[#allocation12 + $0x88] sm:$0xff]  ;;  %v1133_v47 = vld [vmem:[#allocation12 + $0x98] sm:$0xff]  ;;  %v4603_v48 = vpack.c.bf16 %v839_v40, %v837_v39  ;;  %v836_v49 = vld [vmem:[#allocation9 + $0x1e0] sm:$0xff] }
 0x139   : > { %4582 = vmatpush1.bf16.msra.mxu0 %v4581_v51  ;;  %1090 = vmatmul.mubr.f32.vlgmr.msra.gmra.mrb[0].mxu1 %v6055_v55  ;;  %v838_v50 = vld [vmem:[#allocation9 + $0x1f0] sm:$0xff]  ;;  %v4653_v51 = vpack.c.bf16 %v1128_v44, %v1126_v43  ;;  %v4655_v53 = vpack.c.bf16 %v1133_v47, %v1131_v46  ;;  %v1130_v54 = vld [vmem:[#allocation12 + $0x80] sm:$0xff]  ;;  %v1137_v60 = vld [vmem:[#allocation12 + $0xb8] sm:$0xff]  ;;  %p5482_p6 = pnand %p5481_p2, %p7098_p12 }
 0x13a   : > { %4584 = vmatprep.subr.bf16.mxu0 %v4583_v52  ;;  %1095 = vmatprep.mubr.f32.mxu1 %v5596_v1  ;;  %v724_v52 = vld [vmem:[%s6023_s17] sm:$0xff]  ;;  %v1132_v56 = vld [vmem:[#allocation12 + $0x90] sm:$0xff]  ;;  %v4605_v57 = vpack.c.bf16 %v838_v50, %v836_v49  ;;  %v727_v61 = vld [vmem:[%s6023_s17 + $0x18] sm:$0xff] }
 0x13b   : > { %4642 = vmatpush1.bf16.msra.mxu1 %v4641_v16  ;;  %v747_v63 = vld [vmem:[#allocation6 + $0x18] sm:$0xff]  ;;  %v4657_v0 = vpack.c.bf16 %v1132_v56, %v1130_v54  ;;  %v726_v3 = vld [vmem:[%s6023_s17 + $0x10] sm:$0xff]  ;;  %v1134_v6 = vld [vmem:[#allocation12 + $0xa0] sm:$0xff]  ;;  %p5483_p1 = pneg %p5482_p6 }
 0x13c   : > { %4644 = vmatprep.subr.bf16.mxu1 %v4643_v17  ;;  %v1136_v7 = vld [vmem:[#allocation12 + $0xb0] sm:$0xff]  ;;  %v763_v8 = vadd.f32 %v747_v63, %v727_v61  ;;  %v1139_v10 = vld [vmem:[#allocation12 + $0xc8] sm:$0xff]  ;;  %v1141_v11 = vld [vmem:[#allocation12 + $0xd8] sm:$0xff]  ;;  %v842_v63 = vlaneseq }
 0x13d   : > { %4586 = vmatpush1.bf16.msra.mxu0 %v4585_v58  ;;  %1096 = vmatmul.mubr.f32.gmra.mrb[2].mxu1 %v6060_v62  ;;  %v744_v58 = vld [vmem:[#allocation6] sm:$0xff]  ;;  %v729_v12 = vld [vmem:[%s6023_s17 + $0x28] sm:$0xff]  ;;  %v4661_v14 = vpack.c.bf16 %v1136_v7, %v1134_v6  ;;  %v4663_v16 = vpack.c.bf16 %v1141_v11, %v1139_v10  ;;  %v1140_v18 = vld [vmem:[#allocation12 + $0xd0] sm:$0xff] }
 0x13e   : > { %4588 = vmatprep.subr.bf16.mxu0 %v4587_v59  ;;  %1101 = vmatprep.mubr.f32.mxu1 %v5596_v1  ;;  %v1135_v59 = vld [vmem:[#allocation12 + $0xa8] sm:$0xff]  ;;  %v760_v2 = vadd.f32 %v744_v58, %v724_v52  ;;  %v1138_v17 = vld [vmem:[#allocation12 + $0xc0] sm:$0xff]  ;;  %v731_v22 = vld [vmem:[%s6023_s17 + $0x38] sm:$0xff] }
 0x13f   : > { %4646 = vmatpush1.bf16.msra.mxu1 %v4645_v29  ;;  %v749_v13 = vld [vmem:[#allocation6 + $0x28] sm:$0xff]  ;;  %v748_v21 = vld [vmem:[#allocation6 + $0x20] sm:$0xff]  ;;  %v4665_v24 = vpack.c.bf16 %v1140_v18, %v1138_v17  ;;  %v730_v28 = vld [vmem:[%s6023_s17 + $0x30] sm:$0xff] }
 0x140   : > { %4648 = vmatprep.subr.bf16.mxu1 %v4647_v30  ;;  %v765_v19 = vadd.f32 %v749_v13, %v729_v12  ;;  %v750_v29 = vld [vmem:[#allocation6 + $0x30] sm:$0xff]  ;;  %v733_v30 = vld [vmem:[%s6023_s17 + $0x48] sm:$0xff]  ;;  %v732_v34 = vld [vmem:[%s6023_s17 + $0x40] sm:$0xff] }
 0x141   : > { %4590 = vmatpush1.bf16.msra.mxu0 %v4589_v5  ;;  %1102 = vmatmul.mubr.f32.gmra.mrb[4].mxu1 %v6063_v4  ;;  %v4659_v5 = vpack.c.bf16 %v1137_v60, %v1135_v59  ;;  %v753_v31 = vld [vmem:[#allocation6 + $0x48] sm:$0xff]  ;;  %v766_v32 = vadd.f32 %v750_v29, %v730_v28  ;;  %v752_v35 = vld [vmem:[#allocation6 + $0x40] sm:$0xff]  ;;  %v755_v37 = vld [vmem:[#allocation6 + $0x58] sm:$0xff] }
 0x142   : > { %4592 = vmatprep.subr.bf16.mxu0 %v4591_v9  ;;  %1107 = vmatprep.mubr.f32.mxu1 %v5596_v1  ;;  %v746_v9 = vld [vmem:[#allocation6 + $0x10] sm:$0xff]  ;;  %v768_v38 = vadd.f32 %v752_v35, %v732_v34  ;;  %v757_v43 = vld [vmem:[#allocation6 + $0x68] sm:$0xff]  ;;  %v736_v46 = vld [vmem:[%s6023_s17 + $0x60] sm:$0xff] }
 0x143   : > { %4650 = vmatpush1.bf16.msra.mxu1 %v4649_v41  ;;  %v762_v15 = vadd.f32 %v746_v9, %v726_v3  ;;  %v734_v40 = vld [vmem:[%s6023_s17 + $0x50] sm:$0xff]  ;;  %v756_v47 = vld [vmem:[#allocation6 + $0x60] sm:$0xff]  ;;  %v759_v49 = vld [vmem:[#allocation6 + $0x78] sm:$0xff] }
 0x144   : > { %4652 = vmatprep.subr.bf16.mxu1 %v4651_v42  ;;  %v754_v41 = vld [vmem:[#allocation6 + $0x50] sm:$0xff]  ;;  %v737_v42 = vld [vmem:[%s6023_s17 + $0x68] sm:$0xff]  ;;  %v772_v50 = vadd.f32 %v756_v47, %v736_v46  ;;  %v1142_v58 = vld [vmem:[#allocation12 + $0xe0] sm:$0xff] }
 0x145   : > { %4594 = vmatpush1.bf16.msra.mxu0 %v4593_v20  ;;  %1108 = vmatmul.mubr.f32.gmra.mrb[6].mxu1 %v6070_v26  ;;  %v728_v20 = vld [vmem:[%s6023_s17 + $0x20] sm:$0xff]  ;;  %v770_v44 = vadd.f32 %v754_v41, %v734_v40  ;;  %v738_v52 = vld [vmem:[%s6023_s17 + $0x70] sm:$0xff]  ;;  %v1143_v56 = vld [vmem:[#allocation12 + $0xe8] sm:$0xff] }
 0x146   : > { %4596 = vmatprep.subr.bf16.mxu0 %v4595_v23  ;;  %1222 = vmatprep.mubr.f32.mxu1 %v5596_v1  ;;  %v751_v23 = vld [vmem:[#allocation6 + $0x38] sm:$0xff]  ;;  %v764_v25 = vadd.f32 %v748_v21, %v728_v20  ;;  %v1144_v60 = vld [vmem:[#allocation12 + $0xf0] sm:$0xff]  ;;  %vm6111_vm1 = vmpackc.low %vm1247_vm0, %vm1247_vm0 }
 0x147   : > { %4654 = vmatpush1.bf16.msra.mxu1 %v4653_v51  ;;  %v767_v27 = vadd.f32 %v751_v23, %v731_v22  ;;  %v4669_v61 = vpack.c.bf16 %v1144_v60, %v1142_v58 }
 0x148   : > { %4656 = vmatprep.subr.bf16.mxu1 %v4655_v53  ;;  %v758_v53 = vld [vmem:[#allocation6 + $0x70] sm:$0xff] }
 0x149   : > { %4598 = vmatpush1.bf16.msra.mxu0 %v4597_v33  ;;  %v769_v33 = vadd.f32 %v753_v31, %v733_v30  ;;  %v774_v54 = vadd.f32 %v758_v53, %v738_v52  ;;  %v840_v30 = vld [vmem:[%s7088_s28] sm:$0x3]  ;;  %s4230_s28 = sshll.u32 %s7096_s23, 10 }
 0x14a   : > { %4600 = vmatprep.subr.bf16.mxu0 %v4599_v36  ;;  %v735_v36 = vld [vmem:[%s6023_s17 + $0x58] sm:$0xff]  ;;  %s6944_s4 = scalar_lea.hbm %s7097_s15, %s4230_s28 }
 0x14b   : > { %4658 = vmatpush1.bf16.msra.mxu1 %v4657_v0  ;;  %v771_v39 = vadd.f32 %v755_v37, %v735_v36  ;;  %v843_v0 = vshrl.u32 %v842_v63, 7 }
 0x14c   : > { %4660 = vmatprep.subr.bf16.mxu1 %v4659_v5 }
 0x14d   : > { %4602 = vmatpush1.bf16.msra.mxu0 %v4601_v45  ;;  %v773_v45 = vadd.f32 %v757_v43, %v737_v42  ;;  %v6101_v3 = vsub.s32 1, %v843_v0 }
 0x14e   : > { %4604 = vmatprep.subr.bf16.mxu0 %v4603_v48  ;;  %v739_v48 = vld [vmem:[%s6023_s17 + $0x78] sm:$0xff] }
 0x14f   : > { %4662 = vmatpush1.bf16.msra.mxu1 %v4661_v14  ;;  %v775_v51 = vadd.f32 %v759_v49, %v739_v48 }
 0x150   : > { %4664 = vmatprep.subr.bf16.mxu1 %v4663_v16 }
 0x151   : > { %4606 = vmatpush1.bf16.msra.mxu0 %v4605_v57  ;;  %v1145_v57 = vld [vmem:[#allocation12 + $0xf8] sm:$0xff] }
 0x152   : > { %v4667_v59 = vpack.c.bf16 %v1145_v57, %v1143_v56 }
 0x153   : > { %4666 = vmatpush1.bf16.msra.mxu1 %v4665_v24 }
 0x154   : > { %917 = vmatmul.mubr.f32.vlgmr.msra.gmra.mrb[0].mxu0 %v760_v2  ;;  %4668 = vmatprep.subr.bf16.mxu1 %v4667_v59  ;;  %v6096_v2 = vsub.s32 0, %v843_v0 }
 0x155   : > { %922 = vmatprep.mubr.f32.mxu0 %v763_v8 }
 0x156   : > { %v845_v31 = vrot.slane %v840_v30, %v6096_v2 }
 0x157   : > { %4670 = vmatpush1.bf16.msra.mxu1 %v4669_v61 }
 0x158   : > { %923 = vmatmul.mubr.f32.gmra.mrb[2].mxu0 %v762_v15 }
 0x159   : > { %928 = vmatprep.mubr.f32.mxu0 %v765_v19 }
 0x15a   : > { %1223 = vmatmul.mubr.f32.vlgmr.msra.gmra.mrb[8].mxu1 %v6055_v55  ;;  %v1013_v55 = vld [vmem:[%s7002_s6] sm:$0x3] }
 0x15b   : > { %1228 = vmatprep.mubr.f32.mxu1 %v5596_v1  ;;  %v1022_v6 = vrot.slane %v1013_v55, %v6101_v3 }
 0x15c   : > { %929 = vmatmul.mubr.f32.gmra.mrb[4].mxu0 %v764_v25 }
 0x15d   : > { %934 = vmatprep.mubr.f32.mxu0 %v767_v27 }
 0x15e   : > { %1229 = vmatmul.mubr.f32.gmra.mrb[10].mxu1 %v6060_v62  ;;  %v1018_v62 = vrot.slane %v1013_v55, %v6096_v2 }
 0x15f   : > { %1234 = vmatprep.mubr.f32.mxu1 %v5596_v1 }
 0x160   : > { %935 = vmatmul.mubr.f32.gmra.mrb[6].mxu0 %v766_v32  ;;  %v849_v32 = vrot.slane %v840_v30, %v6101_v3 }
 0x161   : > { %940 = vmatprep.mubr.f32.mxu0 %v769_v33 }
 0x162   : > { %1235 = vmatmul.mubr.f32.gmra.mrb[12].mxu1 %v6063_v4 }
 0x163   : > { %1240 = vmatprep.mubr.f32.mxu1 %v5596_v1 }
 0x164   : > { %941 = vmatmul.mubr.f32.gmra.mrb[8].mxu0 %v768_v38 }
 0x165   : > { %946 = vmatprep.mubr.f32.mxu0 %v771_v39 }
 0x166   : > { %1241 = vmatmul.mubr.f32.gmra.mrb[14].mxu1 %v6070_v26 }
 0x168   : > { %947 = vmatmul.mubr.f32.gmra.mrb[10].mxu0 %v770_v44 }
 0x169   : > { %952 = vmatprep.mubr.f32.mxu0 %v773_v45 }
 0x16c   : > { %953 = vmatmul.mubr.f32.gmra.mrb[12].mxu0 %v772_v50 }
 0x16d   : > { %958 = vmatprep.mubr.f32.mxu0 %v775_v51 }
 0x170   : > { %959 = vmatmul.mubr.f32.gmra.mrb[14].mxu0 %v774_v54 }
 0x20c   : > { %v1091_v5 = vpop.f32.mrb[0].mxu1 }
 0x20d   : > { %v1093_v4 = vpop.f32.mrb[1].mxu1  ;;  %v1092_v7 = vadd.f32 %v1091_v5, %v1018_v62 }
 0x20e   : > { %v6105_v8 = vadd.f32 %v1093_v4, %v1022_v6 }
 0x210   : > { %v1097_v26 = vpop.f32.mrb[2].mxu1 }
 0x211   : > { %v1098_v9 = vadd.f32 %v1097_v26, %v1018_v62  ;;  %v1099_v10 = vpop.f32.mrb[3].mxu1 }
 0x212   : > { %v6107_v11 = vadd.f32 %v1099_v10, %v1022_v6 }
 0x213   : > { %v4671_v13 = vpack.c.bf16 %v1098_v9, %v1092_v7  ;;  %v5032_v14 = vpack.i.bf16 %v1098_v9, %v1092_v7 }
 0x214   : > { %v5052_v15 = vpack.i.bf16 %v6107_v11, %v6105_v8  ;;  %v6119_v16 = vpack.c.bf16 %v6107_v11, %v6105_v8  ;;  %v1103_v17 = vpop.f32.mrb[4].mxu1 }
 0x215   : > { %5033 = vrot.lane.b32.xlu0 %v5032_v14, %s5597_s8  ;;  %v1105_v18 = vpop.f32.mrb[5].mxu1  ;;  %4673 = vmatprep.subr.msk.bf16.mxu1 %vm6111_vm1, %v4671_v13  ;;  %v1104_v19 = vadd.f32 %v1103_v17, %v1018_v62  ;;  %v1146_v14 = vld [vmem:[%s7089_s26] sm:$0x3] }
 0x216   : > { %4676 = vmatpush3.bf16.xpose.msk.msra.mxu1 %vm6111_vm1, %v4671_v13  ;;  %v6126_v20 = vadd.f32 %v1105_v18, %v1022_v6  ;;  %v1155_v17 = vrot.slane %v1146_v14, %v6101_v3  ;;  %v1151_v18 = vrot.slane %v1146_v14, %v6096_v2 }
 0x218   : > { %v1109_v21 = vpop.f32.mrb[6].mxu1 }
 0x219   : > { %v1110_v22 = vadd.f32 %v1109_v21, %v1018_v62  ;;  %v1111_v23 = vpop.f32.mrb[7].mxu1 }
 0x21a   : > { %v6128_v24 = vadd.f32 %v1111_v23, %v1022_v6 }
 0x21b   : > { %v5037_v25 = vpack.i.bf16 %v1110_v22, %v1104_v19  ;;  %v4677_v27 = vpack.c.bf16 %v1110_v22, %v1104_v19 }
 0x21c   : > { %v5057_v28 = vpack.i.bf16 %v6128_v24, %v6126_v20  ;;  %v6134_v29 = vpack.c.bf16 %v6128_v24, %v6126_v20  ;;  %v2658_v20 = vld [vmem:[#allocation13 + $0x108] sm:$0xff]  ;;  %v2660_v24 = vld [vmem:[#allocation13 + $0x118] sm:$0xff] }
 0x21d   : > { %5038 = vrot.lane.b32.xlu0 %v5037_v25, %s5597_s8  ;;  %4679 = vmatprep.subr.msk.bf16.mxu1 %vm6111_vm1, %v4677_v27 }
 0x21e   : > { %4682 = vmatpush3.bf16.xpose.msk.msra.mxu1 %vm6111_vm1, %v4677_v27 }
 0x227   : > { %v918_v33 = vpop.f32.mrb[0].mxu0 }
 0x228   : > { %v919_v34 = vadd.f32 %v918_v33, %v845_v31  ;;  %v920_v35 = vpop.f32.mrb[1].mxu0 }
 0x229   : > { %v6146_v36 = vadd.f32 %v920_v35, %v849_v32 }
 0x22a   : > { %v965_v37 = vmul.f32 0.125, %v919_v34 }
 0x22b   : > { %v924_v38 = vpop.f32.mrb[2].mxu0 }
 0x22c   : > { %v925_v39 = vadd.f32 %v924_v38, %v845_v31  ;;  %v926_v40 = vpop.f32.mrb[3].mxu0  ;;  %1623 = vrot.lane.b32.xlu1 %v965_v37, %s5597_s8  ;;  %4391 = vmatprep.mubr.msk.f32.mxu1 %vm1247_vm0, %v965_v37 }
 0x22d   : > { %v6150_v41 = vadd.f32 %v926_v40, %v849_v32  ;;  %v1224_v19 = vpop.f32.mrb[8].mxu1 }
 0x22e   : > { %v967_v42 = vmul.f32 0.125, %v925_v39  ;;  %v1226_v21 = vpop.f32.mrb[9].mxu1  ;;  %v6185_v23 = vadd.f32 %v1224_v19, %v1151_v18 }
 0x22f   : > { %v930_v43 = vpop.f32.mrb[4].mxu0  ;;  %v6183_v22 = vadd.f32 %v1226_v21, %v1155_v17 }
 0x230   : > { %v931_v44 = vadd.f32 %v930_v43, %v845_v31  ;;  %v932_v45 = vpop.f32.mrb[5].mxu0  ;;  %1625 = vrot.lane.b32.xlu1 %v967_v42, %s5597_s8  ;;  %4392 = vmatmul.mubr.msk.f32.vlgmr.msra.gmra.mrb[16].mxu1 %vm1247_vm0, %v967_v42 }
 0x231   : > { %v6154_v46 = vadd.f32 %v932_v45, %v849_v32  ;;  %v1230_v25 = vpop.f32.mrb[10].mxu1 }
 0x232   : > { %v969_v47 = vmul.f32 0.125, %v931_v44  ;;  %v6187_v27 = vadd.f32 %v1230_v25, %v1151_v18  ;;  %v1232_v30 = vpop.f32.mrb[11].mxu1 }
 0x233   : > { %v936_v48 = vpop.f32.mrb[6].mxu0 }
 0x234   : > { %v937_v49 = vadd.f32 %v936_v48, %v845_v31  ;;  %v938_v50 = vpop.f32.mrb[7].mxu0  ;;  %1627 = vrot.lane.b32.xlu0 %v969_v47, %s5597_s8  ;;  %4394 = vmatprep.mubr.msk.f32.mxu1 %vm1247_vm0, %v969_v47  ;;  %v4683_v33 = vpack.c.bf16 %v6187_v27, %v6185_v23 }
 0x235   : > { %v6158_v51 = vadd.f32 %v938_v50, %v849_v32  ;;  %v1236_v37 = vpop.f32.mrb[12].mxu1 }
 0x236   : > { %v971_v52 = vmul.f32 0.125, %v937_v49  ;;  %v1238_v38 = vpop.f32.mrb[13].mxu1  ;;  %4684 = vmatprep.subr.bf16.mxu0 %v4683_v33  ;;  %v6203_v40 = vadd.f32 %v1236_v37, %v1151_v18 }
 0x237   : > { %v942_v53 = vpop.f32.mrb[8].mxu0  ;;  %v6201_v39 = vadd.f32 %v1238_v38, %v1155_v17  ;;  %4686 = vmatpush3.bf16.msra.mxu0 %v4683_v33 }
 0x238   : > { %v943_v54 = vadd.f32 %v942_v53, %v845_v31  ;;  %v944_v56 = vpop.f32.mrb[9].mxu0  ;;  %1629 = vrot.lane.b32.xlu1 %v971_v52, %s5597_s8  ;;  %4395 = vmatmul.mubr.msk.f32.gmra.mrb[18].mxu1 %vm1247_vm0, %v971_v52 }
 0x239   : > { %v6162_v57 = vadd.f32 %v944_v56, %v849_v32  ;;  %v1242_v42 = vpop.f32.mrb[14].mxu1 }
 0x23a   : > { %v973_v58 = vmul.f32 0.125, %v943_v54  ;;  %v6205_v43 = vadd.f32 %v1242_v42, %v1151_v18  ;;  %v1244_v44 = vpop.f32.mrb[15].mxu1 }
 0x23b   : > { %v948_v59 = vpop.f32.mrb[10].mxu0  ;;  %v6207_v45 = vadd.f32 %v1244_v44, %v1155_v17 }
 0x23c   : > { %v949_v60 = vadd.f32 %v948_v59, %v845_v31  ;;  %v950_v61 = vpop.f32.mrb[11].mxu0  ;;  %1631 = vrot.lane.b32.xlu0 %v973_v58, %s5597_s8  ;;  %4397 = vmatprep.mubr.msk.f32.mxu1 %vm1247_vm0, %v973_v58  ;;  %v5047_v47 = vpack.i.bf16 %v6205_v43, %v6203_v40  ;;  %v4687_v48 = vpack.c.bf16 %v6205_v43, %v6203_v40 }
 0x23d   : > { %v6166_v63 = vadd.f32 %v950_v61, %v849_v32  ;;  %v6217_v50 = vpack.c.bf16 %v6207_v45, %v6201_v39 }
 0x23e   : > { %v975_v0 = vmul.f32 0.125, %v949_v60  ;;  %4688 = vmatprep.subr.bf16.mxu0 %v4687_v48 }
 0x23f   : > { %v954_v55 = vpop.f32.mrb[12].mxu0  ;;  %4690 = vmatpush3.bf16.msra.mxu0 %v4687_v48 }
 0x240   : > { %v955_v62 = vadd.f32 %v954_v55, %v845_v31  ;;  %v956_v5 = vpop.f32.mrb[13].mxu0  ;;  %1633 = vrot.lane.b32.xlu1 %v975_v0, %s5597_s8  ;;  %4398 = vmatmul.mubr.msk.f32.gmra.mrb[20].mxu1 %vm1247_vm0, %v975_v0 }
 0x241   : > { %v6170_v6 = vadd.f32 %v956_v5, %v849_v32 }
 0x242   : > { %v977_v4 = vmul.f32 0.125, %v955_v62 }
 0x243   : > { %v960_v7 = vpop.f32.mrb[14].mxu0 }
 0x244   : > { %v961_v26 = vadd.f32 %v960_v7, %v845_v31  ;;  %v962_v9 = vpop.f32.mrb[15].mxu0  ;;  %1635 = vrot.lane.b32.xlu0 %v977_v4, %s5597_s8  ;;  %4400 = vmatprep.mubr.msk.f32.mxu1 %vm1247_vm0, %v977_v4  ;;  %v6189_v31 = vadd.f32 %v1232_v30, %v1155_v17 }
 0x245   : > { %v6174_v10 = vadd.f32 %v962_v9, %v849_v32  ;;  %v5042_v32 = vpack.i.bf16 %v6187_v27, %v6185_v23 }
 0x246   : > { %v979_v13 = vmul.f32 0.125, %v961_v26  ;;  %v5062_v34 = vpack.i.bf16 %v6189_v31, %v6183_v22  ;;  %v6199_v35 = vpack.c.bf16 %v6189_v31, %v6183_v22 }
 0x248   : > { %1637 = vrot.lane.b32.xlu1 %v979_v13, %s5597_s8  ;;  %4401 = vmatmul.mubr.msk.f32.gmra.mrb[22].mxu1 %vm1247_vm0, %v979_v13 }
 0x287   : > { %v5034_v52 = vpop.permute.xlu0 %5033 }
 0x288   : > { %v5036_v53 = vunpack.i.h.bf16 %v5034_v52  ;;  %v5035_v54 = vunpack.i.l.bf16 %v5034_v52 }
 0x28a   : > { %v4691_v56 = vpack.c.bf16 %v5036_v53, %v5035_v54 }
 0x28c   : > { %4693 = vmatprep.subr.msk.bf16.mxu1 %vm6111_vm1, %v4691_v56 }
 0x28d   : > { %4696 = vmatpush3.bf16.xpose.msk.msra.mxu1 %vm6111_vm1, %v4691_v56 }
 0x28f   : > { %v5039_v58 = vpop.permute.xlu0 %5038 }
 0x290   : > { %v5041_v59 = vunpack.i.h.bf16 %v5039_v58  ;;  %v5040_v60 = vunpack.i.l.bf16 %v5039_v58 }
 0x292   : > { %v4697_v61 = vpack.c.bf16 %v5041_v59, %v5040_v60 }
 0x294   : > { %4699 = vmatprep.subr.msk.bf16.mxu1 %vm6111_vm1, %v4697_v61 }
 0x295   : > { %4702 = vmatpush3.bf16.xpose.msk.msra.mxu1 %vm6111_vm1, %v4697_v61 }
 0x29e   : > { %v1624_v0 = vpop.permute.xlu1 %1623 }
 0x29f   : > { %4431 = vmatprep.mubr.msk.f32.mxu1 %vm1247_vm0, %v1624_v0 }
 0x2a2   : > { %v1626_v55 = vpop.permute.xlu1 %1625 }
 0x2a3   : > { %4432 = vmatmul.mubr.msk.f32.vlgmr.msra.gmra.mrb[24].mxu1 %vm1247_vm0, %v1626_v55 }
 0x2a6   : > { %v1628_v62 = vpop.permute.xlu0 %1627 }
 0x2a7   : > { %4434 = vmatprep.mubr.msk.f32.mxu1 %vm1247_vm0, %v1628_v62 }
 0x2aa   : > { %v1630_v5 = vpop.permute.xlu1 %1629 }
 0x2ab   : > { %4435 = vmatmul.mubr.msk.f32.gmra.mrb[26].mxu1 %vm1247_vm0, %v1630_v5 }
 0x2ae   : > { %v1632_v4 = vpop.permute.xlu0 %1631 }
 0x2af   : > { %4437 = vmatprep.mubr.msk.f32.mxu1 %vm1247_vm0, %v1632_v4 }
 0x2b2   : > { %v1634_v7 = vpop.permute.xlu1 %1633 }
 0x2b3   : > { %4438 = vmatmul.mubr.msk.f32.gmra.mrb[28].mxu1 %vm1247_vm0, %v1634_v7 }
 0x2b6   : > { %v1636_v26 = vpop.permute.xlu0 %1635 }
 0x2b7   : > { %4440 = vmatprep.mubr.msk.f32.mxu1 %vm1247_vm0, %v1636_v26 }
 0x2ba   : > { %v1638_v9 = vpop.permute.xlu1 %1637 }
 0x2bb   : > { %4441 = vmatmul.mubr.msk.f32.gmra.mrb[30].mxu1 %vm1247_vm0, %v1638_v9 }
 0x2bc   : > { %2113 = vmatprep.mubr.f32.mxu1 %v5596_v1 }
 0x303   : > { %v4393_v13 = vpop.f32.mrb[16].mxu1 }
 0x304   : > { %v1350_v14 = vpop.f32.mrb[17].mxu1  ;;  %v1393_v17 = vsel %vm1389_vm2, %v4393_v13, -inf }
 0x305   : > { %1394 = vmax.xlane.f32.xlu1 %v1393_v17  ;;  %v1390_v18 = vsel %vm1389_vm2, %v1350_v14, -inf }
 0x306   : > { %1391 = vmax.xlane.f32.xlu0 %v1390_v18 }
 0x30b   : > { %v4396_v19 = vpop.f32.mrb[18].mxu1 }
 0x30c   : > { %v1360_v21 = vpop.f32.mrb[19].mxu1  ;;  %v1399_v30 = vsel %vm1389_vm2, %v4396_v19, -inf }
 0x30d   : > { %v1396_v25 = vsel %vm1389_vm2, %v1360_v21, -inf }
 0x30e   : > { %1397 = vmax.xlane.f32.xlu0 %v1396_v25 }
 0x312   : > { %1400 = vmax.xlane.f32.xlu0 %v1399_v30 }
 0x313   : > { %v4399_v33 = vpop.f32.mrb[20].mxu1 }
 0x314   : > { %v1370_v37 = vpop.f32.mrb[21].mxu1  ;;  %v1405_v38 = vsel %vm1389_vm2, %v4399_v33, -inf }
 0x315   : > { %v1402_v42 = vsel %vm1389_vm2, %v1370_v37, -inf }
 0x316   : > { %1406 = vmax.xlane.f32.xlu0 %v1405_v38  ;;  %1403 = vmax.xlane.f32.xlu1 %v1402_v42 }
 0x31b   : > { %v6242_v44 = vpop.f32.mrb[22].mxu1 }
 0x31c   : > { %v6244_v48 = vpop.f32.mrb[23].mxu1  ;;  %v1411_v52 = vsel %vm1389_vm2, %v6242_v44, -inf }
 0x31d   : > { %1412 = vmax.xlane.f32.xlu0 %v1411_v52  ;;  %v1408_v53 = vsel %vm1389_vm2, %v6244_v48, -inf }
 0x31e   : > { %1409 = vmax.xlane.f32.xlu1 %v1408_v53 }
 0x376   : > { %v6250_v54 = vpop.f32.mrb[24].mxu1 }
 0x377   : > { %v6252_v56 = vpop.f32.mrb[25].mxu1  ;;  %v1779_v58 = vsel %vm1389_vm2, %v6250_v54, -inf }
 0x378   : > { %1780 = vmax.xlane.f32.xlu0 %v1779_v58  ;;  %v1776_v59 = vsel %vm1389_vm2, %v6252_v56, -inf }
 0x379   : > { %1777 = vmax.xlane.f32.xlu1 %v1776_v59 }
 0x37e   : > { %v6258_v60 = vpop.f32.mrb[26].mxu1 }
 0x37f   : > { %v6260_v61 = vpop.f32.mrb[27].mxu1  ;;  %v1785_v0 = vsel %vm1389_vm2, %v6258_v60, -inf }
 0x380   : > { %1786 = vmax.xlane.f32.xlu0 %v1785_v0  ;;  %v1782_v55 = vsel %vm1389_vm2, %v6260_v61, -inf }
 0x381   : > { %1783 = vmax.xlane.f32.xlu1 %v1782_v55 }
 0x386   : > { %v6266_v62 = vpop.f32.mrb[28].mxu1 }
 0x387   : > { %v6268_v5 = vpop.f32.mrb[29].mxu1  ;;  %v1791_v4 = vsel %vm1389_vm2, %v6266_v62, -inf }
 0x388   : > { %1792 = vmax.xlane.f32.xlu0 %v1791_v4  ;;  %v1788_v7 = vsel %vm1389_vm2, %v6268_v5, -inf }
 0x389   : > { %1789 = vmax.xlane.f32.xlu1 %v1788_v7 }
 0x38e   : > { %v6274_v26 = vpop.f32.mrb[30].mxu1 }
 0x38f   : > { %v6276_v9 = vpop.f32.mrb[31].mxu1  ;;  %v1797_v17 = vsel %vm1389_vm2, %v6274_v26, -inf }
 0x390   : > { %1798 = vmax.xlane.f32.xlu0 %v1797_v17  ;;  %v1794_v18 = vsel %vm1389_vm2, %v6276_v9, -inf }
 0x391   : > { %1795 = vmax.xlane.f32.xlu1 %v1794_v18 }
 0x392   : > { %v1395_v25 = vpop.xlane.xlu1 %1394 }
 0x393   : > { %v1415_v30 = vsub.f32 %v4393_v13, %v1395_v25  ;;  %v1392_v38 = vpop.xlane.xlu0 %1391 }
 0x394   : > { %v1414_v42 = vsub.f32 %v1350_v14, %v1392_v38 }
 0x395   : > { %v1424_v52 = vmul.f32 1.442695, %v1415_v30 }
 0x396   : > { %v1422_v53 = vmul.f32 1.442695, %v1414_v42 }
 0x397   : > { %5074 = vpow2.f32 %v1424_v52 }
 0x398   : > { %5076 = vpow2.f32 %v1422_v53 }
 0x39b   : > { %v1398_v58 = vpop.xlane.xlu0 %1397 }
 0x39c   : > { %v1416_v59 = vsub.f32 %v1360_v21, %v1398_v58 }
 0x39e   : > { %v1426_v0 = vmul.f32 1.442695, %v1416_v59 }
 0x39f   : > { %v1401_v55 = vpop.xlane.xlu0 %1400 }
 0x3a0   : > { %5078 = vpow2.f32 %v1426_v0  ;;  %v1417_v4 = vsub.f32 %v4396_v19, %v1401_v55 }
 0x3a1   : > { %v6282_v7 = vpop.eup %5074 }
 0x3a2   : > { %v6284_v17 = vpop.eup %5076  ;;  %v1428_v49 = vmul.f32 1.442695, %v1417_v4  ;;  %v1441_v13 = vsel %vm1389_vm2, %v6282_v7, 0.0 }
 0x3a3   : > { %v1407_v18 = vpop.xlane.xlu0 %1406  ;;  %v1404_v14 = vpop.xlane.xlu1 %1403  ;;  %1442 = vadd.xlane.f32.xlu0 %v1441_v13  ;;  %v1438_v25 = vsel %vm1389_vm2, %v6284_v17, 0.0 }
 0x3a4   : > { %5080 = vpow2.f32 %v1428_v49  ;;  %v1419_v21 = vsub.f32 %v4399_v33, %v1407_v18  ;;  %v1418_v30 = vsub.f32 %v1370_v37, %v1404_v14  ;;  %1439 = vadd.xlane.f32.xlu1 %v1438_v25 }
 0x3a6   : > { %v1432_v38 = vmul.f32 1.442695, %v1419_v21  ;;  %v1430_v19 = vmul.f32 1.442695, %v1418_v30 }
 0x3a8   : > { %5082 = vpow2.f32 %v1432_v38 }
 0x3a9   : > { %5084 = vpow2.f32 %v1430_v19 }
 0x3aa   : > { %v6290_v42 = vpop.eup %5078  ;;  %v1413_v52 = vpop.xlane.xlu0 %1412 }
 0x3ab   : > { %v1421_v53 = vsub.f32 %v6242_v44, %v1413_v52  ;;  %v1410_v58 = vpop.xlane.xlu1 %1409  ;;  %v1444_v59 = vsel %vm1389_vm2, %v6290_v42, 0.0 }
 0x3ac   : > { %v1420_v0 = vsub.f32 %v6244_v48, %v1410_v58  ;;  %1445 = vadd.xlane.f32.xlu1 %v1444_v59 }
 0x3ad   : > { %v1436_v49 = vmul.f32 1.442695, %v1421_v53 }
 0x3ae   : > { %v6296_v33 = vpop.eup %5080  ;;  %v1434_v37 = vmul.f32 1.442695, %v1420_v0 }
 0x3af   : > { %5086 = vpow2.f32 %v1436_v49  ;;  %v1447_v55 = vsel %vm1389_vm2, %v6296_v33, 0.0 }
 0x3b0   : > { %5088 = vpow2.f32 %v1434_v37  ;;  %1448 = vadd.xlane.f32.xlu0 %v1447_v55 }
 0x3b2   : > { %v6300_v4 = vpop.eup %5082 }
 0x3b3   : > { %v6302_v44 = vpop.eup %5084  ;;  %v1453_v13 = vsel %vm1389_vm2, %v6300_v4, 0.0 }
 0x3b4   : > { %1454 = vadd.xlane.f32.xlu0 %v1453_v13  ;;  %v1450_v48 = vsel %vm1389_vm2, %v6302_v44, 0.0 }
 0x3b5   : > { %1451 = vadd.xlane.f32.xlu1 %v1450_v48 }
 0x3b9   : > { %v6308_v18 = vpop.eup %5086 }
 0x3ba   : > { %v6310_v14 = vpop.eup %5088  ;;  %v1459_v25 = vsel %vm1389_vm2, %v6308_v18, 0.0 }
 0x3bb   : > { %1460 = vadd.xlane.f32.xlu0 %v1459_v25  ;;  %v1456_v21 = vsel %vm1389_vm2, %v6310_v14, 0.0 }
 0x3bc   : > { %1457 = vadd.xlane.f32.xlu1 %v1456_v21 }
 0x405   : > { %v1781_v30 = vpop.xlane.xlu0 %1780 }
 0x406   : > { %v1801_v38 = vsub.f32 %v6250_v54, %v1781_v30  ;;  %v1778_v19 = vpop.xlane.xlu1 %1777 }
 0x407   : > { %v1800_v52 = vsub.f32 %v6252_v56, %v1778_v19 }
 0x408   : > { %v1810_v53 = vmul.f32 1.442695, %v1801_v38 }
 0x409   : > { %v1808_v58 = vmul.f32 1.442695, %v1800_v52 }
 0x40a   : > { %5090 = vpow2.f32 %v1810_v53 }
 0x40b   : > { %5092 = vpow2.f32 %v1808_v58 }
 0x40d   : > { %v1787_v59 = vpop.xlane.xlu0 %1786 }
 0x40e   : > { %v1803_v0 = vsub.f32 %v6258_v60, %v1787_v59  ;;  %v1784_v49 = vpop.xlane.xlu1 %1783 }
 0x40f   : > { %v1802_v37 = vsub.f32 %v6260_v61, %v1784_v49 }
 0x410   : > { %v1814_v55 = vmul.f32 1.442695, %v1803_v0 }
 0x411   : > { %v1812_v13 = vmul.f32 1.442695, %v1802_v37 }
 0x412   : > { %5094 = vpow2.f32 %v1814_v55 }
 0x413   : > { %5096 = vpow2.f32 %v1812_v13 }
 0x414   : > { %v6320_v48 = vpop.eup %5090 }
 0x415   : > { %v6322_v54 = vpop.eup %5092  ;;  %v1793_v25 = vpop.xlane.xlu0 %1792  ;;  %v1827_v56 = vsel %vm1389_vm2, %v6320_v48, 0.0 }
 0x416   : > { %v1805_v21 = vsub.f32 %v6266_v62, %v1793_v25  ;;  %1828 = vadd.xlane.f32.xlu0 %v1827_v56  ;;  %v1790_v30 = vpop.xlane.xlu1 %1789  ;;  %v1824_v60 = vsel %vm1389_vm2, %v6322_v54, 0.0 }
 0x417   : > { %v1804_v61 = vsub.f32 %v6268_v5, %v1790_v30  ;;  %1825 = vadd.xlane.f32.xlu1 %v1824_v60 }
 0x418   : > { %v1818_v38 = vmul.f32 1.442695, %v1805_v21 }
 0x419   : > { %v1816_v19 = vmul.f32 1.442695, %v1804_v61 }
 0x41a   : > { %5098 = vpow2.f32 %v1818_v38 }
 0x41b   : > { %5100 = vpow2.f32 %v1816_v19 }
 0x41c   : > { %v6330_v52 = vpop.eup %5094 }
 0x41d   : > { %v6332_v53 = vpop.eup %5096  ;;  %v1799_v58 = vpop.xlane.xlu0 %1798  ;;  %v1833_v62 = vsel %vm1389_vm2, %v6330_v52, 0.0 }
 0x41e   : > { %v1807_v59 = vsub.f32 %v6274_v26, %v1799_v58  ;;  %1834 = vadd.xlane.f32.xlu0 %v1833_v62  ;;  %v1796_v0 = vpop.xlane.xlu1 %1795  ;;  %v1830_v5 = vsel %vm1389_vm2, %v6332_v53, 0.0 }
 0x41f   : > { %v1806_v49 = vsub.f32 %v6276_v9, %v1796_v0  ;;  %1831 = vadd.xlane.f32.xlu1 %v1830_v5 }
 0x420   : > { %v1822_v37 = vmul.f32 1.442695, %v1807_v59 }
 0x421   : > { %v1820_v55 = vmul.f32 1.442695, %v1806_v49 }
 0x422   : > { %5102 = vpow2.f32 %v1822_v37 }
 0x423   : > { %5104 = vpow2.f32 %v1820_v55 }
 0x424   : > { %v6340_v13 = vpop.eup %5098 }
 0x425   : > { %v6342_v25 = vpop.eup %5100  ;;  %v1839_v56 = vsel %vm1389_vm2, %v6340_v13, 0.0 }
 0x426   : > { %1840 = vadd.xlane.f32.xlu0 %v1839_v56  ;;  %v1836_v26 = vsel %vm1389_vm2, %v6342_v25, 0.0 }
 0x427   : > { %1837 = vadd.xlane.f32.xlu1 %v1836_v26 }
 0x42c   : > { %v6348_v21 = vpop.eup %5102 }
 0x42d   : > { %v6350_v9 = vpop.eup %5104  ;;  %v1845_v30 = vsel %vm1389_vm2, %v6348_v21, 0.0 }
 0x42e   : > { %1846 = vadd.xlane.f32.xlu0 %v1845_v30  ;;  %v1842_v60 = vsel %vm1389_vm2, %v6350_v9, 0.0 }
 0x42f   : > { %1843 = vadd.xlane.f32.xlu1 %v1842_v60 }
 0x430   : > { %v1443_v61 = vpop.xlane.xlu0 %1442 }
 0x431   : > { %5106 = vrcp.f32 %v1443_v61  ;;  %v1440_v38 = vpop.xlane.xlu1 %1439  ;;  %v2010_v61 = vld [vmem:[#allocation13 + $0x88] sm:$0xff] }
 0x432   : > { %5108 = vrcp.f32 %v1440_v38  ;;  %v2009_v38 = vld [vmem:[#allocation13 + $0x80] sm:$0xff] }
 0x439   : > { %v1446_v19 = vpop.xlane.xlu1 %1445 }
 0x43a   : > { %5110 = vrcp.f32 %v1446_v19  ;;  %v2011_v19 = vld [vmem:[#allocation13 + $0x90] sm:$0xff] }
 0x43b   : > { %v5107_v58 = vpop.eup %5106 }
 0x43c   : > { %v5109_v62 = vpop.eup %5108  ;;  %v1471_v5 = vmul.f32 %v5107_v58, %v6282_v7  ;;  %v2014_v58 = vld [vmem:[#allocation13 + $0xa8] sm:$0xff] }
 0x43d   : > { %v1449_v59 = vpop.xlane.xlu0 %1448  ;;  %v1470_v0 = vmul.f32 %v5109_v62, %v6284_v17  ;;  %v2016_v62 = vld [vmem:[#allocation13 + $0xb8] sm:$0xff] }
 0x43e   : > { %5112 = vrcp.f32 %v1449_v59  ;;  %v4713_v59 = vpack.c.bf16 %v2011_v19, %v2009_v38 }
 0x43f   : > { %4411 = vmatprep.mubr.msk.f32.mxu0 %vm1389_vm2, %v1470_v0  ;;  %v4715_v0 = vpack.c.bf16 %v2016_v62, %v2014_v58 }
 0x440   : > { %5043 = vrot.lane.b32.xlu1 %v5042_v32, %s5597_s8  ;;  %4412 = vmatmul.mubr.msk.f32.vlgmr.msra.gmra.mrb[16].mxu0 %vm1389_vm2, %v1471_v5  ;;  %v2013_v5 = vld [vmem:[#allocation13 + $0xa0] sm:$0xff] }
 0x441   : > { %v1455_v49 = vpop.xlane.xlu0 %1454 }
 0x442   : > { %5114 = vrcp.f32 %v1455_v49  ;;  %v1452_v37 = vpop.xlane.xlu1 %1451  ;;  %v2015_v49 = vld [vmem:[#allocation13 + $0xb0] sm:$0xff] }
 0x443   : > { %5116 = vrcp.f32 %v1452_v37 }
 0x444   : > { %v5111_v55 = vpop.eup %5110  ;;  %5048 = vrot.lane.b32.xlu0 %v5047_v47, %s5597_s8 }
 0x445   : > { %v1472_v7 = vmul.f32 %v5111_v55, %v6290_v42  ;;  %v2020_v55 = vld [vmem:[#allocation13 + $0xd8] sm:$0xff] }
 0x447   : > { %4414 = vmatprep.mubr.msk.f32.mxu0 %vm1389_vm2, %v1472_v7 }
 0x448   : > { %v5113_v17 = vpop.eup %5112  ;;  %v1461_v56 = vpop.xlane.xlu0 %1460 }
 0x449   : > { %5118 = vrcp.f32 %v1461_v56  ;;  %v1458_v23 = vpop.xlane.xlu1 %1457  ;;  %v1473_v27 = vmul.f32 %v5113_v17, %v6296_v33  ;;  %v4717_v17 = vpack.c.bf16 %v2015_v49, %v2013_v5 }
 0x44a   : > { %5120 = vrcp.f32 %v1458_v23  ;;  %v2017_v23 = vld [vmem:[#allocation13 + $0xc0] sm:$0xff] }
 0x44b   : > { %4415 = vmatmul.mubr.msk.f32.gmra.mrb[18].mxu0 %vm1389_vm2, %v1473_v27  ;;  %v2019_v27 = vld [vmem:[#allocation13 + $0xd0] sm:$0xff] }
 0x44c   : > { %v5115_v32 = vpop.eup %5114 }
 0x44d   : > { %v5117_v26 = vpop.eup %5116  ;;  %v1475_v30 = vmul.f32 %v5115_v32, %v6300_v4  ;;  %v2012_v4 = vld [vmem:[#allocation13 + $0x98] sm:$0xff]  ;;  %v2022_v32 = vld [vmem:[#allocation13 + $0xe8] sm:$0xff] }
 0x44e   : > { %v1474_v40 = vmul.f32 %v5117_v26, %v6302_v44  ;;  %v4711_v44 = vpack.c.bf16 %v2012_v4, %v2010_v61  ;;  %v2024_v26 = vld [vmem:[#allocation13 + $0xf8] sm:$0xff] }
 0x450   : > { %4417 = vmatprep.mubr.msk.f32.mxu0 %vm1389_vm2, %v1474_v40  ;;  %4712 = vmatprep.subr.bf16.mxu1 %v4711_v44 }
 0x451   : > { %4418 = vmatmul.mubr.msk.f32.gmra.mrb[20].mxu0 %vm1389_vm2, %v1475_v30  ;;  %4714 = vmatpush1.bf16.msra.mxu1 %v4713_v59 }
 0x452   : > { %4716 = vmatprep.subr.bf16.mxu1 %v4715_v0 }
 0x453   : > { %v5119_v43 = vpop.eup %5118 }
 0x454   : > { %v5121_v47 = vpop.eup %5120  ;;  %v1477_v60 = vmul.f32 %v5119_v43, %v6308_v18  ;;  %v4721_v43 = vpack.c.bf16 %v2019_v27, %v2017_v23 }
 0x455   : > { %v1476_v42 = vmul.f32 %v5121_v47, %v6310_v14  ;;  %v2018_v14 = vld [vmem:[#allocation13 + $0xc8] sm:$0xff]  ;;  %4718 = vmatpush1.bf16.msra.mxu1 %v4717_v17  ;;  %v4723_v47 = vpack.c.bf16 %v2024_v26, %v2022_v32  ;;  %v6405_v26 = vmul.f32 0.125, %v6146_v36  ;;  %v6426_v36 = vmul.f32 0.125, %v6158_v51 }
 0x456   : > { %v4719_v56 = vpack.c.bf16 %v2020_v55, %v2018_v14  ;;  %v6448_v51 = vmul.f32 0.125, %v6174_v10  ;;  %v1608_v10 = vld [vmem:[#allocation13 + $0x8] sm:$0xff] }
 0x457   : > { %4420 = vmatprep.mubr.msk.f32.mxu0 %vm1389_vm2, %v1476_v42  ;;  %v2021_v42 = vld [vmem:[#allocation13 + $0xe0] sm:$0xff] }
 0x458   : > { %4421 = vmatmul.mubr.msk.f32.gmra.mrb[22].mxu0 %vm1389_vm2, %v1477_v60  ;;  %4720 = vmatprep.subr.bf16.mxu1 %v4719_v56  ;;  %v2023_v60 = vld [vmem:[#allocation13 + $0xf0] sm:$0xff] }
 0x459   : > { %4722 = vmatpush1.bf16.msra.mxu1 %v4721_v43  ;;  %v4725_v61 = vpack.c.bf16 %v2023_v60, %v2021_v42  ;;  %v1609_v42 = vld [vmem:[#allocation13 + $0x10] sm:$0xff]  ;;  %v1612_v60 = vld [vmem:[#allocation13 + $0x28] sm:$0xff] }
 0x45a   : > { %4724 = vmatprep.subr.bf16.mxu1 %v4723_v47  ;;  %v1607_v47 = vld [vmem:[#allocation13] sm:$0xff] }
 0x45d   : > { %4726 = vmatpush1.bf16.msra.mxu1 %v4725_v61 }
 0x4a3   : > { %v1829_v18 = vpop.xlane.xlu0 %1828 }
 0x4a4   : > { %v1826_v33 = vpop.xlane.xlu1 %1825 }
 0x4a5   : > { %5122 = vrcp.f32 %v1826_v33 }
 0x4a6   : > { %5124 = vrcp.f32 %v1829_v18 }
 0x4ab   : > { %v1835_v30 = vpop.xlane.xlu0 %1834 }
 0x4ac   : > { %v1832_v40 = vpop.xlane.xlu1 %1831 }
 0x4ad   : > { %5126 = vrcp.f32 %v1832_v40  ;;  %v1610_v40 = vld [vmem:[#allocation13 + $0x18] sm:$0xff] }
 0x4ae   : > { %5128 = vrcp.f32 %v1835_v30  ;;  %v4727_v43 = vpack.c.bf16 %v1610_v40, %v1608_v10 }
 0x4af   : > { %v5123_v37 = vpop.eup %5122 }
 0x4b0   : > { %v1856_v7 = vmul.f32 %v5123_v37, %v6322_v54  ;;  %v5125_v14 = vpop.eup %5124  ;;  %4728 = vmatprep.subr.bf16.mxu1 %v4727_v43 }
 0x4b1   : > { %v1857_v18 = vmul.f32 %v5125_v14, %v6320_v48  ;;  %v1617_v14 = vld [vmem:[#allocation13 + $0x50] sm:$0xff] }
 0x4b2   : > { %4451 = vmatprep.mubr.msk.f32.mxu0 %vm1389_vm2, %v1856_v7 }
 0x4b3   : > { %v1841_v33 = vpop.xlane.xlu0 %1840 }
 0x4b4   : > { %v1838_v54 = vpop.xlane.xlu1 %1837 }
 0x4b5   : > { %5130 = vrcp.f32 %v1838_v54  ;;  %v4729_v54 = vpack.c.bf16 %v1609_v42, %v1607_v47 }
 0x4b6   : > { %5132 = vrcp.f32 %v1841_v33  ;;  %v1614_v33 = vld [vmem:[#allocation13 + $0x38] sm:$0xff] }
 0x4b7   : > { %v5127_v37 = vpop.eup %5126 }
 0x4b8   : > { %v5129_v55 = vpop.eup %5128  ;;  %v1858_v7 = vmul.f32 %v5127_v37, %v6332_v53 }
 0x4b9   : > { %v1859_v56 = vmul.f32 %v5129_v55, %v6330_v52  ;;  %v1622_v55 = vld [vmem:[#allocation13 + $0x78] sm:$0xff] }
 0x4bb   : > { %v1847_v4 = vpop.xlane.xlu0 %1846 }
 0x4bc   : > { %v1844_v38 = vpop.xlane.xlu1 %1843 }
 0x4bd   : > { %5134 = vrcp.f32 %v1844_v38  ;;  %v1611_v38 = vld [vmem:[#allocation13 + $0x20] sm:$0xff] }
 0x4be   : > { %5136 = vrcp.f32 %v1847_v4  ;;  %v4731_v4 = vpack.c.bf16 %v1614_v33, %v1612_v60 }
 0x4bf   : > { %v5049_v44 = vpop.permute.xlu0 %5048  ;;  %v5131_v17 = vpop.eup %5130 }
 0x4c0   : > { %v5044_v19 = vpop.permute.xlu1 %5043  ;;  %v5051_v58 = vunpack.i.h.bf16 %v5049_v44  ;;  %v5050_v62 = vunpack.i.l.bf16 %v5049_v44  ;;  %v5133_v23 = vpop.eup %5132  ;;  %v1860_v27 = vmul.f32 %v5131_v17, %v6342_v25  ;;  %v1613_v44 = vld [vmem:[#allocation13 + $0x30] sm:$0xff] }
 0x4c1   : > { %v5046_v59 = vunpack.i.h.bf16 %v5044_v19  ;;  %v5045_v0 = vunpack.i.l.bf16 %v5044_v19  ;;  %v1861_v48 = vmul.f32 %v5133_v23, %v6340_v13  ;;  %v6418_v13 = vmul.f32 0.125, %v6154_v46  ;;  %v1619_v23 = vld [vmem:[#allocation13 + $0x60] sm:$0xff] }
 0x4c2   : > { %v4707_v49 = vpack.c.bf16 %v5051_v58, %v5050_v62  ;;  %v6441_v46 = vmul.f32 0.125, %v6170_v6  ;;  %v1616_v58 = vld [vmem:[#allocation13 + $0x48] sm:$0xff]  ;;  %v1618_v62 = vld [vmem:[#allocation13 + $0x58] sm:$0xff] }
 0x4c3   : > { %v4703_v5 = vpack.c.bf16 %v5046_v59, %v5045_v0  ;;  %v4733_v59 = vpack.c.bf16 %v1613_v44, %v1611_v38 }
 0x4c5   : > { %4704 = vmatprep.subr.bf16.mxu0 %v4703_v5 }
 0x4c6   : > { %4706 = vmatpush3.bf16.msra.mxu0 %v4703_v5  ;;  %v4735_v5 = vpack.c.bf16 %v1618_v62, %v1616_v58 }
 0x4c7   : > { %4708 = vmatprep.subr.bf16.mxu0 %v4707_v49  ;;  %v5135_v32 = vpop.eup %5134 }
 0x4c8   : > { %v5137_v53 = vpop.eup %5136  ;;  %v1862_v52 = vmul.f32 %v5135_v32, %v6350_v9 }
 0x4c9   : > { %v1863_v25 = vmul.f32 %v5137_v53, %v6348_v21 }
 0x4ca   : > { %4710 = vmatpush3.bf16.msra.mxu0 %v4707_v49  ;;  %v1615_v49 = vld [vmem:[#allocation13 + $0x40] sm:$0xff] }
 0x4cb   : > { %4745 = vmatprep.subr.msk.bf16.mxu0 %vm6111_vm1, %v6119_v16 }
 0x4cd   : > { %4452 = vmatmul.mubr.msk.f32.vlgmr.msra.gmra.mrb[24].mxu0 %vm1389_vm2, %v1857_v18  ;;  %v1620_v18 = vld [vmem:[#allocation13 + $0x68] sm:$0xff] }
 0x4ce   : > { %4454 = vmatprep.mubr.msk.f32.mxu0 %vm1389_vm2, %v1858_v7  ;;  %v4737_v7 = vpack.c.bf16 %v1617_v14, %v1615_v49 }
 0x4d1   : > { %4455 = vmatmul.mubr.msk.f32.gmra.mrb[26].mxu0 %vm1389_vm2, %v1859_v56  ;;  %v4739_v56 = vpack.c.bf16 %v1622_v55, %v1620_v18 }
 0x4d2   : > { %4457 = vmatprep.mubr.msk.f32.mxu0 %vm1389_vm2, %v1860_v27  ;;  %v1621_v27 = vld [vmem:[#allocation13 + $0x70] sm:$0xff] }
 0x4d3   : > { %4748 = vmatpush3.bf16.xpose.msk.msra.mxu0 %vm6111_vm1, %v6119_v16  ;;  %v6415_v16 = vmul.f32 0.125, %v6150_v41  ;;  %v6438_v41 = vmul.f32 0.125, %v6166_v63 }
 0x4d4   : > { %4751 = vmatprep.subr.msk.bf16.mxu0 %vm6111_vm1, %v6134_v29 }
 0x4d5   : > { %4458 = vmatmul.mubr.msk.f32.gmra.mrb[28].mxu0 %vm1389_vm2, %v1861_v48  ;;  %v4741_v48 = vpack.c.bf16 %v1621_v27, %v1619_v23 }
 0x4d6   : > { %4460 = vmatprep.mubr.msk.f32.mxu0 %vm1389_vm2, %v1862_v52 }
 0x4d9   : > { %4461 = vmatmul.mubr.msk.f32.gmra.mrb[30].mxu0 %vm1389_vm2, %v1863_v25 }
 0x4da   : > { %4471 = vmatprep.mubr.msk.f32.mxu0 %vm1247_vm0, %v6405_v26 }
 0x4db   : > { %4754 = vmatpush3.bf16.xpose.msk.msra.mxu0 %vm6111_vm1, %v6134_v29  ;;  %v6430_v29 = vmul.f32 0.125, %v6162_v57 }
 0x4dc   : > { %4756 = vmatprep.subr.bf16.mxu0 %v6199_v35 }
 0x4e2   : > { %4472 = vmatmul.mubr.msk.f32.vlgmr.msra.gmra.mrb[32].mxu0 %vm1247_vm0, %v6415_v16 }
 0x4e3   : > { %4474 = vmatprep.mubr.msk.f32.mxu0 %vm1247_vm0, %v6418_v13  ;;  %4758 = vmatpush3.bf16.msra.mxu0 %v6199_v35 }
 0x4e4   : > { %4760 = vmatprep.subr.bf16.mxu0 %v6217_v50 }
 0x4e6   : > { %4475 = vmatmul.mubr.msk.f32.gmra.mrb[34].mxu0 %vm1247_vm0, %v6426_v36 }
 0x4e7   : > { %4477 = vmatprep.mubr.msk.f32.mxu0 %vm1247_vm0, %v6430_v29  ;;  %4762 = vmatpush3.bf16.msra.mxu0 %v6217_v50 }
 0x4ea   : > { %4478 = vmatmul.mubr.msk.f32.gmra.mrb[36].mxu0 %vm1247_vm0, %v6438_v41 }
 0x4eb   : > { %4480 = vmatprep.mubr.msk.f32.mxu0 %vm1247_vm0, %v6441_v46 }
 0x4ee   : > { %4481 = vmatmul.mubr.msk.f32.gmra.mrb[38].mxu0 %vm1247_vm0, %v6448_v51 }
 0x513   : > { %v6452_v57 = vpop.f32.mrb[16].mxu0 }
 0x514   : > { %v6454_v35 = vpop.f32.mrb[17].mxu0 }
 0x51e   : > { %v6456_v63 = vpop.f32.mrb[18].mxu0 }
 0x51f   : > { %v6458_v6 = vpop.f32.mrb[19].mxu0 }
 0x524   : > { %v6460_v50 = vpop.f32.mrb[20].mxu0 }
 0x525   : > { %v6462_v21 = vpop.f32.mrb[21].mxu0 }
 0x52b   : > { %v6464_v9 = vpop.f32.mrb[22].mxu0 }
 0x52c   : > { %v6466_v30 = vpop.f32.mrb[23].mxu0 }
 0x5a0   : > { %v4453_v61 = vpop.f32.mrb[24].mxu0 }
 0x5a1   : > { %v1970_v19 = vpop.f32.mrb[25].mxu0 }
 0x5a2   : > { %4149 = vmatmul.mubr.msk.f32.vlgmr.msra.gmra.mrb[32].mxu1 %vm1247_vm0, %v1970_v19 }
 0x5a3   : > { %2119 = vmatprep.mubr.f32.mxu1 %v5596_v1  ;;  %4730 = vmatpush1.bf16.msra.mxu1 %v4729_v54 }
 0x5a4   : > { %v4456_v0 = vpop.f32.mrb[26].mxu0  ;;  %4732 = vmatprep.subr.bf16.mxu1 %v4731_v4 }
 0x5a5   : > { %v1980_v37 = vpop.f32.mrb[27].mxu0 }
 0x5a6   : > { %4150 = vmatmul.mubr.msk.f32.gmra.mrb[34].mxu1 %vm1247_vm0, %v4453_v61 }
 0x5a7   : > { %2125 = vmatprep.mubr.f32.mxu1 %v5596_v1  ;;  %4734 = vmatpush1.bf16.msra.mxu1 %v4733_v59 }
 0x5a8   : > { %v4459_v17 = vpop.f32.mrb[28].mxu0  ;;  %4736 = vmatprep.subr.bf16.mxu1 %v4735_v5 }
 0x5a9   : > { %v1990_v32 = vpop.f32.mrb[29].mxu0 }
 0x5aa   : > { %4151 = vmatmul.mubr.msk.f32.gmra.mrb[36].mxu1 %vm1247_vm0, %v1980_v37 }
 0x5ab   : > { %2131 = vmatprep.mubr.f32.mxu1 %v5596_v1  ;;  %4738 = vmatpush1.bf16.msra.mxu1 %v4737_v7 }
 0x5ac   : > { %v4462_v53 = vpop.f32.mrb[30].mxu0  ;;  %4740 = vmatprep.subr.bf16.mxu1 %v4739_v56 }
 0x5ad   : > { %v2000_v52 = vpop.f32.mrb[31].mxu0 }
 0x5ae   : > { %4152 = vmatmul.mubr.msk.f32.gmra.mrb[38].mxu1 %vm1247_vm0, %v4456_v0 }
 0x5af   : > { %2137 = vmatprep.mubr.f32.mxu1 %v5596_v1  ;;  %4742 = vmatpush1.bf16.msra.mxu1 %v4741_v48 }
 0x5b2   : > { %4153 = vmatmul.mubr.msk.f32.gmra.mrb[40].mxu1 %vm1247_vm0, %v1990_v32 }
 0x5b3   : > { %2143 = vmatprep.mubr.f32.mxu1 %v5596_v1 }
 0x5b5   : > { %v4473_v25 = vpop.f32.mrb[32].mxu0 }
 0x5b6   : > { %4154 = vmatmul.mubr.msk.f32.gmra.mrb[42].mxu1 %vm1247_vm0, %v4459_v17  ;;  %v2401_v10 = vpop.f32.mrb[33].mxu0  ;;  %v2443_v40 = vsel %vm1389_vm2, %v4473_v25, -inf }
 0x5b7   : > { %2444 = vmax.xlane.f32.xlu0 %v2443_v40  ;;  %v2440_v43 = vsel %vm1389_vm2, %v2401_v10, -inf  ;;  %2149 = vmatprep.mubr.f32.mxu1 %v5596_v1 }
 0x5b8   : > { %2441 = vmax.xlane.f32.xlu1 %v2440_v43 }
 0x5b9   : > { %v4476_v47 = vpop.f32.mrb[34].mxu0 }
 0x5ba   : > { %4155 = vmatmul.mubr.msk.f32.gmra.mrb[44].mxu1 %vm1247_vm0, %v2000_v52  ;;  %v2411_v42 = vpop.f32.mrb[35].mxu0  ;;  %v2449_v60 = vsel %vm1389_vm2, %v4476_v47, -inf }
 0x5bb   : > { %2450 = vmax.xlane.f32.xlu0 %v2449_v60  ;;  %v2446_v33 = vsel %vm1389_vm2, %v2411_v42, -inf  ;;  %2155 = vmatprep.mubr.f32.mxu1 %v5596_v1 }
 0x5bc   : > { %2447 = vmax.xlane.f32.xlu1 %v2446_v33 }
 0x5bd   : > { %v4479_v54 = vpop.f32.mrb[36].mxu0 }
 0x5be   : > { %4156 = vmatmul.mubr.msk.f32.gmra.mrb[46].mxu1 %vm1247_vm0, %v4462_v53  ;;  %v2421_v61 = vpop.f32.mrb[37].mxu0  ;;  %v2455_v4 = vsel %vm1389_vm2, %v4479_v54, -inf }
 0x5bf   : > { %2456 = vmax.xlane.f32.xlu0 %v2455_v4  ;;  %v2452_v38 = vsel %vm1389_vm2, %v2421_v61, -inf  ;;  %2250 = vmatprep.mubr.f32.mxu1 %v5596_v1 }
 0x5c0   : > { %2453 = vmax.xlane.f32.xlu1 %v2452_v38 }
 0x5c1   : > { %v4482_v44 = vpop.f32.mrb[38].mxu0 }
 0x5c2   : > { %4157 = vmatmul.mubr.msk.f32.vlgmr.msra.gmra.mrb[32].mxu1 %vm1247_vm0, %v6454_v35  ;;  %v6492_v19 = vpop.f32.mrb[39].mxu0  ;;  %v2461_v58 = vsel %vm1389_vm2, %v4482_v44, -inf }
 0x5c3   : > { %2462 = vmax.xlane.f32.xlu0 %v2461_v58  ;;  %v2458_v62 = vsel %vm1389_vm2, %v6492_v19, -inf  ;;  %2256 = vmatprep.mubr.f32.mxu1 %v5596_v1 }
 0x5c4   : > { %2459 = vmax.xlane.f32.xlu1 %v2458_v62 }
 0x5c6   : > { %4158 = vmatmul.mubr.msk.f32.gmra.mrb[34].mxu1 %vm1247_vm0, %v6452_v57 }
 0x5c7   : > { %2262 = vmatprep.mubr.f32.mxu1 %v5596_v1 }
 0x5ca   : > { %4159 = vmatmul.mubr.msk.f32.gmra.mrb[36].mxu1 %vm1247_vm0, %v6458_v6 }
 0x5cb   : > { %2268 = vmatprep.mubr.f32.mxu1 %v5596_v1 }
 0x5ce   : > { %4160 = vmatmul.mubr.msk.f32.gmra.mrb[38].mxu1 %vm1247_vm0, %v6456_v63 }
 0x5cf   : > { %2274 = vmatprep.mubr.f32.mxu1 %v5596_v1 }
 0x5d2   : > { %4161 = vmatmul.mubr.msk.f32.gmra.mrb[40].mxu1 %vm1247_vm0, %v6462_v21 }
 0x5d3   : > { %2280 = vmatprep.mubr.f32.mxu1 %v5596_v1 }
 0x5d5   : > { %5053 = vrot.lane.b32.xlu1 %v5052_v15, %s5597_s8 }
 0x5d6   : > { %4162 = vmatmul.mubr.msk.f32.gmra.mrb[42].mxu1 %vm1247_vm0, %v6460_v50 }
 0x5d7   : > { %2286 = vmatprep.mubr.f32.mxu1 %v5596_v1 }
 0x5da   : > { %4163 = vmatmul.mubr.msk.f32.gmra.mrb[44].mxu1 %vm1247_vm0, %v6466_v30 }
 0x5db   : > { %2292 = vmatprep.mubr.f32.mxu1 %v5596_v1 }
 0x5de   : > { %4164 = vmatmul.mubr.msk.f32.gmra.mrb[46].mxu1 %vm1247_vm0, %v6464_v9 }
 0x5df   : > { %2761 = vmatprep.mubr.f32.mxu1 %v5596_v1 }
 0x644   : > { %v2445_v57 = vpop.xlane.xlu0 %2444 }
 0x645   : > { %v2465_v35 = vsub.f32 %v4473_v25, %v2445_v57  ;;  %v2442_v63 = vpop.xlane.xlu1 %2441 }
 0x646   : > { %v2464_v8 = vsub.f32 %v2401_v10, %v2442_v63  ;;  %v2661_v63 = vld [vmem:[#allocation13 + $0x120] sm:$0xff] }
 0x647   : > { %v2474_v11 = vmul.f32 1.442695, %v2465_v35 }
 0x648   : > { %v2472_v15 = vmul.f32 1.442695, %v2464_v8  ;;  %v2451_v6 = vpop.xlane.xlu0 %2450  ;;  %v2666_v8 = vld [vmem:[#allocation13 + $0x148] sm:$0xff] }
 0x649   : > { %5138 = vpow2.f32 %v2474_v11  ;;  %v2467_v50 = vsub.f32 %v4476_v47, %v2451_v6  ;;  %v2448_v21 = vpop.xlane.xlu1 %2447  ;;  %v2670_v6 = vld [vmem:[#allocation13 + $0x168] sm:$0xff] }
 0x64a   : > { %5140 = vpow2.f32 %v2472_v15  ;;  %v2466_v59 = vsub.f32 %v2411_v42, %v2448_v21  ;;  %v2665_v15 = vld [vmem:[#allocation13 + $0x140] sm:$0xff] }
 0x64b   : > { %v2478_v30 = vmul.f32 1.442695, %v2467_v50  ;;  %v2672_v50 = vld [vmem:[#allocation13 + $0x178] sm:$0xff] }
 0x64c   : > { %v2476_v0 = vmul.f32 1.442695, %v2466_v59  ;;  %v2457_v5 = vpop.xlane.xlu0 %2456  ;;  %v4775_v59 = vpack.c.bf16 %v2672_v50, %v2670_v6 }
 0x64d   : > { %5142 = vpow2.f32 %v2478_v30  ;;  %v2469_v49 = vsub.f32 %v4479_v54, %v2457_v5  ;;  %v2454_v9 = vpop.xlane.xlu1 %2453  ;;  %v2669_v30 = vld [vmem:[#allocation13 + $0x160] sm:$0xff] }
 0x64e   : > { %5144 = vpow2.f32 %v2476_v0  ;;  %v2468_v14 = vsub.f32 %v2421_v61, %v2454_v9  ;;  %v2671_v0 = vld [vmem:[#allocation13 + $0x170] sm:$0xff] }
 0x64f   : > { %v2482_v37 = vmul.f32 1.442695, %v2469_v49  ;;  %v4777_v5 = vpack.c.bf16 %v2671_v0, %v2669_v30 }
 0x650   : > { %v2480_v18 = vmul.f32 1.442695, %v2468_v14  ;;  %v2463_v55 = vpop.xlane.xlu0 %2462 }
 0x651   : > { %5146 = vpow2.f32 %v2482_v37  ;;  %v2471_v7 = vsub.f32 %v4482_v44, %v2463_v55  ;;  %v2460_v17 = vpop.xlane.xlu1 %2459 }
 0x652   : > { %5148 = vpow2.f32 %v2480_v18  ;;  %v2470_v44 = vsub.f32 %v6492_v19, %v2460_v17  ;;  %v2664_v19 = vld [vmem:[#allocation13 + $0x138] sm:$0xff] }
 0x653   : > { %v6523_v56 = vpop.eup %5138  ;;  %v2486_v23 = vmul.f32 1.442695, %v2471_v7 }
 0x654   : > { %v6525_v27 = vpop.eup %5140  ;;  %v2491_v32 = vsel %vm1389_vm2, %v6523_v56, 0.0  ;;  %v2484_v58 = vmul.f32 1.442695, %v2470_v44 }
 0x655   : > { %5150 = vpow2.f32 %v2486_v23  ;;  %2492 = vadd.xlane.f32.xlu0 %v2491_v32  ;;  %v5054_v48 = vpop.permute.xlu1 %5053  ;;  %v2488_v53 = vsel %vm1389_vm2, %v6525_v27, 0.0 }
 0x656   : > { %v5056_v52 = vunpack.i.h.bf16 %v5054_v48  ;;  %v5055_v25 = vunpack.i.l.bf16 %v5054_v48  ;;  %2489 = vadd.xlane.f32.xlu1 %v2488_v53  ;;  %5152 = vpow2.f32 %v2484_v58 }
 0x657   : > { %v6531_v10 = vpop.eup %5142 }
 0x658   : > { %v6533_v40 = vpop.eup %5144  ;;  %v6535_v43 = vpack.c.bf16 %v5056_v52, %v5055_v25  ;;  %v2497_v47 = vsel %vm1389_vm2, %v6531_v10, 0.0 }
 0x659   : > { %2498 = vadd.xlane.f32.xlu0 %v2497_v47  ;;  %v2494_v42 = vsel %vm1389_vm2, %v6533_v40, 0.0 }
 0x65a   : > { %2495 = vadd.xlane.f32.xlu1 %v2494_v42  ;;  %4781 = vmatprep.subr.msk.bf16.mxu0 %vm6111_vm1, %v6535_v43 }
 0x65b   : > { %v6544_v60 = vpop.eup %5146 }
 0x65c   : > { %v6546_v33 = vpop.eup %5148  ;;  %v2503_v54 = vsel %vm1389_vm2, %v6544_v60, 0.0 }
 0x65d   : > { %2504 = vadd.xlane.f32.xlu0 %v2503_v54  ;;  %v2500_v61 = vsel %vm1389_vm2, %v6546_v33, 0.0 }
 0x65e   : > { %2501 = vadd.xlane.f32.xlu1 %v2500_v61 }
 0x65f   : > { %v6552_v4 = vpop.eup %5150 }
 0x660   : > { %v2509_v38 = vsel %vm1389_vm2, %v6552_v4, 0.0  ;;  %v6569_v62 = vpop.eup %5152 }
 0x661   : > { %2510 = vadd.xlane.f32.xlu0 %v2509_v38 }
 0x66f   : > { %2826 = vrot.lane.b32.xlu1 %v6405_v26, %s5597_s8  ;;  %v2506_v26 = vsel %vm1389_vm2, %v6569_v62, 0.0 }
 0x677   : > { %5058 = vrot.lane.b32.xlu0 %v5057_v28, %s5597_s8  ;;  %v2657_v28 = vld [vmem:[#allocation13 + $0x100] sm:$0xff] }
 0x67b   : > { %2830 = vrot.lane.b32.xlu0 %v6418_v13, %s5597_s8  ;;  %v4763_v13 = vpack.c.bf16 %v2660_v24, %v2658_v20 }
 0x67d   : > { %4764 = vmatprep.subr.bf16.mxu1 %v4763_v13 }
 0x67f   : > { %2834 = vrot.lane.b32.xlu0 %v6430_v29, %s5597_s8  ;;  %v2659_v29 = vld [vmem:[#allocation13 + $0x110] sm:$0xff] }
 0x680   : > { %v4765_v57 = vpack.c.bf16 %v2659_v29, %v2657_v28 }
 0x682   : > { %4766 = vmatpush1.bf16.msra.mxu1 %v4765_v57 }
 0x683   : > { %2838 = vrot.lane.b32.xlu0 %v6441_v46, %s5597_s8  ;;  %v2662_v46 = vld [vmem:[#allocation13 + $0x128] sm:$0xff] }
 0x684   : > { %v4767_v35 = vpack.c.bf16 %v2664_v19, %v2662_v46 }
 0x686   : > { %4768 = vmatprep.subr.bf16.mxu1 %v4767_v35 }
 0x693   : > { %2507 = vadd.xlane.f32.xlu1 %v2506_v26 }
 0x6a4   : > { %2828 = vrot.lane.b32.xlu1 %v6415_v16, %s5597_s8  ;;  %v2663_v16 = vld [vmem:[#allocation13 + $0x130] sm:$0xff] }
 0x6a5   : > { %v4769_v11 = vpack.c.bf16 %v2663_v16, %v2661_v63 }
 0x6a7   : > { %4770 = vmatpush1.bf16.msra.mxu1 %v4769_v11 }
 0x6a8   : > { %2832 = vrot.lane.b32.xlu1 %v6426_v36, %s5597_s8  ;;  %v2668_v36 = vld [vmem:[#allocation13 + $0x158] sm:$0xff] }
 0x6ac   : > { %2836 = vrot.lane.b32.xlu1 %v6438_v41, %s5597_s8  ;;  %v4771_v41 = vpack.c.bf16 %v2668_v36, %v2666_v8 }
 0x6ae   : > { %4772 = vmatprep.subr.bf16.mxu1 %v4771_v41 }
 0x6b0   : > { %2840 = vrot.lane.b32.xlu1 %v6448_v51, %s5597_s8  ;;  %v2667_v51 = vld [vmem:[#allocation13 + $0x150] sm:$0xff] }
 0x6b1   : > { %v4773_v21 = vpack.c.bf16 %v2667_v51, %v2665_v15 }
 0x6b3   : > { %4774 = vmatpush1.bf16.msra.mxu1 %v4773_v21 }
 0x6b4   : > { %4776 = vmatprep.subr.bf16.mxu1 %v4775_v59 }
 0x6b7   : > { %4778 = vmatpush1.bf16.msra.mxu1 %v4777_v5 }
 0x6e2   : > { %v2493_v49 = vpop.xlane.xlu0 %2492 }
 0x6e3   : > { %5154 = vrcp.f32 %v2493_v49  ;;  %v2490_v9 = vpop.xlane.xlu1 %2489 }
 0x6e4   : > { %5156 = vrcp.f32 %v2490_v9 }
 0x6e6   : > { %v2499_v14 = vpop.xlane.xlu0 %2498 }
 0x6e7   : > { %5158 = vrcp.f32 %v2499_v14  ;;  %v2496_v37 = vpop.xlane.xlu1 %2495 }
 0x6e8   : > { %5160 = vrcp.f32 %v2496_v37 }
 0x6ea   : > { %v2505_v18 = vpop.xlane.xlu0 %2504 }
 0x6eb   : > { %5162 = vrcp.f32 %v2505_v18  ;;  %v2502_v55 = vpop.xlane.xlu1 %2501 }
 0x6ec   : > { %5164 = vrcp.f32 %v2502_v55 }
 0x6ed   : > { %v5155_v7 = vpop.eup %5154 }
 0x6ee   : > { %v5157_v17 = vpop.eup %5156  ;;  %v2511_v23 = vpop.xlane.xlu0 %2510  ;;  %v2521_v48 = vmul.f32 %v5155_v7, %v6523_v56 }
 0x6ef   : > { %v2520_v32 = vmul.f32 %v5157_v17, %v6525_v27  ;;  %5166 = vrcp.f32 %v2511_v23 }
 0x6f1   : > { %v5159_v53 = vpop.eup %5158  ;;  %4491 = vmatprep.mubr.msk.f32.mxu0 %vm1389_vm2, %v2520_v32 }
 0x6f2   : > { %v5161_v52 = vpop.eup %5160  ;;  %v5059_v25 = vpop.permute.xlu0 %5058  ;;  %4492 = vmatmul.mubr.msk.f32.vlgmr.msra.gmra.mrb[40].mxu0 %vm1389_vm2, %v2521_v48  ;;  %v2523_v61 = vmul.f32 %v5159_v53, %v6531_v10 }
 0x6f3   : > { %v5061_v47 = vunpack.i.h.bf16 %v5059_v25  ;;  %v5060_v42 = vunpack.i.l.bf16 %v5059_v25  ;;  %4784 = vmatpush3.bf16.xpose.msk.msra.mxu0 %vm6111_vm1, %v6535_v43  ;;  %v2522_v54 = vmul.f32 %v5161_v52, %v6533_v40  ;;  %v2827_v10 = vpop.permute.xlu1 %2826 }
 0x6f5   : > { %v5163_v27 = vpop.eup %5162  ;;  %v4785_v38 = vpack.c.bf16 %v5061_v47, %v5060_v42  ;;  %4494 = vmatprep.mubr.msk.f32.mxu0 %vm1389_vm2, %v2522_v54 }
 0x6f6   : > { %v5165_v56 = vpop.eup %5164  ;;  %4495 = vmatmul.mubr.msk.f32.gmra.mrb[42].mxu0 %vm1389_vm2, %v2523_v61  ;;  %v2525_v58 = vmul.f32 %v5163_v27, %v6544_v60  ;;  %v2831_v60 = vpop.permute.xlu0 %2830 }
 0x6f7   : > { %4787 = vmatprep.subr.msk.bf16.mxu0 %vm6111_vm1, %v4785_v38  ;;  %v2524_v44 = vmul.f32 %v5165_v56, %v6546_v33 }
 0x6f9   : > { %4497 = vmatprep.mubr.msk.f32.mxu0 %vm1389_vm2, %v2524_v44  ;;  %v5167_v43 = vpop.eup %5166 }
 0x6fa   : > { %4498 = vmatmul.mubr.msk.f32.gmra.mrb[44].mxu0 %vm1389_vm2, %v2525_v58  ;;  %v2527_v33 = vmul.f32 %v5167_v43, %v6552_v4  ;;  %v2835_v28 = vpop.permute.xlu0 %2834 }
 0x6fb   : > { %4790 = vmatpush3.bf16.xpose.msk.msra.mxu0 %vm6111_vm1, %v4785_v38 }
 0x720   : > { %v2508_v40 = vpop.xlane.xlu1 %2507 }
 0x721   : > { %5168 = vrcp.f32 %v2508_v40 }
 0x724   : > { %v2829_v20 = vpop.permute.xlu1 %2828 }
 0x728   : > { %v2833_v12 = vpop.permute.xlu1 %2832 }
 0x72b   : > { %v5169_v26 = vpop.eup %5168 }
 0x72c   : > { %v2526_v24 = vmul.f32 %v5169_v26, %v6569_v62  ;;  %v2837_v13 = vpop.permute.xlu1 %2836  ;;  %v2839_v62 = vpop.permute.xlu0 %2838 }
 0x72e   : > { %4500 = vmatprep.mubr.msk.f32.mxu0 %vm1389_vm2, %v2526_v24 }
 0x72f   : > { %4501 = vmatmul.mubr.msk.f32.gmra.mrb[46].mxu0 %vm1389_vm2, %v2527_v33 }
 0x730   : > { %4511 = vmatprep.mubr.msk.f32.mxu0 %vm1247_vm0, %v2827_v10  ;;  %v2841_v4 = vpop.permute.xlu1 %2840 }
 0x733   : > { %4512 = vmatmul.mubr.msk.f32.vlgmr.msra.gmra.mrb[48].mxu0 %vm1247_vm0, %v2829_v20 }
 0x734   : > { %4514 = vmatprep.mubr.msk.f32.mxu0 %vm1247_vm0, %v2831_v60 }
 0x737   : > { %4515 = vmatmul.mubr.msk.f32.gmra.mrb[50].mxu0 %vm1247_vm0, %v2833_v12 }
 0x738   : > { %4517 = vmatprep.mubr.msk.f32.mxu0 %vm1247_vm0, %v2835_v28 }
 0x73b   : > { %4518 = vmatmul.mubr.msk.f32.gmra.mrb[52].mxu0 %vm1247_vm0, %v2837_v13 }
 0x73c   : > { %4520 = vmatprep.mubr.msk.f32.mxu0 %vm1247_vm0, %v2839_v62  ;;  %v7090_v62 = vpack.i.bf16 %v6207_v45, %v6201_v39  ;;  %v3215_v39 = vld [vmem:[#allocation13 + $0x198] sm:$0xff]  ;;  %v3212_v45 = vld [vmem:[#allocation13 + $0x180] sm:$0xff] }
 0x73f   : > { %4521 = vmatmul.mubr.msk.f32.gmra.mrb[54].mxu0 %vm1247_vm0, %v2841_v4 }
 0x7c5   : > { %v4493_v29 = vpop.f32.mrb[40].mxu0 }
 0x7c6   : > { %v2618_v46 = vpop.f32.mrb[41].mxu0 }
 0x7c7   : > { %4185 = vmatmul.mubr.msk.f32.vlgmr.msra.gmra.mrb[32].mxu1 %vm1247_vm0, %v2618_v46 }
 0x7c8   : > { %2767 = vmatprep.mubr.f32.mxu1 %v5596_v1 }
 0x7c9   : > { %v4496_v19 = vpop.f32.mrb[42].mxu0 }
 0x7ca   : > { %v2628_v57 = vpop.f32.mrb[43].mxu0 }
 0x7cb   : > { %4186 = vmatmul.mubr.msk.f32.gmra.mrb[34].mxu1 %vm1247_vm0, %v4493_v29 }
 0x7cc   : > { %2773 = vmatprep.mubr.f32.mxu1 %v5596_v1 }
 0x7cd   : > { %v4499_v35 = vpop.f32.mrb[44].mxu0 }
 0x7ce   : > { %v2638_v63 = vpop.f32.mrb[45].mxu0 }
 0x7cf   : > { %4187 = vmatmul.mubr.msk.f32.gmra.mrb[36].mxu1 %vm1247_vm0, %v2628_v57 }
 0x7d0   : > { %2779 = vmatprep.mubr.f32.mxu1 %v5596_v1 }
 0x7d3   : > { %4188 = vmatmul.mubr.msk.f32.gmra.mrb[38].mxu1 %vm1247_vm0, %v4496_v19 }
 0x7d4   : > { %2785 = vmatprep.mubr.f32.mxu1 %v5596_v1 }
 0x7d7   : > { %4189 = vmatmul.mubr.msk.f32.gmra.mrb[40].mxu1 %vm1247_vm0, %v2638_v63 }
 0x7d8   : > { %2791 = vmatprep.mubr.f32.mxu1 %v5596_v1 }
 0x7db   : > { %4190 = vmatmul.mubr.msk.f32.gmra.mrb[42].mxu1 %vm1247_vm0, %v4499_v35 }
 0x7dc   : > { %2797 = vmatprep.mubr.f32.mxu1 %v5596_v1 }
 0x802   : > { %v4502_v16 = vpop.f32.mrb[46].mxu0 }
 0x803   : > { %v2648_v8 = vpop.f32.mrb[47].mxu0 }
 0x804   : > { %4191 = vmatmul.mubr.msk.f32.gmra.mrb[44].mxu1 %vm1247_vm0, %v2648_v8 }
 0x805   : > { %2803 = vmatprep.mubr.f32.mxu1 %v5596_v1 }
 0x806   : > { %v4513_v36 = vpop.f32.mrb[48].mxu0 }
 0x807   : > { %v2940_v11 = vpop.f32.mrb[49].mxu0  ;;  %v2982_v41 = vsel %vm1389_vm2, %v4513_v36, -inf }
 0x808   : > { %2983 = vmax.xlane.f32.xlu1 %v2982_v41  ;;  %4192 = vmatmul.mubr.msk.f32.gmra.mrb[46].mxu1 %vm1247_vm0, %v4502_v16  ;;  %v2979_v15 = vsel %vm1389_vm2, %v2940_v11, -inf  ;;  %v3219_v41 = vld [vmem:[#allocation13 + $0x1b8] sm:$0xff] }
 0x809   : > { %2980 = vmax.xlane.f32.xlu0 %v2979_v15  ;;  %3316 = vmatprep.mubr.f32.mxu1 %v5596_v1 }
 0x80a   : > { %v4516_v51 = vpop.f32.mrb[50].mxu0 }
 0x80b   : > { %v2950_v6 = vpop.f32.mrb[51].mxu0  ;;  %v2988_v30 = vsel %vm1389_vm2, %v4516_v51, -inf }
 0x80c   : > { %v2985_v50 = vsel %vm1389_vm2, %v2950_v6, -inf }
 0x80d   : > { %2986 = vmax.xlane.f32.xlu0 %v2985_v50  ;;  %v3218_v50 = vld [vmem:[#allocation13 + $0x1b0] sm:$0xff] }
 0x80e   : > { %v4519_v21 = vpop.f32.mrb[52].mxu0 }
 0x80f   : > { %v2960_v59 = vpop.f32.mrb[53].mxu0  ;;  %v2994_v9 = vsel %vm1389_vm2, %v4519_v21, -inf }
 0x810   : > { %v2991_v0 = vsel %vm1389_vm2, %v2960_v59, -inf }
 0x811   : > { %2989 = vmax.xlane.f32.xlu0 %v2988_v30  ;;  %2992 = vmax.xlane.f32.xlu1 %v2991_v0 }
 0x812   : > { %v4522_v5 = vpop.f32.mrb[54].mxu0 }
 0x813   : > { %v2970_v49 = vpop.f32.mrb[55].mxu0  ;;  %v3000_v37 = vsel %vm1389_vm2, %v4522_v5, -inf }
 0x814   : > { %v2997_v14 = vsel %vm1389_vm2, %v2970_v49, -inf }
 0x815   : > { %2995 = vmax.xlane.f32.xlu0 %v2994_v9  ;;  %2998 = vmax.xlane.f32.xlu1 %v2997_v14  ;;  %v3225_v9 = vld [vmem:[#allocation13 + $0x1e8] sm:$0xff]  ;;  %v3227_v14 = vld [vmem:[#allocation13 + $0x1f8] sm:$0xff] }
 0x819   : > { %3001 = vmax.xlane.f32.xlu0 %v3000_v37 }
 0x895   : > { %v2984_v18 = vpop.xlane.xlu1 %2983 }
 0x896   : > { %v3004_v55 = vsub.f32 %v4513_v36, %v2984_v18  ;;  %v2981_v7 = vpop.xlane.xlu0 %2980  ;;  %v3214_v36 = vld [vmem:[#allocation13 + $0x190] sm:$0xff]  ;;  %v4811_v18 = vpack.c.bf16 %v3227_v14, %v3225_v9 }
 0x897   : > { %v3003_v17 = vsub.f32 %v2940_v11, %v2981_v7  ;;  %v3217_v11 = vld [vmem:[#allocation13 + $0x1a8] sm:$0xff]  ;;  %v4801_v15 = vpack.c.bf16 %v3214_v36, %v3212_v45  ;;  %v3226_v7 = vld [vmem:[#allocation13 + $0x1f0] sm:$0xff] }
 0x898   : > { %v3013_v23 = vmul.f32 1.442695, %v3004_v55  ;;  %v3224_v55 = vld [vmem:[#allocation13 + $0x1e0] sm:$0xff] }
 0x899   : > { %v3011_v32 = vmul.f32 1.442695, %v3003_v17  ;;  %v4813_v17 = vpack.c.bf16 %v3226_v7, %v3224_v55 }
 0x89a   : > { %5170 = vpow2.f32 %v3013_v23  ;;  %v2987_v48 = vpop.xlane.xlu0 %2986 }
 0x89b   : > { %5172 = vpow2.f32 %v3011_v32  ;;  %v3005_v53 = vsub.f32 %v2950_v6, %v2987_v48  ;;  %v3216_v6 = vld [vmem:[#allocation13 + $0x1a0] sm:$0xff] }
 0x89c   : > { %v4805_v30 = vpack.c.bf16 %v3218_v50, %v3216_v6 }
 0x89d   : > { %v3015_v52 = vmul.f32 1.442695, %v3005_v53 }
 0x89e   : > { %v2990_v25 = vpop.xlane.xlu0 %2989  ;;  %v2993_v47 = vpop.xlane.xlu1 %2992 }
 0x89f   : > { %5174 = vpow2.f32 %v3015_v52  ;;  %v3006_v42 = vsub.f32 %v4516_v51, %v2990_v25  ;;  %v3007_v54 = vsub.f32 %v2960_v59, %v2993_v47  ;;  %v4803_v51 = vpack.c.bf16 %v3219_v41, %v3217_v11  ;;  %v3223_v59 = vld [vmem:[#allocation13 + $0x1d8] sm:$0xff] }
 0x8a1   : > { %v3017_v61 = vmul.f32 1.442695, %v3006_v42  ;;  %v3019_v27 = vmul.f32 1.442695, %v3007_v54 }
 0x8a2   : > { %v2996_v38 = vpop.xlane.xlu0 %2995  ;;  %v2999_v4 = vpop.xlane.xlu1 %2998 }
 0x8a3   : > { %5176 = vpow2.f32 %v3017_v61  ;;  %v3008_v56 = vsub.f32 %v4519_v21, %v2996_v38  ;;  %v3009_v29 = vsub.f32 %v2970_v49, %v2999_v4  ;;  %v3221_v21 = vld [vmem:[#allocation13 + $0x1c8] sm:$0xff]  ;;  %v3222_v49 = vld [vmem:[#allocation13 + $0x1d0] sm:$0xff] }
 0x8a4   : > { %v6636_v44 = vpop.eup %5170  ;;  %5178 = vpow2.f32 %v3019_v27  ;;  %v4807_v0 = vpack.c.bf16 %v3223_v59, %v3221_v21 }
 0x8a5   : > { %v6638_v58 = vpop.eup %5172  ;;  %v3021_v10 = vmul.f32 1.442695, %v3008_v56  ;;  %v3030_v40 = vsel %vm1389_vm2, %v6636_v44, 0.0  ;;  %v3023_v57 = vmul.f32 1.442695, %v3009_v29 }
 0x8a6   : > { %3031 = vadd.xlane.f32.xlu0 %v3030_v40  ;;  %v3027_v43 = vsel %vm1389_vm2, %v6638_v58, 0.0  ;;  %v3002_v46 = vpop.xlane.xlu0 %3001 }
 0x8a7   : > { %5180 = vpow2.f32 %v3021_v10  ;;  %3028 = vadd.xlane.f32.xlu1 %v3027_v43  ;;  %v3010_v19 = vsub.f32 %v4522_v5, %v3002_v46  ;;  %v3220_v5 = vld [vmem:[#allocation13 + $0x1c0] sm:$0xff] }
 0x8a8   : > { %5182 = vpow2.f32 %v3023_v57  ;;  %v4809_v37 = vpack.c.bf16 %v3222_v49, %v3220_v5 }
 0x8a9   : > { %v6644_v26 = vpop.eup %5174  ;;  %v3025_v35 = vmul.f32 1.442695, %v3010_v19 }
 0x8aa   : > { %v3033_v20 = vsel %vm1389_vm2, %v6644_v26, 0.0 }
 0x8ab   : > { %3034 = vadd.xlane.f32.xlu1 %v3033_v20  ;;  %5184 = vpow2.f32 %v3025_v35 }
 0x8ad   : > { %v6648_v24 = vpop.eup %5176 }
 0x8ae   : > { %v6650_v33 = vpop.eup %5178  ;;  %v3036_v60 = vsel %vm1389_vm2, %v6648_v24, 0.0 }
 0x8af   : > { %3037 = vadd.xlane.f32.xlu0 %v3036_v60  ;;  %v3039_v12 = vsel %vm1389_vm2, %v6650_v33, 0.0 }
 0x8b0   : > { %3040 = vadd.xlane.f32.xlu1 %v3039_v12 }
 0x8b1   : > { %v6656_v28 = vpop.eup %5180 }
 0x8b2   : > { %v3042_v13 = vsel %vm1389_vm2, %v6656_v28, 0.0  ;;  %v6668_v63 = vpop.eup %5182 }
 0x8b3   : > { %3043 = vadd.xlane.f32.xlu0 %v3042_v13  ;;  %v3045_v22 = vsel %vm1389_vm2, %v6668_v63, 0.0 }
 0x8b5   : > { %v6670_v16 = vpop.eup %5184 }
 0x8b6   : > { %v3048_v31 = vsel %vm1389_vm2, %v6670_v16, 0.0 }
 0x8c1   : > { %5063 = vrot.lane.b32.xlu1 %v5062_v34, %s5597_s8  ;;  %v3213_v34 = vld [vmem:[#allocation13 + $0x188] sm:$0xff] }
 0x8c2   : > { %v4799_v8 = vpack.c.bf16 %v3215_v39, %v3213_v34 }
 0x8c4   : > { %4800 = vmatprep.subr.bf16.mxu1 %v4799_v8  ;;  %v3381_v8 = vld [vmem:[%s7091_s22] sm:$0x3]  ;;  %s3902_s22 = scalar_lea.sflag [#allocation5], %s6020_s12 }
 0x8c5   : > { %4802 = vmatpush1.bf16.msra.mxu1 %v4801_v15  ;;  %v3386_v36 = vrot.slane %v3381_v8, %v6096_v2  ;;  %v3390_v11 = vrot.slane %v3381_v8, %v6101_v3 }
 0x8c6   : > { %4804 = vmatprep.subr.bf16.mxu1 %v4803_v51 }
 0x8c9   : > { %5068 = vrot.lane.b32.xlu0 %v7090_v62, %s5597_s8  ;;  %4806 = vmatpush1.bf16.msra.mxu1 %v4805_v30  ;;  %s7095_s8 = sld [smem:[#allocation41_spill]] }
 0x8ca   : > { %4808 = vmatprep.subr.bf16.mxu1 %v4807_v0 }
 0x8cd   : > { %4810 = vmatpush1.bf16.msra.mxu1 %v4809_v37 }
 0x8ce   : > { %4812 = vmatprep.subr.bf16.mxu1 %v4811_v18 }
 0x8d1   : > { %4814 = vmatpush1.bf16.msra.mxu1 %v4813_v17 }
 0x8e5   : > { %3046 = vadd.xlane.f32.xlu1 %v3045_v22 }
 0x8e8   : > { %3049 = vadd.xlane.f32.xlu0 %v3048_v31 }
 0x933   : > { %v3032_v32 = vpop.xlane.xlu0 %3031 }
 0x934   : > { %v3029_v23 = vpop.xlane.xlu1 %3028 }
 0x935   : > { %5186 = vrcp.f32 %v3029_v23 }
 0x936   : > { %5188 = vrcp.f32 %v3032_v32 }
 0x938   : > { %v3035_v48 = vpop.xlane.xlu1 %3034 }
 0x939   : > { %5190 = vrcp.f32 %v3035_v48 }
 0x93c   : > { %v3038_v53 = vpop.xlane.xlu0 %3037 }
 0x93d   : > { %v3041_v52 = vpop.xlane.xlu1 %3040  ;;  %5192 = vrcp.f32 %v3038_v53 }
 0x93e   : > { %5194 = vrcp.f32 %v3041_v52 }
 0x93f   : > { %v5187_v25 = vpop.eup %5186 }
 0x940   : > { %v3044_v47 = vpop.xlane.xlu0 %3043  ;;  %v3059_v42 = vmul.f32 %v5187_v25, %v6638_v58  ;;  %v5189_v20 = vpop.eup %5188 }
 0x941   : > { %v5064_v54 = vpop.permute.xlu1 %5063  ;;  %5196 = vrcp.f32 %v3044_v47  ;;  %v3060_v58 = vmul.f32 %v5189_v20, %v6636_v44 }
 0x942   : > { %v5066_v61 = vunpack.i.h.bf16 %v5064_v54  ;;  %v5065_v27 = vunpack.i.l.bf16 %v5064_v54  ;;  %4531 = vmatprep.mubr.msk.f32.mxu0 %vm1389_vm2, %v3059_v42 }
 0x943   : > { %v5191_v60 = vpop.eup %5190 }
 0x944   : > { %v4791_v38 = vpack.c.bf16 %v5066_v61, %v5065_v27  ;;  %v5069_v56 = vpop.permute.xlu0 %5068  ;;  %v3061_v13 = vmul.f32 %v5191_v60, %v6644_v26 }
 0x945   : > { %v5071_v10 = vunpack.i.h.bf16 %v5069_v56  ;;  %v5070_v40 = vunpack.i.l.bf16 %v5069_v56 }
 0x946   : > { %4792 = vmatprep.subr.bf16.mxu0 %v4791_v38 }
 0x947   : > { %v4795_v43 = vpack.c.bf16 %v5071_v10, %v5070_v40  ;;  %4794 = vmatpush3.bf16.msra.mxu0 %v4791_v38  ;;  %v5193_v12 = vpop.eup %5192 }
 0x948   : > { %v5195_v62 = vpop.eup %5194  ;;  %v3062_v4 = vmul.f32 %v5193_v12, %v6648_v24 }
 0x949   : > { %4796 = vmatprep.subr.bf16.mxu0 %v4795_v43  ;;  %v3063_v46 = vmul.f32 %v5195_v62, %v6650_v33  ;;  %v5598_v62 = vmov 0  }
 0x94a   : > { %5072 = vset.pattern.permute.xlu1 %v5598_v62  ;;  %5073 = vset.pattern.permute.xlu0 %v5598_v62  ;;  %v3641_v62 = vld [vmem:[#allocation15 + $0x20] sm:$0xff] }
 0x94b   : > { %4798 = vmatpush3.bf16.msra.mxu0 %v4795_v43  ;;  %v5197_v29 = vpop.eup %5196 }
 0x94c   : > { %v3064_v19 = vmul.f32 %v5197_v29, %v6656_v28 }
 0x94e   : > { %4532 = vmatmul.mubr.msk.f32.vlgmr.msra.gmra.mrb[56].mxu0 %vm1389_vm2, %v3060_v58 }
 0x94f   : > { %4534 = vmatprep.mubr.msk.f32.mxu0 %vm1389_vm2, %v3061_v13 }
 0x952   : > { %4535 = vmatmul.mubr.msk.f32.gmra.mrb[58].mxu0 %vm1389_vm2, %v3062_v4 }
 0x953   : > { %4537 = vmatprep.mubr.msk.f32.mxu0 %vm1389_vm2, %v3063_v46 }
 0x956   : > { %4538 = vmatmul.mubr.msk.f32.gmra.mrb[60].mxu0 %vm1389_vm2, %v3064_v19 }
 0x972   : > { %v3047_v44 = vpop.xlane.xlu1 %3046 }
 0x973   : > { %5198 = vrcp.f32 %v3047_v44 }
 0x975   : > { %v3050_v26 = vpop.xlane.xlu0 %3049 }
 0x976   : > { %5200 = vrcp.f32 %v3050_v26 }
 0x97d   : > { %v5199_v57 = vpop.eup %5198 }
 0x97e   : > { %v3065_v35 = vmul.f32 %v5199_v57, %v6668_v63 }
 0x980   : > { %v5201_v22 = vpop.eup %5200  ;;  %4540 = vmatprep.mubr.msk.f32.mxu0 %vm1389_vm2, %v3065_v35 }
 0x981   : > { %v3066_v24 = vmul.f32 %v5201_v22, %v6670_v16 }
 0x983   : > { %4541 = vmatmul.mubr.msk.f32.gmra.mrb[62].mxu0 %vm1389_vm2, %v3066_v24 }
 0xa21   : > { %v4533_v33 = vpop.f32.mrb[56].mxu0 }
 0xa22   : > { %v3173_v31 = vpop.f32.mrb[57].mxu0 }
 0xa23   : > { %4213 = vmatmul.mubr.msk.f32.vlgmr.msra.gmra.mrb[32].mxu1 %vm1247_vm0, %v3173_v31 }
 0xa24   : > { %3322 = vmatprep.mubr.f32.mxu1 %v5596_v1 }
 0xa25   : > { %v4536_v28 = vpop.f32.mrb[58].mxu0 }
 0xa26   : > { %v3183_v34 = vpop.f32.mrb[59].mxu0 }
 0xa27   : > { %4214 = vmatmul.mubr.msk.f32.gmra.mrb[34].mxu1 %vm1247_vm0, %v4533_v33 }
 0xa28   : > { %3328 = vmatprep.mubr.f32.mxu1 %v5596_v1 }
 0xa29   : > { %v4539_v63 = vpop.f32.mrb[60].mxu0 }
 0xa2a   : > { %v3193_v39 = vpop.f32.mrb[61].mxu0 }
 0xa2b   : > { %4215 = vmatmul.mubr.msk.f32.gmra.mrb[36].mxu1 %vm1247_vm0, %v3183_v34 }
 0xa2c   : > { %3334 = vmatprep.mubr.f32.mxu1 %v5596_v1 }
 0xa2f   : > { %4216 = vmatmul.mubr.msk.f32.gmra.mrb[38].mxu1 %vm1247_vm0, %v4536_v28 }
 0xa30   : > { %3340 = vmatprep.mubr.f32.mxu1 %v5596_v1 }
 0xa33   : > { %4217 = vmatmul.mubr.msk.f32.gmra.mrb[40].mxu1 %vm1247_vm0, %v3193_v39 }
 0xa34   : > { %3346 = vmatprep.mubr.f32.mxu1 %v5596_v1 }
 0xa37   : > { %4218 = vmatmul.mubr.msk.f32.gmra.mrb[42].mxu1 %vm1247_vm0, %v4539_v63 }
 0xa38   : > { %3352 = vmatprep.mubr.f32.mxu1 %v5596_v1 }
 0xa56   : > { %v4542_v16 = vpop.f32.mrb[62].mxu0 }
 0xa57   : > { %v3203_v45 = vpop.f32.mrb[63].mxu0 }
 0xa58   : > { %4219 = vmatmul.mubr.msk.f32.gmra.mrb[44].mxu1 %vm1247_vm0, %v3203_v45 }
 0xa59   : > { %3358 = vmatprep.mubr.f32.mxu1 %v5596_v1 }
 0xa5c   : > { %4220 = vmatmul.mubr.msk.f32.gmra.mrb[46].mxu1 %vm1247_vm0, %v4542_v16 }
 0xaf6   : > { %v3318_v41 = vpop.f32.mrb[32].mxu1 }
 0xaf7   : > { %v3393_v15 = vadd.f32 %v3386_v36, %v3318_v41  ;;  %v3320_v51 = vpop.f32.mrb[33].mxu1 }
 0xaf8   : > { %v3394_v6 = vadd.f32 %v3390_v11, %v3320_v51 }
 0xafa   : > { %v3324_v50 = vpop.f32.mrb[34].mxu1  ;;  %v3411_v21 = vadd.f32 %v3394_v6, %v3393_v15 }
 0xafb   : > { %v3395_v59 = vadd.f32 %v3386_v36, %v3324_v50  ;;  %v3326_v30 = vpop.f32.mrb[35].mxu1 }
 0xafc   : > { %v3396_v0 = vadd.f32 %v3390_v11, %v3326_v30  ;;  %3412 = vadd.xlane.f32.xlu1 %v3411_v21 }
 0xafe   : > { %v3330_v1 = vpop.f32.mrb[36].mxu1  ;;  %v3414_v5 = vadd.f32 %v3396_v0, %v3395_v59 }
 0xaff   : > { %v3397_v49 = vadd.f32 %v3386_v36, %v3330_v1  ;;  %v3332_v9 = vpop.f32.mrb[37].mxu1 }
 0xb00   : > { %v3398_v14 = vadd.f32 %v3390_v11, %v3332_v9  ;;  %3415 = vadd.xlane.f32.xlu0 %v3414_v5 }
 0xb02   : > { %v3336_v37 = vpop.f32.mrb[38].mxu1  ;;  %v3417_v18 = vadd.f32 %v3398_v14, %v3397_v49 }
 0xb03   : > { %v3399_v55 = vadd.f32 %v3386_v36, %v3336_v37  ;;  %v3338_v7 = vpop.f32.mrb[39].mxu1 }
 0xb04   : > { %v3400_v17 = vadd.f32 %v3390_v11, %v3338_v7  ;;  %3418 = vadd.xlane.f32.xlu1 %v3417_v18 }
 0xb06   : > { %v3342_v23 = vpop.f32.mrb[40].mxu1  ;;  %v3420_v32 = vadd.f32 %v3400_v17, %v3399_v55 }
 0xb07   : > { %v3401_v48 = vadd.f32 %v3386_v36, %v3342_v23  ;;  %v3344_v53 = vpop.f32.mrb[41].mxu1 }
 0xb08   : > { %v3402_v52 = vadd.f32 %v3390_v11, %v3344_v53  ;;  %3421 = vadd.xlane.f32.xlu0 %v3420_v32  ;;  %v3654_v53 = vld [vmem:[#allocation15 + $0x88] sm:$0xff] }
 0xb0a   : > { %v3348_v25 = vpop.f32.mrb[42].mxu1  ;;  %v3423_v47 = vadd.f32 %v3402_v52, %v3401_v48 }
 0xb0b   : > { %v3403_v42 = vadd.f32 %v3386_v36, %v3348_v25  ;;  %v3350_v54 = vpop.f32.mrb[43].mxu1 }
 0xb0c   : > { %v3404_v61 = vadd.f32 %v3390_v11, %v3350_v54  ;;  %3424 = vadd.xlane.f32.xlu1 %v3423_v47  ;;  %v3638_v47 = vld [vmem:[#allocation15 + $0x8] sm:$0xff]  ;;  %v3655_v54 = vld [vmem:[#allocation15 + $0x90] sm:$0xff] }
 0xb0e   : > { %v3426_v27 = vadd.f32 %v3404_v61, %v3403_v42 }
 0xb10   : > { %3427 = vadd.xlane.f32.xlu0 %v3426_v27 }
 0xb2b   : > { %v3354_v38 = vpop.f32.mrb[44].mxu1 }
 0xb2c   : > { %v6712_v56 = vadd.f32 %v3386_v36, %v3354_v38  ;;  %v3356_v10 = vpop.f32.mrb[45].mxu1  ;;  %v3639_v38 = vld [vmem:[#allocation15 + $0x10] sm:$0xff] }
 0xb2d   : > { %v6714_v40 = vadd.f32 %v3390_v11, %v3356_v10  ;;  %v3640_v10 = vld [vmem:[#allocation15 + $0x18] sm:$0xff] }
 0xb2f   : > { %v3360_v43 = vpop.f32.mrb[46].mxu1  ;;  %v3429_v20 = vadd.f32 %v6714_v40, %v6712_v56 }
 0xb30   : > { %v6718_v60 = vadd.f32 %v3386_v36, %v3360_v43  ;;  %v3362_v58 = vpop.f32.mrb[47].mxu1  ;;  %v3657_v43 = vld [vmem:[#allocation15 + $0xa0] sm:$0xff] }
 0xb31   : > { %v6720_v12 = vadd.f32 %v3390_v11, %v3362_v58  ;;  %3430 = vadd.xlane.f32.xlu1 %v3429_v20  ;;  %v3658_v20 = vld [vmem:[#allocation15 + $0xa8] sm:$0xff]  ;;  %v4821_v58 = vpack.c.bf16 %v3640_v10, %v3639_v38  ;;  %v3667_v38 = vld [vmem:[#allocation15 + $0xf0] sm:$0xff]  ;;  %v3668_v10 = vld [vmem:[#allocation15 + $0xf8] sm:$0xff] }
 0xb33   : > { %v3432_v13 = vadd.f32 %v6720_v12, %v6718_v60 }
 0xb35   : > { %3433 = vadd.xlane.f32.xlu0 %v3432_v13  ;;  %v4823_v13 = vpack.c.bf16 %v3658_v20, %v3657_v43  ;;  %v4843_v43 = vpack.c.bf16 %v3668_v10, %v3667_v38  ;;  %v3651_v20 = vld [vmem:[#allocation15 + $0x70] sm:$0xff] }
 0xb89   : > { %v3413_v4 = vpop.xlane.xlu1 %3412 }
 0xb8a   : > { %v3436_v29 = vmul.f32 0.00390625, %v3413_v4  ;;  %v3642_v4 = vld [vmem:[#allocation15 + $0x28] sm:$0xff] }
 0xb8c   : > { %v6724_v46 = vsub.f32 %v3393_v15, %v3436_v29  ;;  %v6726_v19 = vsub.f32 %v3394_v6, %v3436_v29 }
 0xb8d   : > { %v3416_v44 = vpop.xlane.xlu0 %3415 }
 0xb8e   : > { %v3437_v26 = vmul.f32 0.00390625, %v3416_v44  ;;  %v3460_v57 = vmul.f32 %v6724_v46, %v6724_v46  ;;  %v3461_v35 = vmul.f32 %v6726_v19, %v6726_v19  ;;  %v3659_v44 = vld [vmem:[#allocation15 + $0xb0] sm:$0xff] }
 0xb90   : > { %v6732_v22 = vsub.f32 %v3395_v59, %v3437_v26  ;;  %v6734_v24 = vsub.f32 %v3396_v0, %v3437_v26  ;;  %v3476_v33 = vadd.f32 %v3461_v35, %v3460_v57  ;;  %v3660_v26 = vld [vmem:[#allocation15 + $0xb8] sm:$0xff]  ;;  %v4825_v35 = vpack.c.bf16 %v3642_v4, %v3641_v62 }
 0xb91   : > { %v3419_v31 = vpop.xlane.xlu1 %3418 }
 0xb92   : > { %v3462_v28 = vmul.f32 %v6732_v22, %v6732_v22  ;;  %v3463_v34 = vmul.f32 %v6734_v24, %v6734_v24  ;;  %v3438_v63 = vmul.f32 0.00390625, %v3419_v31  ;;  %3477 = vadd.xlane.f32.xlu1 %v3476_v33 }
 0xb94   : > { %v6740_v39 = vsub.f32 %v3397_v49, %v3438_v63  ;;  %v6742_v16 = vsub.f32 %v3398_v14, %v3438_v63  ;;  %v3479_v45 = vadd.f32 %v3463_v34, %v3462_v28  ;;  %v4827_v28 = vpack.c.bf16 %v3660_v26, %v3659_v44  ;;  %v3643_v34 = vld [vmem:[#allocation15 + $0x30] sm:$0xff]  ;;  %v3644_v63 = vld [vmem:[#allocation15 + $0x38] sm:$0xff] }
 0xb95   : > { %v3422_v8 = vpop.xlane.xlu0 %3421 }
 0xb96   : > { %v3439_v36 = vmul.f32 0.00390625, %v3422_v8  ;;  %3480 = vadd.xlane.f32.xlu0 %v3479_v45  ;;  %v3464_v11 = vmul.f32 %v6740_v39, %v6740_v39  ;;  %v3465_v41 = vmul.f32 %v6742_v16, %v6742_v16  ;;  %v3661_v8 = vld [vmem:[#allocation15 + $0xc0] sm:$0xff] }
 0xb98   : > { %v6748_v15 = vsub.f32 %v3399_v55, %v3439_v36  ;;  %v6750_v51 = vsub.f32 %v3400_v17, %v3439_v36  ;;  %v3482_v6 = vadd.f32 %v3465_v41, %v3464_v11  ;;  %v3662_v36 = vld [vmem:[#allocation15 + $0xc8] sm:$0xff] }
 0xb99   : > { %v3425_v50 = vpop.xlane.xlu1 %3424 }
 0xb9a   : > { %v3466_v21 = vmul.f32 %v6748_v15, %v6748_v15  ;;  %v3467_v59 = vmul.f32 %v6750_v51, %v6750_v51  ;;  %v3440_v30 = vmul.f32 0.00390625, %v3425_v50  ;;  %3483 = vadd.xlane.f32.xlu1 %v3482_v6  ;;  %v3594_v50 = vld [vmem:[#allocation2] sm:$0x1] }
 0xb9b   : > { %5202 = vtanh.f32 %v3594_v50 }
 0xb9c   : > { %v6756_v0 = vsub.f32 %v3401_v48, %v3440_v30  ;;  %v6758_v1 = vsub.f32 %v3402_v52, %v3440_v30  ;;  %v3485_v5 = vadd.f32 %v3467_v59, %v3466_v21  ;;  %v3653_v48 = vld [vmem:[#allocation15 + $0x80] sm:$0xff]  ;;  %v4831_v30 = vpack.c.bf16 %v3662_v36, %v3661_v8 }
 0xb9d   : > { %v3428_v49 = vpop.xlane.xlu0 %3427  ;;  %v3637_v52 = vld [vmem:[#allocation15] sm:$0xff]  ;;  %v4815_v25 = vpack.c.bf16 %v3654_v53, %v3653_v48 }
 0xb9e   : > { %v3468_v9 = vmul.f32 %v6756_v0, %v6756_v0  ;;  %v3469_v14 = vmul.f32 %v6758_v1, %v6758_v1  ;;  %v3441_v37 = vmul.f32 0.00390625, %v3428_v49  ;;  %3486 = vadd.xlane.f32.xlu0 %v3485_v5  ;;  %v4817_v27 = vpack.c.bf16 %v3638_v47, %v3637_v52  ;;  %v3645_v5 = vld [vmem:[#allocation15 + $0x40] sm:$0xff]  ;;  %v3646_v49 = vld [vmem:[#allocation15 + $0x48] sm:$0xff] }
 0xb9f   : > { %4816 = vmatprep.subr.bf16.mxu0 %v4815_v25  ;;  %v3665_v25 = vld [vmem:[#allocation15 + $0xe0] sm:$0xff]  ;;  %v3666_v47 = vld [vmem:[#allocation15 + $0xe8] sm:$0xff] }
 0xba0   : > { %v6764_v18 = vsub.f32 %v3403_v42, %v3441_v37  ;;  %v6766_v55 = vsub.f32 %v3404_v61, %v3441_v37  ;;  %v3488_v7 = vadd.f32 %v3469_v14, %v3468_v9  ;;  %v3656_v42 = vld [vmem:[#allocation15 + $0x98] sm:$0xff]  ;;  %4818 = vmatpush3.bf16.msra.mxu0 %v4817_v27  ;;  %v3663_v9 = vld [vmem:[#allocation15 + $0xd0] sm:$0xff]  ;;  %v3650_v27 = vld [vmem:[#allocation15 + $0x68] sm:$0xff] }
 0xba1   : > { %v4819_v61 = vpack.c.bf16 %v3656_v42, %v3655_v54  ;;  %v3664_v14 = vld [vmem:[#allocation15 + $0xd8] sm:$0xff]  ;;  %v4839_v54 = vpack.c.bf16 %v3666_v47, %v3665_v25  ;;  %v3649_v42 = vld [vmem:[#allocation15 + $0x60] sm:$0xff] }
 0xba2   : > { %v3470_v17 = vmul.f32 %v6764_v18, %v6764_v18  ;;  %v3471_v23 = vmul.f32 %v6766_v55, %v6766_v55  ;;  %3489 = vadd.xlane.f32.xlu1 %v3488_v7 }
 0xba3   : > { %4820 = vmatprep.subr.bf16.mxu0 %v4819_v61  ;;  %v4841_v61 = vpack.c.bf16 %v3650_v27, %v3649_v42 }
 0xba4   : > { %v3491_v32 = vadd.f32 %v3471_v23, %v3470_v17  ;;  %4822 = vmatpush3.bf16.msra.mxu0 %v4821_v58  ;;  %v3647_v23 = vld [vmem:[#allocation15 + $0x50] sm:$0xff]  ;;  %v3652_v58 = vld [vmem:[#allocation15 + $0x78] sm:$0xff] }
 0xba5   : > { %4824 = vmatprep.subr.bf16.mxu0 %v4823_v13  ;;  %v5203_v53 = vpop.eup %5202  ;;  %v4845_v13 = vpack.c.bf16 %v3652_v58, %v3651_v20 }
 0xba6   : > { %3492 = vadd.xlane.f32.xlu0 %v3491_v32  ;;  %v3648_v32 = vld [vmem:[#allocation15 + $0x58] sm:$0xff]  ;;  %v3600_v52 = vrot.slane %v5203_v53, %v6096_v2 }
 0xba7   : > { %v4837_v48 = vpack.c.bf16 %v3648_v32, %v3647_v23 }
 0xba8   : > { %4826 = vmatpush3.bf16.msra.mxu0 %v4825_v35 }
 0xba9   : > { %4828 = vmatprep.subr.bf16.mxu0 %v4827_v28 }
 0xbbe   : > { %v3431_v29 = vpop.xlane.xlu1 %3430 }
 0xbbf   : > { %v3442_v57 = vmul.f32 0.00390625, %v3431_v29 }
 0xbc1   : > { %v6773_v33 = vsub.f32 %v6712_v56, %v3442_v57  ;;  %v6776_v31 = vsub.f32 %v6714_v40, %v3442_v57  ;;  %v4829_v56 = vpack.c.bf16 %v3644_v63, %v3643_v34 }
 0xbc2   : > { %v3434_v45 = vpop.xlane.xlu0 %3433 }
 0xbc3   : > { %v3472_v11 = vmul.f32 %v6773_v33, %v6773_v33  ;;  %v3473_v41 = vmul.f32 %v6776_v31, %v6776_v31  ;;  %v3443_v6 = vmul.f32 0.00390625, %v3434_v45  ;;  %4830 = vmatpush3.bf16.msra.mxu0 %v4829_v56 }
 0xbc4   : > { %4832 = vmatprep.subr.bf16.mxu0 %v4831_v30 }
 0xbc5   : > { %v6783_v40 = vsub.f32 %v6718_v60, %v3443_v6  ;;  %v6786_v21 = vsub.f32 %v6720_v12, %v3443_v6  ;;  %v3494_v59 = vadd.f32 %v3473_v41, %v3472_v11  ;;  %v4833_v60 = vpack.c.bf16 %v3646_v49, %v3645_v5 }
 0xbc6   : > { %v4835_v12 = vpack.c.bf16 %v3664_v14, %v3663_v9 }
 0xbc7   : > { %v3474_v37 = vmul.f32 %v6783_v40, %v6783_v40  ;;  %v3475_v7 = vmul.f32 %v6786_v21, %v6786_v21  ;;  %3495 = vadd.xlane.f32.xlu1 %v3494_v59  ;;  %4834 = vmatpush3.bf16.msra.mxu0 %v4833_v60  ;;  %v3409_v59 = vld [vmem:[%s7092_s16] sm:$0x3]  ;;  %s5484_s16 = sshll.u32 %s5599_s19, 4  ;;  %s5485_s16 = int_to_ptr.vmem [resolvable:$false] %s5484_s16 }
 0xbc8   : > { %4836 = vmatprep.subr.bf16.mxu0 %v4835_v12  ;;  %v6797_v9 = vrot.slane %v3409_v59, %v6096_v2  ;;  %v3410_v60 = vld [vmem:[%s7093_s11] sm:$0x3]  ;;  %s5486_s10 = scalar_lea.vmem %s5485_s16, 2048  ;;  %p5487_p5 = scmp.lt.s32.totalorder %s6946_s20, %s5485_s16 }
 0xbc9   : > { %v3497_v17 = vadd.f32 %v3475_v7, %v3474_v37  ;;  %v6802_v7 = vrot.slane %v3409_v59, %v6101_v3  ;;  %v6816_v53 = vrot.slane %v3410_v60, %v6101_v3  ;;  %v5239_v59 = vld [vmem:[%s6023_s17 + $0x10] sm:$0xff]  ;;  %p5488_p4 = scmp.lt.s32.totalorder %s5486_s10, %s5480_s1 }
 0xbcb   : > { %3498 = vadd.xlane.f32.xlu0 %v3497_v17  ;;  %4838 = vmatpush3.bf16.msra.mxu0 %v4837_v48  ;;  %p5489_p3 = por %p5488_p4, %p5487_p5 }
 0xbcc   : > { %4840 = vmatprep.subr.bf16.mxu0 %v4839_v54 }
 0xbcd   : > { %p5490_p10 = pnand %p5489_p3, %p5483_p1 }
 0xbcf   : > { %4842 = vmatpush3.bf16.msra.mxu0 %v4841_v61 }
 0xbd0   : > { %4844 = vmatprep.subr.bf16.mxu0 %v4843_v43 }
 0xbd3   : > { %4846 = vmatpush3.bf16.msra.mxu0 %v4845_v13 }
 0xbd8   : > { %3602 = vperm.xlu1 %5072, %v3600_v52  }
 0xc1f   : > { %v3478_v62 = vpop.xlane.xlu1 %3477 }
 0xc20   : > { %v3500_v29 = vmul.f32 0.00390625, %v3478_v62 }
 0xc22   : > { %v3508_v35 = vadd.f32 1e-05, %v3500_v29 }
 0xc23   : > { %v3481_v4 = vpop.xlane.xlu0 %3480 }
 0xc24   : > { %v3501_v26 = vmul.f32 0.00390625, %v3481_v4  ;;  %5204 = vrsqrt.f32 %v3508_v35  ;;  %v5237_v35 = vld [vmem:[%s6023_s17] sm:$0xff] }
 0xc26   : > { %v3509_v34 = vadd.f32 1e-05, %v3501_v26  ;;  %v5236_v26 = vld [vmem:[%s6023_s17 + $0x8] sm:$0xff] }
 0xc27   : > { %v3484_v44 = vpop.xlane.xlu1 %3483 }
 0xc28   : > { %v3502_v57 = vmul.f32 0.00390625, %v3484_v44  ;;  %5206 = vrsqrt.f32 %v3509_v34 }
 0xc2a   : > { %v3510_v63 = vadd.f32 1e-05, %v3502_v57 }
 0xc2b   : > { %v3487_v28 = vpop.xlane.xlu0 %3486 }
 0xc2c   : > { %v3503_v45 = vmul.f32 0.00390625, %v3487_v28  ;;  %5208 = vrsqrt.f32 %v3510_v63 }
 0xc2e   : > { %v3511_v36 = vadd.f32 1e-05, %v3503_v45  ;;  %v5205_v56 = vpop.eup %5204 }
 0xc2f   : > { %v3490_v8 = vpop.xlane.xlu1 %3489  ;;  %v3524_v14 = vmul.f32 %v5205_v56, %v6724_v46  ;;  %v3525_v37 = vmul.f32 %v5205_v56, %v6726_v19  ;;  %v6813_v19 = vrot.slane %v3410_v60, %v6096_v2 }
 0xc30   : > { %v3504_v11 = vmul.f32 0.00390625, %v3490_v8  ;;  %5210 = vrsqrt.f32 %v3511_v36  ;;  %v5238_v8 = vld [vmem:[%s6023_s17 + $0x18] sm:$0xff] }
 0xc31   : > { %v3551_v48 = vmul.f32 %v6797_v9, %v3524_v14  ;;  %v3552_v46 = vmul.f32 %v6802_v7, %v3525_v37 }
 0xc32   : > { %v3512_v6 = vadd.f32 1e-05, %v3504_v11  ;;  %v5207_v30 = vpop.eup %5206 }
 0xc33   : > { %v3493_v41 = vpop.xlane.xlu0 %3492  ;;  %v3527_v17 = vmul.f32 %v5207_v30, %v6734_v24  ;;  %v3526_v12 = vmul.f32 %v5207_v30, %v6732_v22  ;;  %v3579_v27 = vadd.f32 %v6816_v53, %v3552_v46  ;;  %v3578_v2 = vadd.f32 %v6813_v19, %v3551_v48 }
 0xc34   : > { %v3505_v50 = vmul.f32 0.00390625, %v3493_v41  ;;  %5212 = vrsqrt.f32 %v3512_v6 }
 0xc35   : > { %v3554_v25 = vmul.f32 %v6802_v7, %v3527_v17  ;;  %v3553_v24 = vmul.f32 %v6797_v9, %v3526_v12 }
 0xc36   : > { %v3513_v5 = vadd.f32 1e-05, %v3505_v50  ;;  %v5209_v49 = vpop.eup %5208 }
 0xc37   : > { %v3529_v23 = vmul.f32 %v5209_v49, %v6742_v16  ;;  %v3528_v22 = vmul.f32 %v5209_v49, %v6740_v39  ;;  %v3581_v10 = vadd.f32 %v6816_v53, %v3554_v25  ;;  %v3580_v39 = vadd.f32 %v6813_v19, %v3553_v24  ;;  %v5240_v49 = vld [vmem:[%s6023_s17 + $0x28] sm:$0xff]  ;;  %v5242_v24 = vld [vmem:[%s6023_s17 + $0x38] sm:$0xff] }
 0xc38   : > { %5214 = vrsqrt.f32 %v3513_v5 }
 0xc39   : > { %v3556_v16 = vmul.f32 %v6802_v7, %v3529_v23  ;;  %v3555_v43 = vmul.f32 %v6797_v9, %v3528_v22 }
 0xc3a   : > { %v5211_v32 = vpop.eup %5210 }
 0xc3b   : > { %v3531_v54 = vmul.f32 %v5211_v32, %v6750_v51  ;;  %v3583_v62 = vadd.f32 %v6816_v53, %v3556_v16  ;;  %v3530_v29 = vmul.f32 %v5211_v32, %v6748_v15  ;;  %v3582_v41 = vadd.f32 %v6813_v19, %v3555_v43  ;;  %v5241_v32 = vld [vmem:[%s6023_s17 + $0x20] sm:$0xff] }
 0xc3d   : > { %v3558_v4 = vmul.f32 %v6802_v7, %v3531_v54  ;;  %v3557_v6 = vmul.f32 %v6797_v9, %v3530_v29 }
 0xc3e   : > { %v5213_v3 = vpop.eup %5212 }
 0xc3f   : > { %v3533_v34 = vmul.f32 %v5213_v3, %v6758_v1  ;;  %v3532_v15 = vmul.f32 %v5213_v3, %v6756_v0  ;;  %v3585_v1 = vadd.f32 %v6816_v53, %v3558_v4  ;;  %v3584_v60 = vadd.f32 %v6813_v19, %v3557_v6  ;;  %v5251_v6 = vld [vmem:[%s6023_s17 + $0x70] sm:$0xff] }
 0xc41   : > { %v3560_v50 = vmul.f32 %v6802_v7, %v3533_v34  ;;  %v3559_v37 = vmul.f32 %v6797_v9, %v3532_v15 }
 0xc42   : > { %v5215_v63 = vpop.eup %5214 }
 0xc43   : > { %v3535_v56 = vmul.f32 %v5215_v63, %v6766_v55  ;;  %v3534_v17 = vmul.f32 %v5215_v63, %v6764_v18  ;;  %v3587_v55 = vadd.f32 %v6816_v53, %v3560_v50 }
 0xc45   : > { %v3562_v23 = vmul.f32 %v6802_v7, %v3535_v56  ;;  %v3561_v16 = vmul.f32 %v6797_v9, %v3534_v17 }
 0xc54   : > { %v3496_v52 = vpop.xlane.xlu1 %3495 }
 0xc55   : > { %v3506_v47 = vmul.f32 0.00390625, %v3496_v52 }
 0xc57   : > { %v3514_v42 = vadd.f32 1e-05, %v3506_v47  ;;  %v3586_v47 = vadd.f32 %v6813_v19, %v3559_v37 }
 0xc58   : > { %v6825_v61 = vpop.permute.xlu1 %3602  ;;  %v3499_v38 = vpop.xlane.xlu0 %3498 }
 0xc59   : > { %5216 = vrsqrt.f32 %v3514_v42  ;;  %v3507_v20 = vmul.f32 0.00390625, %v3499_v38  ;;  %v3606_v51 = vmul.f32 %v6825_v61, %v3579_v27  ;;  %v3605_v58 = vmul.f32 %v6825_v61, %v3578_v2 }
 0xc5a   : > { %v3608_v13 = vmul.f32 %v6825_v61, %v3581_v10  ;;  %v3607_v45 = vmul.f32 %v6825_v61, %v3580_v39  ;;  %v3610_v11 = vmul.f32 %v6825_v61, %v3583_v62  ;;  %v3609_v5 = vmul.f32 %v6825_v61, %v3582_v41  ;;  %v5244_v39 = vld [vmem:[%s6023_s17 + $0x48] sm:$0xff]  ;;  %v5245_v62 = vld [vmem:[%s6023_s17 + $0x40] sm:$0xff] }
 0xc5b   : > { %v3515_v44 = vadd.f32 1e-05, %v3507_v20  ;;  %v3622_v57 = vadd.f32 %v5236_v26, %v3606_v51  ;;  %v3621_v28 = vadd.f32 %v5237_v35, %v3605_v58  ;;  %v3612_v14 = vmul.f32 %v6825_v61, %v3585_v1 }
 0xc5c   : > { %v3624_v36 = vadd.f32 %v5238_v8, %v3608_v13  ;;  %v3623_v30 = vadd.f32 %v5239_v59, %v3607_v45  ;;  %v3626_v0 = vadd.f32 %v5240_v49, %v3610_v11  ;;  %v3625_v48 = vadd.f32 %v5241_v32, %v3609_v5  ;;  %v5248_v45 = vld [vmem:[%s6023_s17 + $0x68] sm:$0xff] }
 0xc5d   : > { %5218 = vrsqrt.f32 %v3515_v44  ;;  %3733 = vmatprep.mubr.f32.mxu0 %v3622_v57  ;;  %v3611_v46 = vmul.f32 %v6825_v61, %v3584_v60  ;;  %v3628_v22 = vadd.f32 %v5242_v24, %v3612_v14  ;;  %v3614_v18 = vmul.f32 %v6825_v61, %v3587_v55  ;;  %v5246_v44 = vld [vmem:[%s6023_s17 + $0x58] sm:$0xff] }
 0xc5e   : > { %3734 = vmatmul.mubr.f32.vlgmr.msra.gmra.mrb[64].mxu0 %v3621_v28  ;;  %v3613_v27 = vmul.f32 %v6825_v61, %v3586_v47  ;;  %v3588_v58 = vadd.f32 %v6813_v19, %v3561_v16 }
 0xc5f   : > { %3738 = vmatprep.mubr.f32.mxu0 %v3624_v36  ;;  %v3630_v43 = vadd.f32 %v5244_v39, %v3614_v18  ;;  %v5249_v36 = vld [vmem:[%s6023_s17 + $0x60] sm:$0xff] }
 0xc60   : > { %v3629_v4 = vadd.f32 %v5245_v62, %v3613_v27 }
 0xc62   : > { %3739 = vmatmul.mubr.f32.gmra.mrb[66].mxu0 %v3623_v30 }
 0xc63   : > { %v5217_v12 = vpop.eup %5216  ;;  %3743 = vmatprep.mubr.f32.mxu0 %v3626_v0 }
 0xc64   : > { %v3537_v52 = vmul.f32 %v5217_v12, %v6776_v31  ;;  %v3536_v25 = vmul.f32 %v5217_v12, %v6773_v33  ;;  %v3589_v31 = vadd.f32 %v6816_v53, %v3562_v23  ;;  %v5243_v33 = vld [vmem:[%s6023_s17 + $0x30] sm:$0xff] }
 0xc65   : > { %v3627_v2 = vadd.f32 %v5243_v33, %v3611_v46 }
 0xc66   : > { %3744 = vmatmul.mubr.f32.gmra.mrb[68].mxu0 %v3625_v48  ;;  %v3564_v54 = vmul.f32 %v6802_v7, %v3537_v52  ;;  %v3563_v3 = vmul.f32 %v6797_v9, %v3536_v25  ;;  %v3616_v20 = vmul.f32 %v6825_v61, %v3589_v31 }
 0xc67   : > { %v5219_v42 = vpop.eup %5218  ;;  %3748 = vmatprep.mubr.f32.mxu0 %v3628_v22 }
 0xc68   : > { %v3539_v38 = vmul.f32 %v5219_v42, %v6786_v21  ;;  %v3538_v10 = vmul.f32 %v5219_v42, %v6783_v40  ;;  %v3591_v51 = vadd.f32 %v6816_v53, %v3564_v54  ;;  %v3615_v21 = vmul.f32 %v6825_v61, %v3588_v58 }
 0xc69   : > { %v3590_v40 = vadd.f32 %v6813_v19, %v3563_v3  ;;  %v3632_v26 = vadd.f32 %v5246_v44, %v3616_v20 }
 0xc6a   : > { %3749 = vmatmul.mubr.f32.gmra.mrb[70].mxu0 %v3627_v2  ;;  %v3566_v13 = vmul.f32 %v6802_v7, %v3539_v38  ;;  %v3565_v29 = vmul.f32 %v6797_v9, %v3538_v10  ;;  %v3618_v57 = vmul.f32 %v6825_v61, %v3591_v51  ;;  %v5247_v7 = vld [vmem:[%s6023_s17 + $0x50] sm:$0xff] }
 0xc6b   : > { %3753 = vmatprep.mubr.f32.mxu0 %v3630_v43  ;;  %v3631_v28 = vadd.f32 %v5247_v7, %v3615_v21  ;;  %v3617_v34 = vmul.f32 %v6825_v61, %v3590_v40 }
 0xc6c   : > { %v3593_v35 = vadd.f32 %v6816_v53, %v3566_v13  ;;  %v3592_v63 = vadd.f32 %v6813_v19, %v3565_v29  ;;  %v3634_v8 = vadd.f32 %v5248_v45, %v3618_v57  ;;  %v5250_v53 = vld [vmem:[%s6023_s17 + $0x78] sm:$0xff] }
 0xc6d   : > { %v3633_v11 = vadd.f32 %v5249_v36, %v3617_v34 }
 0xc6e   : > { %3754 = vmatmul.mubr.f32.gmra.mrb[72].mxu0 %v3629_v4  ;;  %v3620_v9 = vmul.f32 %v6825_v61, %v3593_v35  ;;  %v3619_v15 = vmul.f32 %v6825_v61, %v3592_v63 }
 0xc6f   : > { %3758 = vmatprep.mubr.f32.mxu0 %v3632_v26 }
 0xc70   : > { %v3636_v41 = vadd.f32 %v5250_v53, %v3620_v9  ;;  %v3635_v1 = vadd.f32 %v5251_v6, %v3619_v15 }
 0xc72   : > { %3759 = vmatmul.mubr.f32.gmra.mrb[74].mxu0 %v3631_v28 }
 0xc73   : > { %3763 = vmatprep.mubr.f32.mxu0 %v3634_v8 }
 0xc76   : > { %3764 = vmatmul.mubr.f32.gmra.mrb[76].mxu0 %v3633_v11 }
 0xc77   : > { %3768 = vmatprep.mubr.f32.mxu0 %v3636_v41 }
 0xc7a   : > { %3769 = vmatmul.mubr.f32.gmra.mrb[78].mxu0 %v3635_v1 }
 0xd31   : > { %v4359_v50 = vpop.f32.mrb[64].mxu0 }
 0xd32   : > { %v4360_v56 = vpop.f32.mrb[65].mxu0 }
 0xd33   : > { %v4361_v19 = vadd.f32 %v4360_v56, %v4359_v50 }
 0xd35   : > { %3776 = vadd.xlane.f32.xlu0 %v4361_v19  ;;  %v4362_v59 = vpop.f32.mrb[66].mxu0 }
 0xd36   : > { %v4363_v30 = vpop.f32.mrb[67].mxu0 }
 0xd37   : > { %v4364_v5 = vadd.f32 %v4363_v30, %v4362_v59  ;;  %v4221_v30 = vld [vmem:[%s7094_s18] ss:$0 sm:$0xff] }
 0xd39   : > { %v4365_v49 = vpop.f32.mrb[68].mxu0  ;;  %3778 = vadd.xlane.f32.xlu0 %v4364_v5 }
 0xd3a   : > { %v4366_v0 = vpop.f32.mrb[69].mxu0 }
 0xd3b   : > { %v4367_v14 = vadd.f32 %v4366_v0, %v4365_v49 }
 0xd3d   : > { %3780 = vadd.xlane.f32.xlu0 %v4367_v14  ;;  %v4368_v61 = vpop.f32.mrb[70].mxu0 }
 0xd3e   : > { %v4369_v37 = vpop.f32.mrb[71].mxu0 }
 0xd3f   : > { %v4370_v60 = vadd.f32 %v4369_v37, %v4368_v61 }
 0xd41   : > { %v4371_v17 = vpop.f32.mrb[72].mxu0  ;;  %3782 = vadd.xlane.f32.xlu0 %v4370_v60 }
 0xd42   : > { %v4372_v12 = vpop.f32.mrb[73].mxu0 }
 0xd43   : > { %v4373_v55 = vadd.f32 %v4372_v12, %v4371_v17 }
 0xd45   : > { %3784 = vadd.xlane.f32.xlu1 %v4373_v55  ;;  %v4374_v23 = vpop.f32.mrb[74].mxu0 }
 0xd46   : > { %v4375_v32 = vpop.f32.mrb[75].mxu0 }
 0xd47   : > { %v4376_v48 = vadd.f32 %v4375_v32, %v4374_v23 }
 0xd49   : > { %v4377_v46 = vpop.f32.mrb[76].mxu0  ;;  %3786 = vadd.xlane.f32.xlu0 %v4376_v48 }
 0xd4a   : > { %v4378_v52 = vpop.f32.mrb[77].mxu0 }
 0xd4b   : > { %v4379_v25 = vadd.f32 %v4378_v52, %v4377_v46 }
 0xd4d   : > { %3788 = vadd.xlane.f32.xlu0 %v4379_v25  ;;  %v4380_v24 = vpop.f32.mrb[78].mxu0 }
 0xd4e   : > { %v4381_v22 = vpop.f32.mrb[79].mxu0 }
 0xd4f   : > { %v4382_v18 = vadd.f32 %v4381_v22, %v4380_v24 }
 0xd51   : > { %3790 = vadd.xlane.f32.xlu0 %v4382_v18 }
 0xdc2   : > { %v3777_v47 = vpop.xlane.xlu0 %3776 }
 0xdc3   : > { %v3793_v16 = vmul.f32 0.0078125, %v3777_v47 }
 0xdc5   : > { %v3801_v54 = vsub.f32 %v4361_v19, %v3793_v16 }
 0xdc6   : > { %v3779_v42 = vpop.xlane.xlu0 %3778 }
 0xdc7   : > { %v3794_v27 = vmul.f32 0.0078125, %v3779_v42  ;;  %v3809_v31 = vmul.f32 %v3801_v54, %v3801_v54 }
 0xdc9   : > { %v3802_v33 = vsub.f32 %v4364_v5, %v3794_v27  ;;  %3817 = vadd.xlane.f32.xlu0 %v3809_v31 }
 0xdca   : > { %v3781_v2 = vpop.xlane.xlu0 %3780 }
 0xdcb   : > { %v3795_v3 = vmul.f32 0.0078125, %v3781_v2  ;;  %v3810_v38 = vmul.f32 %v3802_v33, %v3802_v33 }
 0xdcd   : > { %v6893_v10 = vsub.f32 %v4367_v14, %v3795_v3  ;;  %3819 = vadd.xlane.f32.xlu0 %v3810_v38  ;;  %v4222_v14 = vld [vmem:[%s7095_s8] ss:$0 sm:$0xff] }
 0xdce   : > { %v3783_v39 = vpop.xlane.xlu0 %3782 }
 0xdcf   : > { %v3796_v43 = vmul.f32 0.0078125, %v3783_v39  ;;  %v3811_v20 = vmul.f32 %v6893_v10, %v6893_v10 }
 0xdd1   : > { %v6897_v51 = vsub.f32 %v4370_v60, %v3796_v43  ;;  %3821 = vadd.xlane.f32.xlu0 %v3811_v20 }
 0xdd2   : > { %v3785_v58 = vpop.xlane.xlu1 %3784 }
 0xdd3   : > { %v3797_v13 = vmul.f32 0.0078125, %v3785_v58  ;;  %v3812_v62 = vmul.f32 %v6897_v51, %v6897_v51 }
 0xdd5   : > { %v6901_v4 = vsub.f32 %v4373_v55, %v3797_v13  ;;  %3823 = vadd.xlane.f32.xlu0 %v3812_v62 }
 0xdd6   : > { %v3787_v21 = vpop.xlane.xlu0 %3786 }
 0xdd7   : > { %v3798_v40 = vmul.f32 0.0078125, %v3787_v21  ;;  %v3813_v29 = vmul.f32 %v6901_v4, %v6901_v4 }
 0xdd9   : > { %v6905_v44 = vsub.f32 %v4376_v48, %v3798_v40  ;;  %3825 = vadd.xlane.f32.xlu0 %v3813_v29 }
 0xdda   : > { %v3789_v26 = vpop.xlane.xlu0 %3788 }
 0xddb   : > { %v3799_v57 = vmul.f32 0.0078125, %v3789_v26  ;;  %v3814_v35 = vmul.f32 %v6905_v44, %v6905_v44 }
 0xddd   : > { %v6909_v7 = vsub.f32 %v4379_v25, %v3799_v57  ;;  %3827 = vadd.xlane.f32.xlu0 %v3814_v35 }
 0xdde   : > { %v3791_v28 = vpop.xlane.xlu0 %3790 }
 0xddf   : > { %v3800_v34 = vmul.f32 0.0078125, %v3791_v28  ;;  %v3815_v63 = vmul.f32 %v6909_v7, %v6909_v7 }
 0xde1   : > { %v6913_v45 = vsub.f32 %v4382_v18, %v3800_v34  ;;  %3829 = vadd.xlane.f32.xlu1 %v3815_v63 }
 0xde3   : > { %v3816_v8 = vmul.f32 %v6913_v45, %v6913_v45 }
 0xde5   : > { %3831 = vadd.xlane.f32.xlu0 %v3816_v8 }
 0xe56   : > { %v3818_v9 = vpop.xlane.xlu0 %3817 }
 0xe57   : > { %v3833_v36 = vmul.f32 0.0078125, %v3818_v9 }
 0xe59   : > { %v3841_v11 = vadd.f32 1e-05, %v3833_v36 }
 0xe5a   : > { %v3820_v15 = vpop.xlane.xlu0 %3819 }
 0xe5b   : > { %5220 = vrsqrt.f32 %v3841_v11  ;;  %v3834_v53 = vmul.f32 0.0078125, %v3820_v15 }
 0xe5d   : > { %v3842_v41 = vadd.f32 1e-05, %v3834_v53 }
 0xe5e   : > { %v3822_v6 = vpop.xlane.xlu0 %3821 }
 0xe5f   : > { %5222 = vrsqrt.f32 %v3842_v41  ;;  %v3835_v1 = vmul.f32 0.0078125, %v3822_v6 }
 0xe61   : > { %v3843_v50 = vadd.f32 1e-05, %v3835_v1 }
 0xe62   : > { %v3824_v56 = vpop.xlane.xlu0 %3823 }
 0xe63   : > { %5224 = vrsqrt.f32 %v3843_v50  ;;  %v3836_v19 = vmul.f32 0.0078125, %v3824_v56 }
 0xe65   : > { %v5221_v59 = vpop.eup %5220  ;;  %v3844_v5 = vadd.f32 1e-05, %v3836_v19 }
 0xe66   : > { %v3857_v49 = vmul.f32 %v5221_v59, %v3801_v54  ;;  %v3826_v0 = vpop.xlane.xlu0 %3825 }
 0xe67   : > { %5226 = vrsqrt.f32 %v3844_v5  ;;  %v3837_v61 = vmul.f32 0.0078125, %v3826_v0 }
 0xe68   : > { %v3871_v37 = vmul.f32 %v4221_v30, %v3857_v49 }
 0xe69   : > { %v5223_v60 = vpop.eup %5222  ;;  %v3845_v17 = vadd.f32 1e-05, %v3837_v61 }
 0xe6a   : > { %v3885_v12 = vadd.f32 %v4222_v14, %v3871_v37  ;;  %v3858_v55 = vmul.f32 %v5223_v60, %v3802_v33  ;;  %v3828_v23 = vpop.xlane.xlu0 %3827 }
 0xe6b   : > { %5228 = vrsqrt.f32 %v3845_v17  ;;  %v3838_v32 = vmul.f32 0.0078125, %v3828_v23 }
 0xe6c   : > { %3893 = vst [vmem:[%s6924_s25] sm:$0xff] %v3885_v12  ;;  %v3872_v48 = vmul.f32 %v4221_v30, %v3858_v55 }
 0xe6d   : > { %v5225_v46 = vpop.eup %5224  ;;  %v3846_v52 = vadd.f32 1e-05, %v3838_v32 }
 0xe6e   : > { %v3886_v25 = vadd.f32 %v4222_v14, %v3872_v48  ;;  %v3859_v24 = vmul.f32 %v5225_v46, %v6893_v10  ;;  %v3830_v22 = vpop.xlane.xlu1 %3829 }
 0xe6f   : > { %5230 = vrsqrt.f32 %v3846_v52  ;;  %v3839_v18 = vmul.f32 0.0078125, %v3830_v22 }
 0xe70   : > { %3894 = vst [vmem:[%s6924_s25 + $0x8] sm:$0xff] %v3886_v25  ;;  %v3873_v47 = vmul.f32 %v4221_v30, %v3859_v24 }
 0xe71   : > { %v5227_v16 = vpop.eup %5226  ;;  %v3847_v54 = vadd.f32 1e-05, %v3839_v18 }
 0xe72   : > { %v3887_v42 = vadd.f32 %v4222_v14, %v3873_v47  ;;  %v3860_v27 = vmul.f32 %v5227_v16, %v6897_v51  ;;  %v3832_v31 = vpop.xlane.xlu0 %3831 }
 0xe73   : > { %5232 = vrsqrt.f32 %v3847_v54  ;;  %v3840_v33 = vmul.f32 0.0078125, %v3832_v31 }
 0xe74   : > { %3895 = vst [vmem:[%s6924_s25 + $0x10] sm:$0xff] %v3887_v42  ;;  %v3874_v2 = vmul.f32 %v4221_v30, %v3860_v27 }
 0xe75   : > { %v5229_v3 = vpop.eup %5228  ;;  %v3848_v38 = vadd.f32 1e-05, %v3840_v33 }
 0xe76   : > { %v3888_v10 = vadd.f32 %v4222_v14, %v3874_v2  ;;  %v3861_v39 = vmul.f32 %v5229_v3, %v6901_v4 }
 0xe77   : > { %5234 = vrsqrt.f32 %v3848_v38 }
 0xe78   : > { %3896 = vst [vmem:[%s6924_s25 + $0x18] sm:$0xff] %v3888_v10  ;;  %v3875_v43 = vmul.f32 %v4221_v30, %v3861_v39 }
 0xe79   : > { %v5231_v20 = vpop.eup %5230 }
 0xe7a   : > { %v3889_v51 = vadd.f32 %v4222_v14, %v3875_v43  ;;  %v3862_v58 = vmul.f32 %v5231_v20, %v6905_v44 }
 0xe7c   : > { %3897 = vst [vmem:[%s6924_s25 + $0x20] sm:$0xff] %v3889_v51  ;;  %v3876_v13 = vmul.f32 %v4221_v30, %v3862_v58 }
 0xe7d   : > { %v5233_v62 = vpop.eup %5232 }
 0xe7e   : > { %v3890_v21 = vadd.f32 %v4222_v14, %v3876_v13  ;;  %v3863_v40 = vmul.f32 %v5233_v62, %v6909_v7 }
 0xe80   : > { %3898 = vst [vmem:[%s6924_s25 + $0x28] sm:$0xff] %v3890_v21  ;;  %v3877_v4 = vmul.f32 %v4221_v30, %v3863_v40 }
 0xe81   : > { %v5235_v29 = vpop.eup %5234 }
 0xe82   : > { %v3891_v26 = vadd.f32 %v4222_v14, %v3877_v4  ;;  %v3864_v57 = vmul.f32 %v5235_v29, %v6913_v45 }
 0xe84   : > { %3899 = vst [vmem:[%s6924_s25 + $0x30] sm:$0xff] %v3891_v26  ;;  %v3878_v35 = vmul.f32 %v4221_v30, %v3864_v57 }
 0xe86   : > { %v3892_v44 = vadd.f32 %v4222_v14, %v3878_v35 }
 0xe88   : > { %3900 = vst [vmem:[%s6924_s25 + $0x38] sm:$0xff] %v3892_v44 }
 0xe89   : > { %5493 = shalt.err (!%p5490_p10)
}
 0xe8a   : > { %s5494_s29 = scalar_lea.hbm %s6944_s4, 1024  ;;  %s5498_s17 = scalar_lea.hbm %s7097_s15, 2048 }
 0xe8b   : > { %p5495_p11 = scmp.ne.s32.totalorder %s6944_s4, %s5494_s29  ;;  %p5499_p7 = scmp.lt.u32.totalorder %s6944_s4, %s7097_s15 }
 0xe8c   : > { %p5500_p9 = scmp.lt.u32.totalorder %s5498_s17, %s5494_s29  ;;  %p5502_p2 = scmp.lt.u32.totalorder %s5494_s29, %s6944_s4 }
 0xe8d   : > { %p5496_p0 = pnand %p5495_p11, %p7098_p12 }
 0xe8e   : > { %p5501_p8 = por %p5500_p9, %p5499_p7 }
 0xe8f   : > { %p5497_p13 = pneg %p5496_p0 }
 0xe90   : > { %p5503_p6 = por %p5502_p2, %p5501_p8 }
 0xe92   : > { %p5504_p1 = pnand %p5503_p6, %p5497_p13 }
 0xe94   : > { %5507 = shalt.err (!%p5504_p1)
}
 0xe95   : > { %s5600_s13 = smov 128   ;;  %s5601_s24 = smov 8  }
 0xe96   : > { %4923 = dma.vmem_to_hbm [thread:$0]  (%p7098_p12), %s6946_s20, 1024, %s6944_s4, %s3902_s22, %s5600_s13, %s5600_s13, %s5601_s24  }
 0xe97 PF: > { %s7099_s8 = sld [smem:[#allocation24_spill]]  ;;  %s7100_s25 = sld [smem:[#allocation30_spill]] }
 0xe98   : > { %s7101_s23 = sld [smem:[#allocation27_spill]] }
 0xe9d   : > { %s3932_s28 = sand.u32 1, %s7099_s8   ;;  %p7102_p5 = scmp.ne.s32.totalorder %s7100_s25, 0 }
 0xe9e   : > { %p7103_p4 = scmp.ge.s32.totalorder %s7101_s23, 2  ;;  %s3933_s30 = scalar_lea.sflag [#allocation5], %s3932_s28 }
 0xea0   : > { %p4952_p3 = pnand %p7103_p4, %p7102_p5 }
 0xea2   : > { %5557 = dma.done.wait (!%p4952_p3), %s3933_s30, 1024  }
 0xea3   : > { %5559 = vsyncadd (!%p4952_p3), %s3933_s30, 4294966272  ;;  %s38_s30 = sadd.s32 1, %s7101_s23   ;;  %s7104_s1 = sld [smem:[#allocation25_spill]] }
 0xea4   : > { %p35_p10 = scmp.ge.s32.totalorder %s38_s30, 4   ;;  %s7105_s28 = sld [smem:[#allocation29_spill]] }
 0xea5   : > { %s7106_s21 = sld [smem:[#allocation28_spill]]  ;;  %s7107_s26 = smov %s5566_s27 }
 0xea6   : > { %s7109_s29 = smov %s5578_s0  ;;  %37 = sbr.rel (!%p35_p10) target bundleno = 22 (0x16), region = 169 }
 0xea9   : > { %s7108_s27 = smov %s7104_s1 }
 0xeab   : > { %s7110_s0 = smov %s7106_s21 }
 0xead   :  { %3938 = vsyncpa [#allocation4], 1 }
 0xeae   :  { %3940 = vsyncpa [#allocation4 + $0x1], 1 }
 0xeaf   :  { %3941 = vsyncpa [#allocation7], 1 }
 0xeb0   :  { %3942 = vsyncpa [#allocation11], 1 }
 0xeb1   :  { %3943 = vsyncpa [#allocation14], 1 }
 0xeb2   :  { %3944 = vsyncpa [#allocation5], 1 }
 0xeb3   :  { %3946 = vsyncpa [#allocation5 + $0x1], 1 }

</bundles_post_ra>
